<compile_context>
chip_gen: v7x
topology: tpu7x:2x2x1
jax: 0.10.0
libtpu: 0.0.40
codegen_flags: <defaults>
</compile_context>

<pallas_src>
import jax
import jax.numpy as jnp
from jax import lax
from jax.experimental import pallas as pl
from jax.experimental.pallas import tpu as pltpu

_IMGS_PER_BLOCK = 8   # images (frames / audio samples) per grid step; multiple of 8.
                      # Raise for realistic frame counts to amortize per-step overhead.


def _round_up(x, m):
    return ((x + m - 1) // m) * m


# ----------------------------------------------------------------------------
# Pallas kernel: fused 3x3 SAME conv (9 rolled matmuls) + bias + ReLU
#                + in-kernel mean pool (MXU) + linear head
# ----------------------------------------------------------------------------
def _make_encoder_kernel(c_in, c_mid, d, h, w, t_blk, img_stride, m_blk):
    wp = w + 2
    inv_wp = 1.0 / float(wp)
    inv_hw = 1.0 / float(h * w)

    def kernel(x_ref, wtap_ref, bconv_ref, whead_ref, bhead_ref, out_ref, acc_ref):
        # x_ref:     (c_in, m_blk)     bf16  t_blk zero-padded images, flat (h+2)*(w+2) (+ tail pad)
        # wtap_ref:  (9, c_mid, c_in)  bf16  conv weight, one (c_mid, c_in) matrix per 3x3 tap
        # bconv_ref: (c_mid, 1)        f32
        # whead_ref: (d, c_mid)        bf16
        # bhead_ref: (1, d)            f32
        # out_ref:   (t_blk, d)        f32
        # acc_ref:   (c_mid, m_blk)    f32   conv accumulator (VMEM scratch)
        xb = x_ref[...].astype(jnp.float32)

        acc_ref[...] = jnp.zeros_like(acc_ref)
        for tap in range(9):                                   # static unroll: 9 shifted matmuls
            dy = tap // 3 - 1
            dx = tap % 3 - 1
            s = dy * wp + dx                                   # flat read offset of this tap
            xs = xb if s == 0 else pltpu.roll(xb, shift=(-s) % m_blk, axis=1)
            w_t = wtap_ref[tap]                                # (c_mid, c_in) bf16
            if c_in == 1:
                # contraction depth 1 -> broadcast outer product on the VPU, not a K=1 MXU matmul
                acc_ref[...] += w_t.astype(jnp.float32) * xs
            else:
                acc_ref[...] += jnp.dot(w_t, xs.astype(jnp.bfloat16),
                                        preferred_element_type=jnp.float32)
        # Roll-wrap lanes and halo/tail positions only ever hit spatial positions that the pool
        # matrix below zeroes out, so the conv result needs no extra masking.

        act = jnp.maximum(acc_ref[...] + bconv_ref[...], 0.0)  # bias + ReLU, f32 on the VPU

        # In-kernel block-diagonal pool/validity matrix (t_blk, m_blk), entries {0.0, 1.0}.
        # i = q // (w+2), j = q % (w+2) via an exact-in-range f32 floor-divide (no int vector div).
        lane = lax.broadcasted_iota(jnp.int32, (t_blk, m_blk), 1).astype(jnp.float32)
        row = lax.broadcasted_iota(jnp.int32, (t_blk, m_blk), 0).astype(jnp.float32)
        q = lane - row * float(img_stride)     # offset inside image `row` (out of range otherwise)
        i = jnp.floor((q + 0.5) * inv_wp)
        j = q - i * float(wp)
        valid = (i >= 1.0) & (i <= float(h)) & (j >= 1.0) & (j <= float(w))
        pool = jnp.where(valid, 1.0, 0.0).astype(jnp.float32)

        # Per-image spatial sum on the MXU (A @ B.T pattern), mean applied afterwards in f32.
        pooled = lax.dot_general(pool, act, (((1,), (1,)), ((), ())),
                                 preferred_element_type=jnp.float32) * inv_hw   # (t_blk, c_mid)

        # Linear head, bf16 operands with f32 accumulation; rows come out directly as (N, D).
        out = lax.dot_general(pooled.astype(jnp.bfloat16), whead_ref[...],
                              (((1,), (1,)), ((), ())),
                              preferred_element_type=jnp.float32)               # (t_blk, d)
        out_ref[...] = out + bhead_ref[...]

    return kernel


# ----------------------------------------------------------------------------
# XLA glue: one pass over the input (halo pad + flatten + channels-to-sublanes, bf16)
# ----------------------------------------------------------------------------
@jax.jit
def _encode_jit(x, wtap, bconv, whead, bhead):
    """Synthetic encoder forward: NCHW f32 -> (N, D) f32 features, one pipelined Pallas launch."""
    n, c, h, w = x.shape
    t_blk = _IMGS_PER_BLOCK
    img = (h + 2) * (w + 2)
    img_stride = _round_up(img, max(128 // t_blk, 8))   # t_blk * img_stride is a multiple of 128
    m_blk = t_blk * img_stride
    assert m_blk % 128 == 0 and t_blk % 8 == 0
    n_pad = _round_up(n, t_blk)

    c_mid = wtap.shape[1]
    d = whead.shape[0]

    # Zero halo for SAME conv, flat spatial + tail pad, channels onto the sublane axis, bf16.
    # ~1.3x the raw input bytes instead of the previous 9x im2col expansion + pool matrix.
    xp = jnp.pad(x, ((0, n_pad - n), (0, 0), (1, 1), (1, 1)))
    xp = xp.reshape(n_pad, c, img)
    xp = jnp.pad(xp, ((0, 0), (0, 0), (0, img_stride - img)))
    xflat = jnp.transpose(xp, (1, 0, 2)).reshape(c, n_pad * img_stride).astype(jnp.bfloat16)

    kernel = _make_encoder_kernel(c, c_mid, d, h, w, t_blk, img_stride, m_blk)

    grid = (n_pad // t_blk,)
    flops = 2 * n_pad * img_stride * c_mid * (9 * c + 2) + 2 * n_pad * c_mid * d
    bytes_accessed = (xflat.size * 2 + wtap.size * 2 + bconv.size * 4
                      + whead.size * 2 + bhead.size * 4 + n_pad * d * 4)

    out = pl.pallas_call(
        kernel,
        out_shape=jax.ShapeDtypeStruct((n_pad, d), jnp.float32),
        grid=grid,
        in_specs=[
            pl.BlockSpec((c, m_blk), lambda i: (0, i)),        # image block: pipelined over grid
            pl.BlockSpec((9, c_mid, c), lambda i: (0, 0, 0)),  # weights: constant block index
            pl.BlockSpec((c_mid, 1), lambda i: (0, 0)),
            pl.BlockSpec((d, c_mid), lambda i: (0, 0)),
            pl.BlockSpec((1, d), lambda i: (0, 0)),
        ],
        out_specs=pl.BlockSpec((t_blk, d), lambda i: (i, 0)),
        scratch_shapes=[pltpu.VMEM((c_mid, m_blk), jnp.float32)],
        compiler_params=pltpu.CompilerParams(dimension_semantics=("parallel",)),
        cost_estimate=pl.CostEstimate(flops=flops, transcendentals=0,
                                      bytes_accessed=bytes_accessed),
    )(xflat, wtap, bconv, whead, bhead)
    return out[:n]


def encode(x, params):
    return _encode_jit(x.astype(jnp.float32), *params)


def init_encoder_params(key, c_in, c_mid, d):
    # TODO(synk): the real module loads pretrained ResNet backbones from .pth checkpoints;
    # weights here are synthetic but keep the conv3x3 + ReLU + GAP + linear structure.
    k1, k2, k3, k4 = jax.random.split(key, 4)
    wtap = (jax.random.normal(k1, (9, c_mid, c_in), jnp.float32) * 0.05).astype(jnp.bfloat16)
    bconv = jax.random.normal(k2, (c_mid, 1), jnp.float32) * 0.01
    whead = (jax.random.normal(k3, (d, c_mid), jnp.float32) * 0.05).astype(jnp.bfloat16)
    bhead = jax.random.normal(k4, (1, d), jnp.float32) * 0.01
    return (wtap, bconv, whead, bhead)


# ----------------------------------------------------------------------------
# attention modules
# ----------------------------------------------------------------------------
def identity(x):
    """attention.Identity (unused in forward, kept for parity)."""
    return x


# ----------------------------------------------------------------------------
# FeatureExtractor
# ----------------------------------------------------------------------------
class FeatureExtractor:
    def __init__(self, key, audio_in_ch=1, video_in_ch=3, c_mid=32, feat_dim=32):
        ka, kv = jax.random.split(key)
        self._audio_params = init_encoder_params(ka, audio_in_ch, c_mid, feat_dim)
        self._video_params = init_encoder_params(kv, video_in_ch, c_mid, feat_dim)
        self._cross_attention = identity

    def __call__(self, batch):
        feat_audio = encode(batch['audio'], self._audio_params)       # one launch for all audio
        feat_video = self._encode_video(batch['frames'])              # one launch for all frames
        features = {
            'feat_audio': feat_audio,      # stays on device; .cpu() has no JAX analogue
            'feat_video': feat_video,
            'video': batch['meta']['video'],
            'start': batch['meta']['start'],
            'end': batch['meta']['end'],
            'trackid': batch['meta']['trackid'],
            'visible': batch['visible'],
            'losses': {},
        }
        if 'targets' in batch.keys():
            features['targets'] = batch['targets']
        return features

    def _encode_video(self, video_batch):
        # Batch every utterance's frames into ONE encoder launch; attention.PickFirst then
        # selects each utterance's first-frame encoding (gather), matching the reference
        # encode-all-then-pick-frame-0 semantics.
        counts = [int(f.shape[0]) for f in video_batch]
        frames_all = jnp.concatenate(list(video_batch), axis=0)       # (sum_F, 3, H, W)
        feats = encode(frames_all, self._video_params)                # (sum_F, D)
        first_idx, off = [], 0
        for cnt in counts:
            first_idx.append(off)
            off += cnt
        # TODO(synk): distinct total frame counts across batches retrigger one compile each;
        # pad sum_F to a bucket size in production.
        return feats[jnp.asarray(first_idx, dtype=jnp.int32)]         # (B, D)


# ----------------------------------------------------------------------------
# main
# ----------------------------------------------------------------------------
if __name__ == "__main__":
    key = jax.random.PRNGKey(0)
    k_audio, k_f0, k_f1, k_params = jax.random.split(key, 4)

    B = 2                 # number of utterances
    H = W = 16
    FEAT_DIM = 32

    # audio "spectrograms": (B, 1, H, W) NCHW
    audio = jax.random.normal(k_audio, (B, 1, H, W), jnp.float32)
    # per-utterance frame stacks (variable #frames), NCHW
    frames = [
        jax.random.normal(k_f0, (3, 3, H, W), jnp.float32),
        jax.random.normal(k_f1, (4, 3, H, W), jnp.float32),
    ]

    batch = {
        'audio': audio,
        'frames': frames,
        'visible': jnp.array([True, True]),
        'meta': {
            'video': ['vid_a', 'vid_b'],
            'start': jnp.array([0.0, 1.5], jnp.float32),
            'end': jnp.array([1.5, 3.0], jnp.float32),
            'trackid': jnp.array([0, 1], jnp.int32),
        },
        'targets': jnp.array([0, 1], jnp.int32),
    }

    extractor = FeatureExtractor(k_params, audio_in_ch=1, video_in_ch=3,
                                 c_mid=32, feat_dim=FEAT_DIM)
    features = extractor(batch)

    jax.block_until_ready(features['feat_audio'])
    jax.block_until_ready(features['feat_video'])

    assert features['feat_audio'].shape == (B, FEAT_DIM)
    assert features['feat_video'].shape == (B, FEAT_DIM)
    assert features['losses'] == {}
    print("KERNEL_OK")
</pallas_src>

<mosaic_0001>
module attributes {stable_mosaic.version = 11 : i64} {
  func.func @kernel(%arg0: i32, %arg1: memref<1x2688xbf16, #tpu.memory_space<vmem>>, %arg2: memref<9x32x1xbf16, #tpu.memory_space<vmem>>, %arg3: memref<32x1xf32, #tpu.memory_space<vmem>>, %arg4: memref<32x32xbf16, #tpu.memory_space<vmem>>, %arg5: memref<1x32xf32, #tpu.memory_space<vmem>>, %arg6: memref<8x32xf32, #tpu.memory_space<vmem>>, %arg7: memref<32x2688xf32, #tpu.memory_space<vmem>>) attributes {dimension_semantics = [#tpu.dimension_semantics<parallel>], iteration_bounds = array<i64: 1>, scalar_prefetch = 0 : i64, scratch_operands = 1 : i64, tpu.core_type = #tpu.core_type<tc>, window_params = [{transform_indices = @transform_0, window_bounds = array<i64: 1, 2688>}, {pipeline_mode = #tpu.pipeline_mode<synchronous>, transform_indices = @transform_1, window_bounds = array<i64: 9, 32, 1>}, {pipeline_mode = #tpu.pipeline_mode<synchronous>, transform_indices = @transform_2, window_bounds = array<i64: 32, 1>}, {pipeline_mode = #tpu.pipeline_mode<synchronous>, transform_indices = @transform_3, window_bounds = array<i64: 32, 32>}, {pipeline_mode = #tpu.pipeline_mode<synchronous>, transform_indices = @transform_4, window_bounds = array<i64: 1, 32>}, {transform_indices = @transform_5, window_bounds = array<i64: 8, 32>}]} {
    %c0 = arith.constant 0 : index
    %c0_0 = arith.constant 0 : index
    %0 = vector.load %arg1[%c0, %c0_0] : memref<1x2688xbf16, #tpu.memory_space<vmem>>, vector<1x2688xbf16>
    %1 = arith.extf %0 : vector<1x2688xbf16> to vector<1x2688xf32>
    %cst = arith.constant 0.000000e+00 : f32
    %2 = vector.broadcast %cst : f32 to vector<32x2688xf32>
    %c0_1 = arith.constant 0 : index
    %c0_2 = arith.constant 0 : index
    %3 = vector.load %arg7[%c0_1, %c0_2] : memref<32x2688xf32, #tpu.memory_space<vmem>>, vector<32x2688xf32>
    tpu.vector_store %arg7[%c0_1, %c0_2], %2 {strides = array<i32>} : memref<32x2688xf32, #tpu.memory_space<vmem>>, vector<32x2688xf32>,
    %c19_i32 = arith.constant 19 : i32
    %4 = tpu.dynamic_rotate %1 by %c19_i32 dim 1 : vector<1x2688xf32>, i32 -> vector<1x2688xf32>
    %c0_3 = arith.constant 0 : index
    %c0_4 = arith.constant 0 : index
    %c0_5 = arith.constant 0 : index
    %5 = vector.load %arg2[%c0_3, %c0_4, %c0_5] : memref<9x32x1xbf16, #tpu.memory_space<vmem>>, vector<1x32x1xbf16>
    %6 = vector.shape_cast %5 : vector<1x32x1xbf16> to vector<32x1xbf16>
    %c0_6 = arith.constant 0 : index
    %c0_7 = arith.constant 0 : index
    %7 = vector.load %arg7[%c0_6, %c0_7] : memref<32x2688xf32, #tpu.memory_space<vmem>>, vector<32x2688xf32>
    %8 = arith.extf %6 : vector<32x1xbf16> to vector<32x1xf32>
    %9 = vector.broadcast %8 : vector<32x1xf32> to vector<32x2688xf32>
    %10 = vector.broadcast %4 : vector<1x2688xf32> to vector<32x2688xf32>
    %11 = arith.mulf %9, %10 : vector<32x2688xf32>
    %12 = arith.addf %7, %11 : vector<32x2688xf32>
    %c0_8 = arith.constant 0 : index
    %c0_9 = arith.constant 0 : index
    %13 = vector.load %arg7[%c0_8, %c0_9] : memref<32x2688xf32, #tpu.memory_space<vmem>>, vector<32x2688xf32>
    tpu.vector_store %arg7[%c0_8, %c0_9], %12 {strides = array<i32>} : memref<32x2688xf32, #tpu.memory_space<vmem>>, vector<32x2688xf32>,
    %c18_i32 = arith.constant 18 : i32
    %14 = tpu.dynamic_rotate %1 by %c18_i32 dim 1 : vector<1x2688xf32>, i32 -> vector<1x2688xf32>
    %c1 = arith.constant 1 : index
    %c0_10 = arith.constant 0 : index
    %c0_11 = arith.constant 0 : index
    %15 = vector.load %arg2[%c1, %c0_10, %c0_11] : memref<9x32x1xbf16, #tpu.memory_space<vmem>>, vector<1x32x1xbf16>
    %16 = vector.shape_cast %15 : vector<1x32x1xbf16> to vector<32x1xbf16>
    %c0_12 = arith.constant 0 : index
    %c0_13 = arith.constant 0 : index
    %17 = vector.load %arg7[%c0_12, %c0_13] : memref<32x2688xf32, #tpu.memory_space<vmem>>, vector<32x2688xf32>
    %18 = arith.extf %16 : vector<32x1xbf16> to vector<32x1xf32>
    %19 = vector.broadcast %18 : vector<32x1xf32> to vector<32x2688xf32>
    %20 = vector.broadcast %14 : vector<1x2688xf32> to vector<32x2688xf32>
    %21 = arith.mulf %19, %20 : vector<32x2688xf32>
    %22 = arith.addf %17, %21 : vector<32x2688xf32>
    %c0_14 = arith.constant 0 : index
    %c0_15 = arith.constant 0 : index
    %23 = vector.load %arg7[%c0_14, %c0_15] : memref<32x2688xf32, #tpu.memory_space<vmem>>, vector<32x2688xf32>
    tpu.vector_store %arg7[%c0_14, %c0_15], %22 {strides = array<i32>} : memref<32x2688xf32, #tpu.memory_space<vmem>>, vector<32x2688xf32>,
    %c17_i32 = arith.constant 17 : i32
    %24 = tpu.dynamic_rotate %1 by %c17_i32 dim 1 : vector<1x2688xf32>, i32 -> vector<1x2688xf32>
    %c2 = arith.constant 2 : index
    %c0_16 = arith.constant 0 : index
    %c0_17 = arith.constant 0 : index
    %25 = vector.load %arg2[%c2, %c0_16, %c0_17] : memref<9x32x1xbf16, #tpu.memory_space<vmem>>, vector<1x32x1xbf16>
    %26 = vector.shape_cast %25 : vector<1x32x1xbf16> to vector<32x1xbf16>
    %c0_18 = arith.constant 0 : index
    %c0_19 = arith.constant 0 : index
    %27 = vector.load %arg7[%c0_18, %c0_19] : memref<32x2688xf32, #tpu.memory_space<vmem>>, vector<32x2688xf32>
    %28 = arith.extf %26 : vector<32x1xbf16> to vector<32x1xf32>
    %29 = vector.broadcast %28 : vector<32x1xf32> to vector<32x2688xf32>
    %30 = vector.broadcast %24 : vector<1x2688xf32> to vector<32x2688xf32>
    %31 = arith.mulf %29, %30 : vector<32x2688xf32>
    %32 = arith.addf %27, %31 : vector<32x2688xf32>
    %c0_20 = arith.constant 0 : index
    %c0_21 = arith.constant 0 : index
    %33 = vector.load %arg7[%c0_20, %c0_21] : memref<32x2688xf32, #tpu.memory_space<vmem>>, vector<32x2688xf32>
    tpu.vector_store %arg7[%c0_20, %c0_21], %32 {strides = array<i32>} : memref<32x2688xf32, #tpu.memory_space<vmem>>, vector<32x2688xf32>,
    %c1_i32 = arith.constant 1 : i32
    %34 = tpu.dynamic_rotate %1 by %c1_i32 dim 1 : vector<1x2688xf32>, i32 -> vector<1x2688xf32>
    %c3 = arith.constant 3 : index
    %c0_22 = arith.constant 0 : index
    %c0_23 = arith.constant 0 : index
    %35 = vector.load %arg2[%c3, %c0_22, %c0_23] : memref<9x32x1xbf16, #tpu.memory_space<vmem>>, vector<1x32x1xbf16>
    %36 = vector.shape_cast %35 : vector<1x32x1xbf16> to vector<32x1xbf16>
    %c0_24 = arith.constant 0 : index
    %c0_25 = arith.constant 0 : index
    %37 = vector.load %arg7[%c0_24, %c0_25] : memref<32x2688xf32, #tpu.memory_space<vmem>>, vector<32x2688xf32>
    %38 = arith.extf %36 : vector<32x1xbf16> to vector<32x1xf32>
    %39 = vector.broadcast %38 : vector<32x1xf32> to vector<32x2688xf32>
    %40 = vector.broadcast %34 : vector<1x2688xf32> to vector<32x2688xf32>
    %41 = arith.mulf %39, %40 : vector<32x2688xf32>
    %42 = arith.addf %37, %41 : vector<32x2688xf32>
    %c0_26 = arith.constant 0 : index
    %c0_27 = arith.constant 0 : index
    %43 = vector.load %arg7[%c0_26, %c0_27] : memref<32x2688xf32, #tpu.memory_space<vmem>>, vector<32x2688xf32>
    tpu.vector_store %arg7[%c0_26, %c0_27], %42 {strides = array<i32>} : memref<32x2688xf32, #tpu.memory_space<vmem>>, vector<32x2688xf32>,
    %c4 = arith.constant 4 : index
    %c0_28 = arith.constant 0 : index
    %c0_29 = arith.constant 0 : index
    %44 = vector.load %arg2[%c4, %c0_28, %c0_29] : memref<9x32x1xbf16, #tpu.memory_space<vmem>>, vector<1x32x1xbf16>
    %45 = vector.shape_cast %44 : vector<1x32x1xbf16> to vector<32x1xbf16>
    %c0_30 = arith.constant 0 : index
    %c0_31 = arith.constant 0 : index
    %46 = vector.load %arg7[%c0_30, %c0_31] : memref<32x2688xf32, #tpu.memory_space<vmem>>, vector<32x2688xf32>
    %47 = arith.extf %45 : vector<32x1xbf16> to vector<32x1xf32>
    %48 = vector.broadcast %47 : vector<32x1xf32> to vector<32x2688xf32>
    %49 = vector.broadcast %1 : vector<1x2688xf32> to vector<32x2688xf32>
    %50 = arith.mulf %48, %49 : vector<32x2688xf32>
    %51 = arith.addf %46, %50 : vector<32x2688xf32>
    %c0_32 = arith.constant 0 : index
    %c0_33 = arith.constant 0 : index
    %52 = vector.load %arg7[%c0_32, %c0_33] : memref<32x2688xf32, #tpu.memory_space<vmem>>, vector<32x2688xf32>
    tpu.vector_store %arg7[%c0_32, %c0_33], %51 {strides = array<i32>} : memref<32x2688xf32, #tpu.memory_space<vmem>>, vector<32x2688xf32>,
    %c2687_i32 = arith.constant 2687 : i32
    %53 = tpu.dynamic_rotate %1 by %c2687_i32 dim 1 : vector<1x2688xf32>, i32 -> vector<1x2688xf32>
    %c5 = arith.constant 5 : index
    %c0_34 = arith.constant 0 : index
    %c0_35 = arith.constant 0 : index
    %54 = vector.load %arg2[%c5, %c0_34, %c0_35] : memref<9x32x1xbf16, #tpu.memory_space<vmem>>, vector<1x32x1xbf16>
    %55 = vector.shape_cast %54 : vector<1x32x1xbf16> to vector<32x1xbf16>
    %c0_36 = arith.constant 0 : index
    %c0_37 = arith.constant 0 : index
    %56 = vector.load %arg7[%c0_36, %c0_37] : memref<32x2688xf32, #tpu.memory_space<vmem>>, vector<32x2688xf32>
    %57 = arith.extf %55 : vector<32x1xbf16> to vector<32x1xf32>
    %58 = vector.broadcast %57 : vector<32x1xf32> to vector<32x2688xf32>
    %59 = vector.broadcast %53 : vector<1x2688xf32> to vector<32x2688xf32>
    %60 = arith.mulf %58, %59 : vector<32x2688xf32>
    %61 = arith.addf %56, %60 : vector<32x2688xf32>
    %c0_38 = arith.constant 0 : index
    %c0_39 = arith.constant 0 : index
    %62 = vector.load %arg7[%c0_38, %c0_39] : memref<32x2688xf32, #tpu.memory_space<vmem>>, vector<32x2688xf32>
    tpu.vector_store %arg7[%c0_38, %c0_39], %61 {strides = array<i32>} : memref<32x2688xf32, #tpu.memory_space<vmem>>, vector<32x2688xf32>,
    %c2671_i32 = arith.constant 2671 : i32
    %63 = tpu.dynamic_rotate %1 by %c2671_i32 dim 1 : vector<1x2688xf32>, i32 -> vector<1x2688xf32>
    %c6 = arith.constant 6 : index
    %c0_40 = arith.constant 0 : index
    %c0_41 = arith.constant 0 : index
    %64 = vector.load %arg2[%c6, %c0_40, %c0_41] : memref<9x32x1xbf16, #tpu.memory_space<vmem>>, vector<1x32x1xbf16>
    %65 = vector.shape_cast %64 : vector<1x32x1xbf16> to vector<32x1xbf16>
    %c0_42 = arith.constant 0 : index
    %c0_43 = arith.constant 0 : index
    %66 = vector.load %arg7[%c0_42, %c0_43] : memref<32x2688xf32, #tpu.memory_space<vmem>>, vector<32x2688xf32>
    %67 = arith.extf %65 : vector<32x1xbf16> to vector<32x1xf32>
    %68 = vector.broadcast %67 : vector<32x1xf32> to vector<32x2688xf32>
    %69 = vector.broadcast %63 : vector<1x2688xf32> to vector<32x2688xf32>
    %70 = arith.mulf %68, %69 : vector<32x2688xf32>
    %71 = arith.addf %66, %70 : vector<32x2688xf32>
    %c0_44 = arith.constant 0 : index
    %c0_45 = arith.constant 0 : index
    %72 = vector.load %arg7[%c0_44, %c0_45] : memref<32x2688xf32, #tpu.memory_space<vmem>>, vector<32x2688xf32>
    tpu.vector_store %arg7[%c0_44, %c0_45], %71 {strides = array<i32>} : memref<32x2688xf32, #tpu.memory_space<vmem>>, vector<32x2688xf32>,
    %c2670_i32 = arith.constant 2670 : i32
    %73 = tpu.dynamic_rotate %1 by %c2670_i32 dim 1 : vector<1x2688xf32>, i32 -> vector<1x2688xf32>
    %c7 = arith.constant 7 : index
    %c0_46 = arith.constant 0 : index
    %c0_47 = arith.constant 0 : index
    %74 = vector.load %arg2[%c7, %c0_46, %c0_47] : memref<9x32x1xbf16, #tpu.memory_space<vmem>>, vector<1x32x1xbf16>
    %75 = vector.shape_cast %74 : vector<1x32x1xbf16> to vector<32x1xbf16>
    %c0_48 = arith.constant 0 : index
    %c0_49 = arith.constant 0 : index
    %76 = vector.load %arg7[%c0_48, %c0_49] : memref<32x2688xf32, #tpu.memory_space<vmem>>, vector<32x2688xf32>
    %77 = arith.extf %75 : vector<32x1xbf16> to vector<32x1xf32>
    %78 = vector.broadcast %77 : vector<32x1xf32> to vector<32x2688xf32>
    %79 = vector.broadcast %73 : vector<1x2688xf32> to vector<32x2688xf32>
    %80 = arith.mulf %78, %79 : vector<32x2688xf32>
    %81 = arith.addf %76, %80 : vector<32x2688xf32>
    %c0_50 = arith.constant 0 : index
    %c0_51 = arith.constant 0 : index
    %82 = vector.load %arg7[%c0_50, %c0_51] : memref<32x2688xf32, #tpu.memory_space<vmem>>, vector<32x2688xf32>
    tpu.vector_store %arg7[%c0_50, %c0_51], %81 {strides = array<i32>} : memref<32x2688xf32, #tpu.memory_space<vmem>>, vector<32x2688xf32>,
    %c2669_i32 = arith.constant 2669 : i32
    %83 = tpu.dynamic_rotate %1 by %c2669_i32 dim 1 : vector<1x2688xf32>, i32 -> vector<1x2688xf32>
    %c8 = arith.constant 8 : index
    %c0_52 = arith.constant 0 : index
    %c0_53 = arith.constant 0 : index
    %84 = vector.load %arg2[%c8, %c0_52, %c0_53] : memref<9x32x1xbf16, #tpu.memory_space<vmem>>, vector<1x32x1xbf16>
    %85 = vector.shape_cast %84 : vector<1x32x1xbf16> to vector<32x1xbf16>
    %c0_54 = arith.constant 0 : index
    %c0_55 = arith.constant 0 : index
    %86 = vector.load %arg7[%c0_54, %c0_55] : memref<32x2688xf32, #tpu.memory_space<vmem>>, vector<32x2688xf32>
    %87 = arith.extf %85 : vector<32x1xbf16> to vector<32x1xf32>
    %88 = vector.broadcast %87 : vector<32x1xf32> to vector<32x2688xf32>
    %89 = vector.broadcast %83 : vector<1x2688xf32> to vector<32x2688xf32>
    %90 = arith.mulf %88, %89 : vector<32x2688xf32>
    %91 = arith.addf %86, %90 : vector<32x2688xf32>
    %c0_56 = arith.constant 0 : index
    %c0_57 = arith.constant 0 : index
    %92 = vector.load %arg7[%c0_56, %c0_57] : memref<32x2688xf32, #tpu.memory_space<vmem>>, vector<32x2688xf32>
    tpu.vector_store %arg7[%c0_56, %c0_57], %91 {strides = array<i32>} : memref<32x2688xf32, #tpu.memory_space<vmem>>, vector<32x2688xf32>,
    %c0_58 = arith.constant 0 : index
    %c0_59 = arith.constant 0 : index
    %93 = vector.load %arg7[%c0_58, %c0_59] : memref<32x2688xf32, #tpu.memory_space<vmem>>, vector<32x2688xf32>
    %c0_60 = arith.constant 0 : index
    %c0_61 = arith.constant 0 : index
    %94 = vector.load %arg3[%c0_60, %c0_61] : memref<32x1xf32, #tpu.memory_space<vmem>>, vector<32x1xf32>
    %95 = vector.broadcast %94 : vector<32x1xf32> to vector<32x2688xf32>
    %96 = arith.addf %93, %95 : vector<32x2688xf32>
    %cst_62 = arith.constant 0.000000e+00 : f32
    %97 = vector.broadcast %cst_62 : f32 to vector<32x2688xf32>
    %98 = arith.maximumf %96, %97 : vector<32x2688xf32>
    %99 = tpu.iota {dimensions = array<i32: 1>} : vector<8x2688xi32>
    %100 = arith.sitofp %99 : vector<8x2688xi32> to vector<8x2688xf32>
    %101 = tpu.iota {dimensions = array<i32: 0>} : vector<8x2688xi32>
    %102 = arith.sitofp %101 : vector<8x2688xi32> to vector<8x2688xf32>
    %cst_63 = arith.constant 3.360000e+02 : f32
    %103 = vector.broadcast %cst_63 : f32 to vector<8x2688xf32>
    %104 = arith.mulf %102, %103 : vector<8x2688xf32>
    %105 = arith.subf %100, %104 : vector<8x2688xf32>
    %cst_64 = arith.constant 5.000000e-01 : f32
    %106 = vector.broadcast %cst_64 : f32 to vector<8x2688xf32>
    %107 = arith.addf %105, %106 : vector<8x2688xf32>
    %cst_65 = arith.constant 0.055555556 : f32
    %108 = vector.broadcast %cst_65 : f32 to vector<8x2688xf32>
    %109 = arith.mulf %107, %108 : vector<8x2688xf32>
    %110 = math.floor %109 : vector<8x2688xf32>
    %cst_66 = arith.constant 1.800000e+01 : f32
    %111 = vector.broadcast %cst_66 : f32 to vector<8x2688xf32>
    %112 = arith.mulf %110, %111 : vector<8x2688xf32>
    %113 = arith.subf %105, %112 : vector<8x2688xf32>
    %cst_67 = arith.constant 1.000000e+00 : f32
    %114 = vector.broadcast %cst_67 : f32 to vector<8x2688xf32>
    %115 = arith.cmpf oge, %110, %114 : vector<8x2688xf32>
    %cst_68 = arith.constant 1.600000e+01 : f32
    %116 = vector.broadcast %cst_68 : f32 to vector<8x2688xf32>
    %117 = arith.cmpf ole, %110, %116 : vector<8x2688xf32>
    %118 = arith.andi %115, %117 : vector<8x2688xi1>
    %cst_69 = arith.constant 1.000000e+00 : f32
    %119 = vector.broadcast %cst_69 : f32 to vector<8x2688xf32>
    %120 = arith.cmpf oge, %113, %119 : vector<8x2688xf32>
    %121 = arith.andi %118, %120 : vector<8x2688xi1>
    %cst_70 = arith.constant 1.600000e+01 : f32
    %122 = vector.broadcast %cst_70 : f32 to vector<8x2688xf32>
    %123 = arith.cmpf ole, %113, %122 : vector<8x2688xf32>
    %124 = arith.andi %121, %123 : vector<8x2688xi1>
    %cst_71 = arith.constant 1.000000e+00 : f32
    %cst_72 = arith.constant 0.000000e+00 : f32
    %125 = vector.broadcast %cst_71 : f32 to vector<8x2688xf32>
    %126 = vector.broadcast %cst_72 : f32 to vector<8x2688xf32>
    %127 = arith.select %124, %125, %126 : vector<8x2688xi1>, vector<8x2688xf32>
    %cst_73 = arith.constant dense<0.000000e+00> : vector<8x32xf32>
    %128 = tpu.matmul %127, %98, %cst_73 {dimension_numbers = #tpu.dot_dimension_numbers<[1], [1], [0], [0], [0, 0, 1, 0], [], []>} : vector<8x2688xf32>, vector<32x2688xf32>, vector<8x32xf32> -> vector<8x32xf32>
    %cst_74 = arith.constant 3.906250e-03 : f32
    %129 = vector.broadcast %cst_74 : f32 to vector<8x32xf32>
    %130 = arith.mulf %128, %129 : vector<8x32xf32>
    %131 = arith.truncf %130 : vector<8x32xf32> to vector<8x32xbf16>
    %c0_75 = arith.constant 0 : index
    %c0_76 = arith.constant 0 : index
    %132 = vector.load %arg4[%c0_75, %c0_76] : memref<32x32xbf16, #tpu.memory_space<vmem>>, vector<32x32xbf16>
    %cst_77 = arith.constant dense<0.000000e+00> : vector<8x32xf32>
    %133 = tpu.matmul %131, %132, %cst_77 {dimension_numbers = #tpu.dot_dimension_numbers<[1], [1], [0], [0], [0, 0, 1, 0], [], []>} : vector<8x32xbf16>, vector<32x32xbf16>, vector<8x32xf32> -> vector<8x32xf32>
    %c0_78 = arith.constant 0 : index
    %c0_79 = arith.constant 0 : index
    %134 = vector.load %arg5[%c0_78, %c0_79] : memref<1x32xf32, #tpu.memory_space<vmem>>, vector<1x32xf32>
    %135 = vector.broadcast %134 : vector<1x32xf32> to vector<8x32xf32>
    %136 = arith.addf %133, %135 : vector<8x32xf32>
    %c0_80 = arith.constant 0 : index
    %c0_81 = arith.constant 0 : index
    %137 = vector.load %arg6[%c0_80, %c0_81] : memref<8x32xf32, #tpu.memory_space<vmem>>, vector<8x32xf32>
    tpu.vector_store %arg6[%c0_80, %c0_81], %136 {strides = array<i32>} : memref<8x32xf32, #tpu.memory_space<vmem>>, vector<8x32xf32>,
    return
  }
  func.func @transform_0(%arg0: i32) -> (i32, i32) {
    %c0_i32 = arith.constant 0 : i32
    %c0_i32_0 = arith.constant 0 : i32
    return %c0_i32, %arg0 : i32, i32
  }
  func.func @transform_1(%arg0: i32) -> (i32, i32, i32) {
    %c0_i32 = arith.constant 0 : i32
    %c0_i32_0 = arith.constant 0 : i32
    %c0_i32_1 = arith.constant 0 : i32
    %c0_i32_2 = arith.constant 0 : i32
    return %c0_i32, %c0_i32_0, %c0_i32_1 : i32, i32, i32
  }
  func.func @transform_2(%arg0: i32) -> (i32, i32) {
    %c0_i32 = arith.constant 0 : i32
    %c0_i32_0 = arith.constant 0 : i32
    %c0_i32_1 = arith.constant 0 : i32
    return %c0_i32, %c0_i32_0 : i32, i32
  }
  func.func @transform_3(%arg0: i32) -> (i32, i32) {
    %c0_i32 = arith.constant 0 : i32
    %c0_i32_0 = arith.constant 0 : i32
    %c0_i32_1 = arith.constant 0 : i32
    return %c0_i32, %c0_i32_0 : i32, i32
  }
  func.func @transform_4(%arg0: i32) -> (i32, i32) {
    %c0_i32 = arith.constant 0 : i32
    %c0_i32_0 = arith.constant 0 : i32
    %c0_i32_1 = arith.constant 0 : i32
    return %c0_i32, %c0_i32_0 : i32, i32
  }
  func.func @transform_5(%arg0: i32) -> (i32, i32) {
    %c0_i32 = arith.constant 0 : i32
    %c0_i32_0 = arith.constant 0 : i32
    return %arg0, %c0_i32 : i32, i32
  }
}

</mosaic_0001>

<bundles_post_ra>
// kernel: _encode_jit.1
= control target key start
LH: loop header
LB: loop body
LE: loop exit
PB: predicated region body
PF: predicated region fallthrough
CT: control target
= control target key end

     0   :  { %v120_v0 = vlaneseq  ;;  %v7027_v1 = vmov 0   ;;  %s7028_s7 = smov 18   ;;  %s7029_s8 = smov 19   ;;  %s10878_s1 = inlined_call_operand.vmem [shape: bf16[9,32,1], index: 1, kind: input, shape index: {}]   ;;  %s10879_s0 = inlined_call_operand.vmem [shape: bf16[1,2688], index: 0, kind: input, shape index: {}]   ;;  %s10880_s2 = inlined_call_operand.vmem [shape: f32[32,1], index: 2, kind: input, shape index: {}]   ;;  %s10881_s3 = inlined_call_operand.vmem [shape: bf16[32,32], index: 3, kind: input, shape index: {}]   ;;  %s10882_s4 = inlined_call_operand.vmem [shape: f32[1,32], index: 4, kind: input, shape index: {}]   ;;  %s10883_s5 = inlined_call_operand.vmem [shape: f32[8,32], index: 5, kind: output, shape index: {}]  }
   0x1   :  { %6544 = vset.pattern.permute.xlu1 %v7027_v1  ;;  %6533 = vset.pattern.permute.xlu0 %v7027_v1  ;;  %v6374_v2 = vld [vmem:[%s10878_s1 + $0x20] sm:$0xff]   ;;  %v6376_v4 = vld [vmem:[%s10878_s1 + $0x30] sm:$0xff]   ;;  %v22_v10 = vld [vmem:[%s10879_s0 + $0x8] sm:$0xff]  ;;  %s7030_s13 = smov 17   ;;  %s7031_s20 = smov 1  }
   0x2   :  { %v6300_v3 = vld [vmem:[%s10878_s1] sm:$0xff]   ;;  %v6317_v5 = vunpack.c.l.bf16 %v6374_v2  ;;  %v6318_v6 = vunpack.c.h.bf16 %v6374_v2  ;;  %v6372_v9 = vld [vmem:[%s10878_s1 + $0x10] sm:$0xff]   ;;  %v6325_v12 = vunpack.c.l.bf16 %v6376_v4  ;;  %v6326_v13 = vunpack.c.h.bf16 %v6376_v4  ;;  %v6371_v36 = vld [vmem:[%s10878_s1 + $0x8] sm:$0xff]   ;;  %s7032_s27 = smov 127   ;;  %s7033_s9 = smov 111  }
   0x3   :  { %v6301_v7 = vunpack.c.l.bf16 %v6300_v3  ;;  %v6302_v8 = vunpack.c.h.bf16 %v6300_v3  ;;  %v7088_v11 = vld [vmem:[%s10879_s0] sm:$0xff]  ;;  %v6309_v14 = vunpack.c.l.bf16 %v6372_v9  ;;  %v6310_v15 = vunpack.c.h.bf16 %v6372_v9  ;;  %v6373_v40 = vld [vmem:[%s10878_s1 + $0x18] sm:$0xff]   ;;  %v6380_v44 = vld [vmem:[%s10878_s1 + $0x50] sm:$0xff]   ;;  %s7034_s12 = smov 110   ;;  %s7035_s18 = smov 109  }
   0x4   :  { %v6545_v16 = vpack.i.bf16 %v6318_v6, %v6317_v5  ;;  %v7090_v18 = vunpack.c.l.bf16 %v22_v10  ;;  %v7093_v19 = vshrl.u32 %v120_v0, 7  ;;  %v6550_v20 = vpack.i.bf16 %v6326_v13, %v6325_v12  ;;  %v6378_v32 = vld [vmem:[%s10878_s1 + $0x40] sm:$0xff]   ;;  %v6375_v52 = vld [vmem:[%s10878_s1 + $0x28] sm:$0xff]   ;;  %v6377_v58 = vld [vmem:[%s10878_s1 + $0x38] sm:$0xff]  }
   0x5   :  { %v6534_v17 = vpack.i.bf16 %v6302_v8, %v6301_v7  ;;  %v7096_v21 = vunpack.c.l.bf16 %v7088_v11  ;;  %v6539_v22 = vpack.i.bf16 %v6310_v15, %v6309_v14  ;;  %v6333_v34 = vunpack.c.l.bf16 %v6378_v32  ;;  %v6382_v51 = vld [vmem:[%s10878_s1 + $0x60] sm:$0xff]   ;;  %v6384_v3 = vld [vmem:[%s10878_s1 + $0x70] sm:$0xff]   ;;  %v6379_v12 = vld [vmem:[%s10878_s1 + $0x48] sm:$0xff]  }
   0x6   :  { %6546 = vperm.xlu1 %6544, %v6545_v16   ;;  %v7099_v23 = vsub.s32 0, %v7093_v19  ;;  %v7102_v24 = vsub.s32 4, %v7093_v19  ;;  %v7105_v25 = vsub.s32 6, %v7093_v19  ;;  %v7108_v26 = vsub.s32 2, %v7093_v19 }
   0x7   :  { %6535 = vperm.xlu0 %6533, %v6534_v17   ;;  %v6334_v35 = vunpack.c.h.bf16 %v6378_v32  ;;  %v6305_v38 = vunpack.c.l.bf16 %v6371_v36  ;;  %v6306_v39 = vunpack.c.h.bf16 %v6371_v36  ;;  %v6313_v42 = vunpack.c.l.bf16 %v6373_v40  ;;  %v6386_v17 = vld [vmem:[%s10878_s1 + $0x80] sm:$0xff]  }
   0x8   :  { %v7112_v27 = vrot.slane %v7090_v18, %v7102_v24  ;;  %v7116_v28 = vrot.slane %v7090_v18, %v7105_v25  ;;  %v7120_v29 = vrot.slane %v7096_v21, %v7099_v23  ;;  %v7126_v31 = vrot.slane %v7090_v18, %v7108_v26 }
   0x9   :  { %v6580_v37 = vpack.i.bf16 %v6334_v35, %v6333_v34  ;;  %v6590_v41 = vpack.i.bf16 %v6306_v39, %v6305_v38  ;;  %v6314_v43 = vunpack.c.h.bf16 %v6373_v40  ;;  %v7147_v45 = vunpack.c.h.bf16 %v22_v10  ;;  %v6383_v35 = vld [vmem:[%s10878_s1 + $0x68] sm:$0xff]   ;;  %v23_v40 = vld [vmem:[%s10879_s0 + $0x10] sm:$0x1f] }
   0xa   :  { %6551 = vperm.xlu1 %6544, %v6550_v20   ;;  %v6560_v30 = vpack.i.bf16 %v7116_v28, %v7112_v27  ;;  %11266 = vst [vmem:[#allocation3_spill] sm:$0xff] %v7126_v31  ;;  %v6570_v33 = vpack.i.bf16 %v7120_v29, %v7126_v31  ;;  %v7151_v46 = vrot.slane %v7096_v21, %v7102_v24  ;;  %v6341_v49 = vunpack.c.l.bf16 %v6380_v44 }
   0xb   :  { %6540 = vperm.xlu0 %6533, %v6539_v22   ;;  %v7155_v47 = vrot.slane %v7147_v45, %v7105_v25  ;;  %v6595_v48 = vpack.i.bf16 %v6314_v43, %v6313_v42  ;;  %v6342_v50 = vunpack.c.h.bf16 %v6380_v44  ;;  %v6349_v53 = vunpack.c.l.bf16 %v6382_v51  ;;  %v4863_v42 = vld [vmem:[%s10880_s2] sm:$0xff] }
   0xc   :  { %11267 = vst [vmem:[#allocation4_spill] sm:$0xff] %v7151_v46  ;;  %v6350_v54 = vunpack.c.h.bf16 %v6382_v51  ;;  %v6321_v56 = vunpack.c.l.bf16 %v6375_v52  ;;  %v6322_v57 = vunpack.c.h.bf16 %v6375_v52  ;;  %v7170_v59 = vrot.slane %v7096_v21, %v7105_v25  ;;  %v6385_v51 = vld [vmem:[%s10878_s1 + $0x78] sm:$0xff]  }
   0xd   :  { %11268 = vst [vmem:[#allocation5_spill] sm:$0xff] %v7155_v47  ;;  %v6605_v55 = vpack.i.bf16 %v6342_v50, %v6341_v49  ;;  %v7173_v60 = vunpack.c.h.bf16 %v7088_v11  ;;  %v6329_v62 = vunpack.c.l.bf16 %v6377_v58  ;;  %v7178_v1 = vrot.slane %v7147_v45, %v7099_v23 }
   0xe   :  { %6556 = vrot.lane.b32.xlu1 %v6560_v30, %s7029_s8  ;;  %11269 = vst [vmem:[#allocation6_spill] sm:$0xff] %v7170_v59  ;;  %v6620_v61 = vpack.i.bf16 %v6350_v54, %v6349_v53  ;;  %v6615_v63 = vpack.i.bf16 %v6322_v57, %v6321_v56  ;;  %v6330_v2 = vunpack.c.h.bf16 %v6377_v58  ;;  %v7189_v5 = vrot.slane %v7096_v21, %v7108_v26  ;;  %v6387_v54 = vld [vmem:[%s10878_s1 + $0x88] sm:$0xff]  }
   0xf   :  { %6561 = vrot.lane.b32.xlu0 %v6560_v30, %s7028_s7  ;;  %v7185_v4 = vrot.slane %v7173_v60, %v7108_v26  ;;  %v6357_v6 = vunpack.c.l.bf16 %v6384_v3  ;;  %v7193_v7 = vrot.slane %v7173_v60, %v7102_v24  ;;  %v6630_v8 = vpack.i.bf16 %v7178_v1, %v7116_v28 }
  0x10   :  { %v6625_v9 = vpack.i.bf16 %v6330_v2, %v6329_v62  ;;  %v6358_v10 = vunpack.c.h.bf16 %v6384_v3  ;;  %v7199_v11 = vrot.slane %v7173_v60, %v7105_v25  ;;  %v6640_v13 = vpack.i.bf16 %v7189_v5, %v7112_v27  ;;  %v4866_v62 = vld [vmem:[%s10880_s2 + $0x18] sm:$0xff] }
  0x11   :  { %11270 = vst [vmem:[#allocation7_spill] sm:$0xff] %v7185_v4  ;;  %11271 = vst [vmem:[#allocation8_spill] sm:$0xff] %v7193_v7  ;;  %v6337_v15 = vunpack.c.l.bf16 %v6379_v12  ;;  %v6338_v16 = vunpack.c.h.bf16 %v6379_v12  ;;  %v6365_v21 = vunpack.c.l.bf16 %v6386_v17  ;;  %v6366_v22 = vunpack.c.h.bf16 %v6386_v17 }
  0x12   :  { %6571 = vrot.lane.b32.xlu1 %v6570_v33, %s7028_s7  ;;  %11272 = vst [vmem:[#allocation9_spill] sm:$0xff] %v7199_v11  ;;  %v6635_v14 = vpack.i.bf16 %v6358_v10, %v6357_v6  ;;  %v6354_v38 = vunpack.c.h.bf16 %v6383_v35  ;;  %v7230_v43 = vrot.slane %v7147_v45, %v7108_v26  ;;  %v6695_v50 = vpack.i.bf16 %v7178_v1, %v7189_v5 }
  0x13   :  { %6566 = vrot.lane.b32.xlu0 %v6570_v33, %s7029_s8  ;;  %v6645_v20 = vpack.i.bf16 %v6338_v16, %v6337_v15  ;;  %v6655_v32 = vpack.i.bf16 %v6366_v22, %v6365_v21  ;;  %v6361_v52 = vunpack.c.l.bf16 %v6385_v51  ;;  %v6362_v53 = vunpack.c.h.bf16 %v6385_v51 }
  0x14   :  { %v6369_v56 = vunpack.c.l.bf16 %v6387_v54  ;;  %v6370_v57 = vunpack.c.h.bf16 %v6387_v54  ;;  %v6745_v3 = vpack.i.bf16 %v7230_v43, %v7151_v46  ;;  %v6785_v6 = vpack.i.bf16 %v7170_v59, %v7151_v46 }
  0x15   :  { %v7294_v10 = vrot.slane %v7173_v60, %v7099_v23  ;;  %v7304_v15 = vand.u32 127, %v120_v0  ;;  %v7332_v22 = vrot.slane %v7090_v18, %v7099_v23  ;;  %v7352_v18 = vrot.slane %v7178_v1, %v7099_v23 }
  0x16   :  { %6581 = vperm.xlu1 %6544, %v6580_v37   ;;  %v6353_v37 = vunpack.c.l.bf16 %v6383_v35  ;;  %v6730_v58 = vpack.i.bf16 %v6370_v57, %v6369_v56 }
  0x17   :  { %6576 = vrot.lane.b32.xlu0 %v6560_v30, %s7030_s13  ;;  %11276 = vst [vmem:[#allocation13_spill] sm:$0xff] %v7294_v10  ;;  %vm781_vm0 = vcmp.lt.s32.totalorder %v7304_v15, 18  ;;  %11281 = vst [vmem:[#allocation18_spill] sm:$0xff] %v7332_v22  ;;  %vm269_vm1 = vcmp.lt.s32.totalorder %v7304_v15, 19  ;;  %v7371_v35 = vpack.i.bf16 %v7332_v22, %v7199_v11  ;;  %vm11175_vm2 = vcmp.lt.s32.totalorder %v7304_v15, 17 }
  0x18   :  { %v6680_v39 = vpack.i.bf16 %v6354_v38, %v6353_v37  ;;  %v7380_v38 = vrot.slane %v7189_v5, %v7099_v23  ;;  %v7394_v5 = vrot.slane %v7120_v29, %v7099_v23  ;;  %vm11174_vm3 = vcmp.lt.s32.totalorder %v7304_v15, 1 }
  0x19   :  { %vm2769_vm4 = vcmp.lt.s32.totalorder %v7304_v15, 127  ;;  %vm3282_vm5 = vcmp.lt.s32.totalorder %v7304_v15, 111  ;;  %vm3795_vm6 = vcmp.lt.s32.totalorder %v7304_v15, 110  ;;  %vm4308_vm7 = vcmp.lt.s32.totalorder %v7304_v15, 109 }
  0x1a   :  { %6591 = vperm.xlu1 %6544, %v6590_v41   ;;  %v29_v41 = vunpack.c.h.bf16 %v23_v40  ;;  %11283 = vst [vmem:[#allocation20_spill] sm:$0xff] %v7380_v38  ;;  %11285 = vst [vmem:[#allocation22_spill] sm:$0xff] %v7394_v5 }
  0x1b   :  { %6586 = vrot.lane.b32.xlu0 %v6570_v33, %s7030_s13 }
  0x1c   :  { %v7233_v44 = vrot.slane %v29_v41, %v7099_v23 }
  0x1e   :  { %6601 = vrot.lane.b32.xlu1 %v6560_v30, %s7031_s20  ;;  %v6381_v30 = vld [vmem:[%s10878_s1 + $0x58] sm:$0xff]   ;;  %11273 = vst [vmem:[#allocation10_spill] sm:$0xff] %v7233_v44  ;;  %v6700_v49 = vpack.i.bf16 %v7233_v44, %v7230_v43 }
  0x1f   :  { %6596 = vperm.xlu0 %6533, %v6595_v48   ;;  %v6346_v34 = vunpack.c.h.bf16 %v6381_v30  ;;  %v4864_v48 = vld [vmem:[%s10880_s2 + $0x8] sm:$0xff] }
  0x22   :  { %6611 = vrot.lane.b32.xlu1 %v6570_v33, %s7031_s20  ;;  %v6345_v33 = vunpack.c.l.bf16 %v6381_v30  ;;  %v7336_v30 = vrot.slane %v7116_v28, %v7099_v23  ;;  %v7363_v28 = vpack.i.bf16 %v7199_v11, %v7193_v7 }
  0x23   :  { %6606 = vperm.xlu0 %6533, %v6605_v55   ;;  %v6715_v55 = vpack.i.bf16 %v6362_v53, %v6361_v52 }
  0x24   :  { %v6665_v36 = vpack.i.bf16 %v6346_v34, %v6345_v33 }
  0x26   :  { %6621 = vperm.xlu1 %6544, %v6620_v61   ;;  %v7259_v61 = vrot.slane %v7147_v45, %v7102_v24 }
  0x27   :  { %6616 = vperm.xlu0 %6533, %v6615_v63   ;;  %v4865_v63 = vld [vmem:[%s10880_s2 + $0x10] sm:$0xff] }
  0x28   :  { %11274 = vst [vmem:[#allocation11_spill] sm:$0xff] %v7259_v61  ;;  %v6750_v2 = vpack.i.bf16 %v7120_v29, %v7259_v61  ;;  %v6790_v45 = vpack.i.bf16 %v7155_v47, %v7259_v61 }
  0x2a   :  { %6631 = vrot.lane.b32.xlu1 %v6630_v8, %s7032_s27 }
  0x2b   :  { %6626 = vperm.xlu0 %6533, %v6625_v9  }
  0x2e   :  { %6641 = vrot.lane.b32.xlu1 %v6640_v13, %s7032_s27 }
  0x2f   :  { %6636 = vperm.xlu0 %6533, %v6635_v14   ;;  %v5098_v14 = vcvt.s32.f32 %v7093_v19 }
  0x31   :  { %v7311_v16 = vmul.f32 336.0, %v5098_v14 }
  0x32   :  { %6651 = vrot.lane.b32.xlu1 %v6630_v8, %s7033_s9 }
  0x33   :  { %6646 = vperm.xlu0 %6533, %v6645_v20   ;;  %11278 = vst [vmem:[#allocation15_spill] sm:$0xff] %v7311_v16  ;;  %v7319_v20 = vpack.i.bf16 %v7185_v4, %v7294_v10 }
  0x36   :  { %6661 = vrot.lane.b32.xlu1 %v6640_v13, %s7033_s9 }
  0x37   :  { %6656 = vperm.xlu0 %6533, %v6655_v32   ;;  %v7344_v32 = vrot.slane %v7112_v27, %v7099_v23 }
  0x3a   :  { %6671 = vrot.lane.b32.xlu1 %v6630_v8, %s7034_s12 }
  0x3b   :  { %6666 = vperm.xlu0 %6533, %v6665_v36  }
  0x3e   :  { %6681 = vperm.xlu1 %6544, %v6680_v39   ;;  %v7384_v39 = vrot.slane %v7230_v43, %v7099_v23 }
  0x3f   :  { %6676 = vrot.lane.b32.xlu0 %v6640_v13, %s7034_s12 }
  0x40   :  { %11284 = vst [vmem:[#allocation21_spill] sm:$0xff] %v7384_v39 }
  0x42   :  { %4869 = vperm.xlu1 %6544, %v4863_v42  }
  0x43   :  { %6686 = vrot.lane.b32.xlu0 %v6630_v8, %s7035_s18  ;;  %v28_v8 = vunpack.c.l.bf16 %v23_v40 }
  0x45   :  { %v7290_v9 = vrot.slane %v28_v8, %v7099_v23  ;;  %v7309_v60 = vrot.slane %v28_v8, %v7108_v26  ;;  %v7322_v21 = vrot.slane %v28_v8, %v7102_v24  ;;  %v7328_v26 = vrot.slane %v28_v8, %v7105_v25 }
  0x46   :  { %6691 = vrot.lane.b32.xlu1 %v6640_v13, %s7035_s18  ;;  %v6825_v13 = vpack.i.bf16 %v7294_v10, %v7170_v59  ;;  %v7348_v25 = vpack.i.bf16 %v7193_v7, %v7185_v4 }
  0x47   :  { %4874 = vperm.xlu0 %6533, %v4864_v48   ;;  %11275 = vst [vmem:[#allocation12_spill] sm:$0xff] %v7290_v9  ;;  %v6830_v12 = vpack.i.bf16 %v7290_v9, %v7155_v47  ;;  %11277 = vst [vmem:[#allocation14_spill] sm:$0xff] %v7309_v60  ;;  %v7315_v17 = vpack.i.bf16 %v7309_v60, %v7290_v9  ;;  %v7340_v24 = vpack.i.bf16 %v7322_v21, %v7309_v60 }
  0x48   :  { %11279 = vst [vmem:[#allocation16_spill] sm:$0xff] %v7322_v21  ;;  %11280 = vst [vmem:[#allocation17_spill] sm:$0xff] %v7328_v26  ;;  %v7359_v27 = vpack.i.bf16 %v7328_v26, %v7322_v21  ;;  %v7367_v1 = vpack.i.bf16 %v7233_v44, %v7328_v26 }
  0x4a   :  { %6701 = vrot.lane.b32.xlu1 %v6700_v49, %s7029_s8 }
  0x4b   :  { %6696 = vrot.lane.b32.xlu0 %v6695_v50, %s7029_s8 }
  0x4e   :  { %6711 = vrot.lane.b32.xlu1 %v6700_v49, %s7028_s7 }
  0x4f   :  { %6706 = vrot.lane.b32.xlu0 %v6695_v50, %s7028_s7 }
  0x52   :  { %6721 = vrot.lane.b32.xlu1 %v6695_v50, %s7030_s13 }
  0x53   :  { %6716 = vperm.xlu0 %6533, %v6715_v55  }
  0x56   :  { %6731 = vperm.xlu1 %6544, %v6730_v58  }
  0x57   :  { %6726 = vrot.lane.b32.xlu0 %v6700_v49, %s7030_s13 }
  0x5a   :  { %6741 = vrot.lane.b32.xlu1 %v6700_v49, %s7031_s20 }
  0x5b   :  { %6736 = vrot.lane.b32.xlu0 %v6695_v50, %s7031_s20 }
  0x5e   :  { %4884 = vperm.xlu1 %6544, %v4866_v62  }
  0x5f   :  { %4879 = vperm.xlu0 %6533, %v4865_v63  }
  0x62   :  { %6751 = vrot.lane.b32.xlu1 %v6750_v2, %s7032_s27 }
  0x63   :  { %6746 = vrot.lane.b32.xlu0 %v6745_v3, %s7032_s27 }
  0x66   :  { %6761 = vrot.lane.b32.xlu1 %v6750_v2, %s7033_s9 }
  0x67   :  { %6756 = vrot.lane.b32.xlu0 %v6745_v3, %s7033_s9 }
  0x6a   :  { %6771 = vrot.lane.b32.xlu1 %v6750_v2, %s7034_s12 }
  0x6b   :  { %6766 = vrot.lane.b32.xlu0 %v6745_v3, %s7034_s12 }
  0x6e   :  { %6781 = vrot.lane.b32.xlu1 %v6750_v2, %s7035_s18 }
  0x6f   :  { %6776 = vrot.lane.b32.xlu0 %v6745_v3, %s7035_s18 }
  0x72   :  { %6791 = vrot.lane.b32.xlu1 %v6790_v45, %s7029_s8 }
  0x73   :  { %6786 = vrot.lane.b32.xlu0 %v6785_v6, %s7029_s8 }
  0x76   :  { %6801 = vrot.lane.b32.xlu1 %v6790_v45, %s7028_s7 }
  0x77   :  { %6796 = vrot.lane.b32.xlu0 %v6785_v6, %s7028_s7 }
  0x7a   :  { %6811 = vrot.lane.b32.xlu1 %v6790_v45, %s7030_s13 }
  0x7b   :  { %6806 = vrot.lane.b32.xlu0 %v6785_v6, %s7030_s13 }
  0x7e   :  { %6821 = vrot.lane.b32.xlu1 %v6790_v45, %s7031_s20 }
  0x7f   :  { %6816 = vrot.lane.b32.xlu0 %v6785_v6, %s7031_s20 }
  0x82   :  { %6831 = vrot.lane.b32.xlu1 %v6830_v12, %s7032_s27 }
  0x83   :  { %6826 = vrot.lane.b32.xlu0 %v6825_v13, %s7032_s27 }
  0x85   :  { %v6547_v19 = vpop.permute.xlu1 %6546 }
  0x86   :  { %v6536_v0 = vpop.permute.xlu0 %6535  ;;  %6841 = vrot.lane.b32.xlu1 %v6830_v12, %s7033_s9  ;;  %v7396_v49 = vunpack.i.h.bf16 %v6547_v19  ;;  %v7398_v43 = vunpack.i.l.bf16 %v6547_v19 }
  0x87   :  { %6836 = vrot.lane.b32.xlu0 %v6825_v13, %s7033_s9  ;;  %v7420_v57 = vunpack.i.h.bf16 %v6536_v0  ;;  %v7422_v58 = vunpack.i.l.bf16 %v6536_v0 }
  0x88   :  { %11286 = vst [vmem:[#allocation23_spill] sm:$0xff] %v7396_v49  ;;  %11287 = vst [vmem:[#allocation24_spill] sm:$0xff] %v7398_v43 }
  0x89   :  { %v6552_v33 = vpop.permute.xlu1 %6551  ;;  %11292 = vst [vmem:[#allocation29_spill] sm:$0xff] %v7420_v57  ;;  %11293 = vst [vmem:[#allocation30_spill] sm:$0xff] %v7422_v58 }
  0x8a   :  { %v6541_v34 = vpop.permute.xlu0 %6540  ;;  %6851 = vrot.lane.b32.xlu1 %v6830_v12, %s7034_s12  ;;  %v7430_v2 = vunpack.i.h.bf16 %v6552_v33  ;;  %v7432_v3 = vunpack.i.l.bf16 %v6552_v33 }
  0x8b   :  { %6846 = vrot.lane.b32.xlu0 %v6825_v13, %s7034_s12  ;;  %v7408_v52 = vunpack.i.h.bf16 %v6541_v34  ;;  %v7410_v53 = vunpack.i.l.bf16 %v6541_v34 }
  0x8c   :  { %11294 = vst [vmem:[#allocation31_spill] sm:$0xff] %v7430_v2  ;;  %11295 = vst [vmem:[#allocation32_spill] sm:$0xff] %v7432_v3 }
  0x8d   :  { %v7375_v37 = vpop.permute.xlu1 %6556  ;;  %11288 = vst [vmem:[#allocation25_spill] sm:$0xff] %v7408_v52  ;;  %11289 = vst [vmem:[#allocation26_spill] sm:$0xff] %v7410_v53 }
  0x8e   :  { %v7373_v36 = vpop.permute.xlu0 %6561  ;;  %v10887_v42 = vunpack.i.h.bf16 %v7375_v37  ;;  %v6558_v48 = vunpack.i.l.bf16 %v7375_v37  ;;  %6861 = vrot.lane.b32.xlu1 %v6830_v12, %s7035_s18 }
  0x8f   :  { %11282 = vst [vmem:[#allocation19_spill] sm:$0xff] %v7373_v36  ;;  %v10886_v40 = vunpack.i.h.bf16 %v7373_v36  ;;  %v6563_v41 = vunpack.i.l.bf16 %v7373_v36  ;;  %6856 = vrot.lane.b32.xlu0 %v6825_v13, %s7035_s18 }
  0x90   :  { %v279_v51 = vsel %vm269_vm1, %v6558_v48, %v10887_v42 }
  0x91   :  { %v791_v50 = vsel %vm781_vm0, %v6563_v41, %v10886_v40  ;;  %v450_v54 = vrot.slane %v279_v51, %v7099_v23  ;;  %v7416_v55 = vpop.permute.xlu1 %6571 }
  0x92   :  { %v7413_v29 = vrot.slane %v791_v50, %v7099_v23  ;;  %11290 = vst [vmem:[#allocation27_spill] sm:$0xff] %v7416_v55  ;;  %v7418_v56 = vpop.permute.xlu0 %6566  ;;  %v10884_v62 = vunpack.i.l.bf16 %v7416_v55  ;;  %6871 = vrot.lane.b32.xlu1 %v7315_v17, %s7029_s8 }
  0x93   :  { %11291 = vst [vmem:[#allocation28_spill] sm:$0xff] %v7418_v56  ;;  %v10885_v63 = vunpack.i.l.bf16 %v7418_v56  ;;  %6866 = vrot.lane.b32.xlu0 %v7319_v20, %s7029_s8  ;;  %v498_v8 = vmul.f32 %v7422_v58, %v450_v54  ;;  %v519_v12 = vmul.f32 %v7420_v57, %v450_v54 }
  0x94   :  { %v1011_v45 = vmul.f32 %v7410_v53, %v7413_v29  ;;  %v1032_v6 = vmul.f32 %v7408_v52, %v7413_v29  ;;  %v792_v13 = vsel %vm781_vm0, %v10884_v62, %v6563_v41 }
  0x95   :  { %v280_v14 = vsel %vm269_vm1, %v10885_v63, %v6558_v48  ;;  %v7450_v0 = vrot.slane %v792_v13, %v7099_v23  ;;  %v6582_v50 = vpop.permute.xlu1 %6581 }
  0x96   :  { %v446_v34 = vrot.slane %v280_v14, %v7099_v23  ;;  %v7454_v51 = vpop.permute.xlu0 %6576  ;;  %v7457_v41 = vunpack.i.h.bf16 %v6582_v50  ;;  %v7459_v62 = vunpack.i.l.bf16 %v6582_v50  ;;  %6881 = vrot.lane.b32.xlu1 %v7315_v17, %s7028_s7  ;;  %v1095_v42 = vadd.f32 %v1011_v45, %v498_v8 }
  0x97   :  { %11296 = vst [vmem:[#allocation33_spill] sm:$0xff] %v7454_v51  ;;  %v10894_v48 = vunpack.i.h.bf16 %v7454_v51  ;;  %v6578_v63 = vunpack.i.l.bf16 %v7454_v51  ;;  %6876 = vrot.lane.b32.xlu0 %v7319_v20, %s7028_s7  ;;  %v1010_v13 = vmul.f32 %v7410_v53, %v7450_v0  ;;  %v1031_v14 = vmul.f32 %v7408_v52, %v7450_v0 }
  0x98   :  { %11297 = vst [vmem:[#allocation34_spill] sm:$0xff] %v7457_v41  ;;  %11298 = vst [vmem:[#allocation35_spill] sm:$0xff] %v7459_v62  ;;  %v497_v40 = vmul.f32 %v7422_v58, %v446_v34  ;;  %v518_v50 = vmul.f32 %v7420_v57, %v446_v34  ;;  %v1116_v33 = vadd.f32 %v1032_v6, %v519_v12 }
  0x99   :  { %v1304_v19 = vsel %vm11175_vm2, %v6578_v63, %v10894_v48  ;;  %v7479_v26 = vmul.f32 %v7459_v62, %v7336_v30  ;;  %v6592_v44 = vpop.permute.xlu1 %6591  ;;  %v7488_v60 = vmul.f32 %v7457_v41, %v7336_v30  ;;  %v7492_v48 = vmul.f32 %v7459_v62, %v7344_v32 }
  0x9a   :  { %v1094_v11 = vadd.f32 %v1010_v13, %v497_v40  ;;  %v7482_v7 = vrot.slane %v1304_v19, %v7099_v23  ;;  %v7484_v21 = vpop.permute.xlu0 %6586  ;;  %v1115_v45 = vadd.f32 %v1031_v14, %v518_v50  ;;  %v7494_v6 = vunpack.i.h.bf16 %v6592_v44  ;;  %6891 = vrot.lane.b32.xlu1 %v7315_v17, %s7030_s13 }
  0x9b   :  { %11299 = vst [vmem:[#allocation36_spill] sm:$0xff] %v7484_v21  ;;  %v7496_v8 = vunpack.i.l.bf16 %v6592_v44  ;;  %v10901_v40 = vunpack.i.l.bf16 %v7484_v21  ;;  %6886 = vrot.lane.b32.xlu0 %v7319_v20, %s7030_s13  ;;  %v7510_v44 = vmul.f32 %v7457_v41, %v7344_v32  ;;  %v7518_v50 = vmul.f32 %v7459_v62, %v7352_v18 }
  0x9c   :  { %11300 = vst [vmem:[#allocation37_spill] sm:$0xff] %v7494_v6  ;;  %v1524_v12 = vmul.f32 %v7398_v43, %v7482_v7  ;;  %v1545_v19 = vmul.f32 %v7396_v49, %v7482_v7  ;;  %v7522_v4 = vmul.f32 %v7457_v41, %v7352_v18  ;;  %v561_v46 = vmul.f32 %v7494_v6, %v450_v54 }
  0x9d   :  { %11301 = vst [vmem:[#allocation38_spill] sm:$0xff] %v7496_v8  ;;  %v1305_v14 = vsel %vm11175_vm2, %v10901_v40, %v6578_v63  ;;  %11302 = vst [vmem:[#allocation39_spill] sm:$0xff] %v7518_v50  ;;  %v540_v10 = vmul.f32 %v7496_v8, %v450_v54  ;;  %v7528_v9 = vpop.permute.xlu1 %6601  ;;  %v539_v63 = vmul.f32 %v7496_v8, %v446_v34 }
  0x9e   :  { %11303 = vst [vmem:[#allocation40_spill] sm:$0xff] %v7522_v4  ;;  %v7526_v13 = vrot.slane %v1305_v14, %v7099_v23  ;;  %11304 = vst [vmem:[#allocation41_spill] sm:$0xff] %v7528_v9  ;;  %v6597_v47 = vpop.permute.xlu0 %6596  ;;  %v1608_v59 = vadd.f32 %v1524_v12, %v1095_v42  ;;  %v10909_v40 = vunpack.i.h.bf16 %v7528_v9  ;;  %v6603_v61 = vunpack.i.l.bf16 %v7528_v9  ;;  %6901 = vrot.lane.b32.xlu1 %v7315_v17, %s7031_s20 }
  0x9f   :  { %v7534_v50 = vunpack.i.h.bf16 %v6597_v47  ;;  %v7536_v4 = vunpack.i.l.bf16 %v6597_v47  ;;  %6896 = vrot.lane.b32.xlu0 %v7319_v20, %s7031_s20  ;;  %v1629_v12 = vadd.f32 %v1545_v19, %v1116_v33  ;;  %v560_v14 = vmul.f32 %v7494_v6, %v446_v34 }
  0xa0   :  { %v1523_v42 = vmul.f32 %v7398_v43, %v7526_v13  ;;  %v1544_v54 = vmul.f32 %v7396_v49, %v7526_v13  ;;  %v1817_v47 = vsel %vm11174_vm3, %v6603_v61, %v10909_v40  ;;  %v5065_v19 = vadd.s32 1408, %v7304_v15 }
  0xa1   :  { %11305 = vst [vmem:[#allocation42_spill] sm:$0xff] %v7534_v50  ;;  %11306 = vst [vmem:[#allocation43_spill] sm:$0xff] %v7536_v4  ;;  %v1053_v17 = vmul.f32 %v7536_v4, %v7413_v29  ;;  %v1074_v20 = vmul.f32 %v7534_v50, %v7413_v29  ;;  %v1052_v43 = vmul.f32 %v7536_v4, %v7450_v0  ;;  %v7558_v49 = vpop.permute.xlu1 %6611 }
  0xa2   :  { %v1989_v21 = vrot.slane %v1817_v47, %v7099_v23  ;;  %11307 = vst [vmem:[#allocation44_spill] sm:$0xff] %v7558_v49  ;;  %v6607_v33 = vpop.permute.xlu0 %6606  ;;  %v1073_v34 = vmul.f32 %v7534_v50, %v7450_v0  ;;  %v7566_v40 = vmul.f32 %v7459_v62, %v7380_v38  ;;  %v10929_v9 = vunpack.i.l.bf16 %v7558_v49  ;;  %6911 = vrot.lane.b32.xlu1 %v7340_v24, %s7032_s27 }
  0xa3   :  { %6906 = vrot.lane.b32.xlu0 %v7348_v25, %s7032_s27  ;;  %v1607_v47 = vadd.f32 %v1523_v42, %v1094_v11  ;;  %v1628_v51 = vadd.f32 %v1544_v54, %v1115_v45  ;;  %v7576_v50 = vunpack.i.h.bf16 %v6607_v33  ;;  %v7578_v4 = vunpack.i.l.bf16 %v6607_v33 }
  0xa4   :  { %11308 = vst [vmem:[#allocation45_spill] sm:$0xff] %v7566_v40  ;;  %v2037_v0 = vmul.f32 %v7432_v3, %v1989_v21  ;;  %v2058_v31 = vmul.f32 %v7430_v2, %v1989_v21  ;;  %v1818_v29 = vsel %vm11174_vm3, %v10929_v9, %v6603_v61  ;;  %v1137_v40 = vadd.f32 %v1053_v17, %v540_v10 }
  0xa5   :  { %11309 = vst [vmem:[#allocation46_spill] sm:$0xff] %v7576_v50  ;;  %11310 = vst [vmem:[#allocation47_spill] sm:$0xff] %v7578_v4  ;;  %v1158_v52 = vadd.f32 %v1074_v20, %v561_v46  ;;  %v1136_v53 = vadd.f32 %v1052_v43, %v539_v63  ;;  %v1985_v36 = vrot.slane %v1818_v29, %v7099_v23  ;;  %v6622_v11 = vpop.permute.xlu1 %6621  ;;  %v5086_v61 = vcvt.s32.f32 %v5065_v19 }
  0xa6   :  { %v6617_v45 = vpop.permute.xlu0 %6616  ;;  %v2121_v42 = vadd.f32 %v2037_v0, %v1608_v59  ;;  %v2142_v54 = vadd.f32 %v2058_v31, %v1629_v12  ;;  %v1157_v55 = vadd.f32 %v1073_v34, %v560_v14  ;;  %6921 = vrot.lane.b32.xlu1 %v7340_v24, %s7033_s9  ;;  %v7595_v46 = vmul.f32 %v7457_v41, %v7380_v38 }
  0xa7   :  { %v7585_v22 = vunpack.i.h.bf16 %v6617_v45  ;;  %v7587_v6 = vunpack.i.l.bf16 %v6617_v45  ;;  %6916 = vrot.lane.b32.xlu0 %v7348_v25, %s7033_s9  ;;  %v2036_v10 = vmul.f32 %v7432_v3, %v1985_v36  ;;  %v2057_v31 = vmul.f32 %v7430_v2, %v1985_v36 }
  0xa8   :  { %11313 = vst [vmem:[#allocation50_spill] sm:$0xff] %v7595_v46  ;;  %v7599_v59 = vunpack.i.h.bf16 %v6622_v11  ;;  %v7601_v43 = vunpack.i.l.bf16 %v6622_v11  ;;  %v2570_v63 = vadd.f32 %v7479_v26, %v2121_v42  ;;  %v2591_v12 = vadd.f32 %v7488_v60, %v2142_v54 }
  0xa9   :  { %11311 = vst [vmem:[#allocation48_spill] sm:$0xff] %v7585_v22  ;;  %11312 = vst [vmem:[#allocation49_spill] sm:$0xff] %v7587_v6  ;;  %v1566_v14 = vmul.f32 %v7587_v6, %v7482_v7  ;;  %v1587_v17 = vmul.f32 %v7585_v22, %v7482_v7  ;;  %v7609_v20 = vpop.permute.xlu1 %6631  ;;  %v2120_v34 = vadd.f32 %v2036_v10, %v1607_v47 }
  0xaa   :  { %11314 = vst [vmem:[#allocation51_spill] sm:$0xff] %v7599_v59  ;;  %11315 = vst [vmem:[#allocation52_spill] sm:$0xff] %v7601_v43  ;;  %v6627_v33 = vpop.permute.xlu0 %6626  ;;  %v2141_v19 = vadd.f32 %v2057_v31, %v1628_v51  ;;  %v1565_v29 = vmul.f32 %v7587_v6, %v7526_v13  ;;  %v1586_v26 = vmul.f32 %v7585_v22, %v7526_v13  ;;  %v10930_v60 = vunpack.i.h.bf16 %v7609_v20 }
  0xab   :  { %v6633_v0 = vunpack.i.l.bf16 %v7609_v20  ;;  %v7618_v11 = vunpack.i.h.bf16 %v6627_v33  ;;  %v7620_v7 = vunpack.i.l.bf16 %v6627_v33  ;;  %6931 = vrot.lane.b32.xlu1 %v7340_v24, %s7034_s12  ;;  %6926 = vrot.lane.b32.xlu0 %v7348_v25, %s7034_s12  ;;  %v2569_v51 = vadd.f32 %v7492_v48, %v2120_v34 }
  0xac   :  { %v2590_v47 = vadd.f32 %v7510_v44, %v2141_v19  ;;  %v7629_v13 = vsub.f32 %v5086_v61, %v7311_v16  ;;  %v1650_v42 = vadd.f32 %v1566_v14, %v1137_v40  ;;  %v1671_v44 = vadd.f32 %v1587_v17, %v1158_v52 }
  0xad   :  { %11316 = vst [vmem:[#allocation53_spill] sm:$0xff] %v7618_v11  ;;  %11317 = vst [vmem:[#allocation54_spill] sm:$0xff] %v7620_v7  ;;  %v2778_v45 = vsel %vm2769_vm4, %v6633_v0, %v10930_v60  ;;  %v2079_v54 = vmul.f32 %v7620_v7, %v1989_v21  ;;  %v2100_v10 = vmul.f32 %v7618_v11, %v1989_v21  ;;  %v7640_v33 = vpop.permute.xlu1 %6641 }
  0xae   :  { %v7638_v31 = vrot.slane %v2778_v45, %v7099_v23  ;;  %11318 = vst [vmem:[#allocation55_spill] sm:$0xff] %v7640_v33  ;;  %v6637_v48 = vpop.permute.xlu0 %6636  ;;  %v2078_v61 = vmul.f32 %v7620_v7, %v1985_v36  ;;  %v2099_v34 = vmul.f32 %v7618_v11, %v1985_v36  ;;  %v10933_v9 = vunpack.i.l.bf16 %v7640_v33 }
  0xaf   :  { %6941 = vrot.lane.b32.xlu1 %v7340_v24, %s7035_s18  ;;  %6936 = vrot.lane.b32.xlu0 %v7348_v25, %s7035_s18  ;;  %v1649_v21 = vadd.f32 %v1565_v29, %v1136_v53  ;;  %v1670_v40 = vadd.f32 %v1586_v26, %v1157_v55  ;;  %v7650_v14 = vunpack.i.h.bf16 %v6637_v48  ;;  %v7652_v45 = vunpack.i.l.bf16 %v6637_v48 }
  0xb0   :  { %v2999_v52 = vmul.f32 %v7578_v4, %v7638_v31  ;;  %v3020_v36 = vmul.f32 %v7576_v50, %v7638_v31  ;;  %v2779_v24 = vsel %vm2769_vm4, %v10933_v9, %v6633_v0  ;;  %v2163_v17 = vadd.f32 %v2079_v54, %v1650_v42 }
  0xb1   :  { %11319 = vst [vmem:[#allocation56_spill] sm:$0xff] %v7650_v14  ;;  %11320 = vst [vmem:[#allocation57_spill] sm:$0xff] %v7652_v45  ;;  %v2184_v60 = vadd.f32 %v2100_v10, %v1671_v44  ;;  %v5132_v25 = vadd.f32 0.5, %v7629_v13  ;;  %v7664_v53 = vrot.slane %v2779_v24, %v7099_v23  ;;  %v7666_v55 = vpop.permute.xlu1 %6651  ;;  %v2162_v48 = vadd.f32 %v2078_v61, %v1649_v21 }
  0xb2   :  { %11321 = vst [vmem:[#allocation58_spill] sm:$0xff] %v7666_v55  ;;  %v6647_v29 = vpop.permute.xlu0 %6646  ;;  %v3083_v26 = vadd.f32 %v2999_v52, %v2570_v63  ;;  %v2183_v19 = vadd.f32 %v2099_v34, %v1670_v40  ;;  %v10934_v16 = vunpack.i.h.bf16 %v7666_v55  ;;  %v6653_v46 = vunpack.i.l.bf16 %v7666_v55 }
  0xb3   :  { %v7671_v0 = vunpack.i.h.bf16 %v6647_v29  ;;  %v7673_v42 = vunpack.i.l.bf16 %v6647_v29  ;;  %6951 = vrot.lane.b32.xlu1 %v7359_v27, %s7029_s8  ;;  %6946 = vrot.lane.b32.xlu0 %v7363_v28, %s7029_s8  ;;  %v3104_v54 = vadd.f32 %v3020_v36, %v2591_v12  ;;  %v2998_v63 = vmul.f32 %v7578_v4, %v7664_v53 }
  0xb4   :  { %v3019_v10 = vmul.f32 %v7576_v50, %v7664_v53  ;;  %v7685_v44 = vmul.f32 %v7459_v62, %v7384_v39  ;;  %v3291_v61 = vsel %vm3282_vm5, %v6653_v46, %v10934_v16  ;;  %v5153_v21 = vmul.f32 0.055555556, %v5132_v25 }
  0xb5   :  { %11322 = vst [vmem:[#allocation59_spill] sm:$0xff] %v7671_v0  ;;  %11323 = vst [vmem:[#allocation60_spill] sm:$0xff] %v7673_v42  ;;  %v2528_v34 = vmul.f32 %v7673_v42, %v7336_v30  ;;  %v7695_v12 = vmul.f32 %v7457_v41, %v7384_v39  ;;  %v7698_v40 = vrot.slane %v3291_v61, %v7099_v23  ;;  %v7700_v52 = vpop.permute.xlu1 %6661 }
  0xb6   :  { %11324 = vst [vmem:[#allocation61_spill] sm:$0xff] %v7685_v44  ;;  %11326 = vst [vmem:[#allocation63_spill] sm:$0xff] %v7700_v52  ;;  %v6657_v36 = vpop.permute.xlu0 %6656  ;;  %v7704_v24 = vmul.f32 %v7673_v42, %v7352_v18  ;;  %v7708_v29 = vmul.f32 %v7671_v0, %v7352_v18  ;;  %v2549_v25 = vmul.f32 %v7671_v0, %v7336_v30  ;;  %v10944_v16 = vunpack.i.l.bf16 %v7700_v52 }
  0xb7   :  { %11325 = vst [vmem:[#allocation62_spill] sm:$0xff] %v7695_v12  ;;  %6961 = vrot.lane.b32.xlu1 %v7359_v27, %s7028_s7  ;;  %6956 = vrot.lane.b32.xlu0 %v7363_v28, %s7028_s7  ;;  %v3082_v61 = vadd.f32 %v2998_v63, %v2569_v51  ;;  %v3103_v39 = vadd.f32 %v3019_v10, %v2590_v47  ;;  %v7718_v12 = vunpack.i.h.bf16 %v6657_v36  ;;  %v7720_v44 = vunpack.i.l.bf16 %v6657_v36 }
  0xb8   :  { %11327 = vst [vmem:[#allocation64_spill] sm:$0xff] %v7704_v24  ;;  %11328 = vst [vmem:[#allocation65_spill] sm:$0xff] %v7708_v29  ;;  %v3512_v18 = vmul.f32 %v7601_v43, %v7698_v40  ;;  %v3533_v30 = vmul.f32 %v7599_v59, %v7698_v40  ;;  %v3292_v9 = vsel %vm3282_vm5, %v10944_v16, %v6653_v46  ;;  %v7738_v52 = vfloor.f32 %v5153_v21 }
  0xb9   :  { %11329 = vst [vmem:[#allocation66_spill] sm:$0xff] %v7718_v12  ;;  %11330 = vst [vmem:[#allocation67_spill] sm:$0xff] %v7720_v44  ;;  %v2612_v55 = vadd.f32 %v2528_v34, %v2163_v17  ;;  %v2633_v50 = vadd.f32 %v2549_v25, %v2184_v60  ;;  %v2527_v51 = vmul.f32 %v7673_v42, %v7344_v32  ;;  %v7733_v63 = vpop.permute.xlu1 %6671 }
  0xba   :  { %v3460_v47 = vrot.slane %v3292_v9, %v7099_v23  ;;  %11331 = vst [vmem:[#allocation68_spill] sm:$0xff] %v7733_v63  ;;  %v6667_v10 = vpop.permute.xlu0 %6666  ;;  %v3596_v36 = vadd.f32 %v3512_v18, %v3083_v26  ;;  %v2548_v4 = vmul.f32 %v7671_v0, %v7344_v32  ;;  %v10952_v46 = vunpack.i.h.bf16 %v7733_v63 }
  0xbb   :  { %v6673_v60 = vunpack.i.l.bf16 %v7733_v63  ;;  %v7742_v17 = vunpack.i.h.bf16 %v6667_v10  ;;  %v7744_v34 = vunpack.i.l.bf16 %v6667_v10  ;;  %6971 = vrot.lane.b32.xlu1 %v7359_v27, %s7030_s13  ;;  %6966 = vrot.lane.b32.xlu0 %v7363_v28, %s7030_s13  ;;  %v3617_v9 = vadd.f32 %v3533_v30, %v3104_v54 }
  0xbc   :  { %v3511_v26 = vmul.f32 %v7601_v43, %v3460_v47  ;;  %v3532_v32 = vmul.f32 %v7599_v59, %v3460_v47  ;;  %v7754_v21 = vmul.f32 %v7459_v62, %v7394_v5  ;;  %v2611_v54 = vadd.f32 %v2527_v51, %v2162_v48 }
  0xbd   :  { %11332 = vst [vmem:[#allocation69_spill] sm:$0xff] %v7742_v17  ;;  %11333 = vst [vmem:[#allocation70_spill] sm:$0xff] %v7744_v34  ;;  %v3804_v25 = vsel %vm3795_vm6, %v6673_v60, %v10952_v46  ;;  %v3041_v18 = vmul.f32 %v7744_v34, %v7638_v31  ;;  %v3062_v10 = vmul.f32 %v7742_v17, %v7638_v31  ;;  %v6682_v16 = vpop.permute.xlu1 %6681  ;;  %vm5237_vm8 = vcmp.ge.f32.partialorder %v7738_v52, 1.0 }
  0xbe   :  { %11334 = vst [vmem:[#allocation71_spill] sm:$0xff] %v7754_v21  ;;  %v7765_v30 = vrot.slane %v3804_v25, %v7099_v23  ;;  %v7767_v0 = vpop.permute.xlu0 %6676  ;;  %v3595_v62 = vadd.f32 %v3511_v26, %v3082_v61  ;;  %v2632_v21 = vadd.f32 %v2548_v4, %v2183_v19  ;;  %v3040_v63 = vmul.f32 %v7744_v34, %v7664_v53 }
  0xbf   :  { %11336 = vst [vmem:[#allocation73_spill] sm:$0xff] %v7767_v0  ;;  %v7771_v59 = vunpack.i.h.bf16 %v6682_v16  ;;  %v7773_v46 = vunpack.i.l.bf16 %v6682_v16  ;;  %v10957_v43 = vunpack.i.l.bf16 %v7767_v0  ;;  %6981 = vrot.lane.b32.xlu1 %v7359_v27, %s7031_s20  ;;  %6976 = vrot.lane.b32.xlu0 %v7363_v28, %s7031_s20  ;;  %v3061_v31 = vmul.f32 %v7742_v17, %v7664_v53 }
  0xc0   :  { %11335 = vst [vmem:[#allocation72_spill] sm:$0xff] %v7765_v30  ;;  %v4025_v19 = vmul.f32 %v7652_v45, %v7765_v30  ;;  %v4046_v16 = vmul.f32 %v7650_v14, %v7765_v30  ;;  %v3616_v48 = vadd.f32 %v3532_v32, %v3103_v39  ;;  %v3125_v61 = vadd.f32 %v3041_v18, %v2612_v55 }
  0xc1   :  { %11337 = vst [vmem:[#allocation74_spill] sm:$0xff] %v7771_v59  ;;  %11338 = vst [vmem:[#allocation75_spill] sm:$0xff] %v7773_v46  ;;  %v3805_v27 = vsel %vm3795_vm6, %v10957_v43, %v6673_v60  ;;  %v3146_v51 = vadd.f32 %v3062_v10, %v2633_v50  ;;  %v3554_v28 = vmul.f32 %v7773_v46, %v7698_v40  ;;  %v7796_v26 = vpop.permute.xlu1 %4869  ;;  %vm5258_vm9 = vcmp.le.f32.partialorder %v7738_v52, 16.0 }
  0xc2   :  { %v7794_v53 = vrot.slane %v3805_v27, %v7099_v23  ;;  %11340 = vst [vmem:[#allocation77_spill] sm:$0xff] %v7796_v26  ;;  %v7798_v25 = vpop.permute.xlu0 %6686  ;;  %v4109_v4 = vadd.f32 %v4025_v19, %v3596_v36  ;;  %v3575_v39 = vmul.f32 %v7771_v59, %v7698_v40  ;;  %v3124_v32 = vadd.f32 %v3040_v63, %v2611_v54  ;;  %vm5279_vm10 = vmand %vm5237_vm8, %vm5258_vm9 }
  0xc3   :  { %11341 = vst [vmem:[#allocation78_spill] sm:$0xff] %v7798_v25  ;;  %v10961_v0 = vunpack.i.h.bf16 %v7798_v25  ;;  %v6688_v55 = vunpack.i.l.bf16 %v7798_v25  ;;  %6991 = vrot.lane.b32.xlu1 %v7367_v1, %s7032_s27  ;;  %6986 = vrot.lane.b32.xlu0 %v7371_v35, %s7032_s27  ;;  %v4130_v50 = vadd.f32 %v4046_v16, %v3617_v9  ;;  %v3145_v60 = vadd.f32 %v3061_v31, %v2632_v21 }
  0xc4   :  { %11339 = vst [vmem:[#allocation76_spill] sm:$0xff] %v7794_v53  ;;  %v4024_v18 = vmul.f32 %v7652_v45, %v7794_v53  ;;  %v4045_v36 = vmul.f32 %v7650_v14, %v7794_v53  ;;  %v3553_v40 = vmul.f32 %v7773_v46, %v3460_v47  ;;  %v3574_v63 = vmul.f32 %v7771_v59, %v3460_v47 }
  0xc5   :  { %v4317_v10 = vsel %vm4308_vm7, %v6688_v55, %v10961_v0  ;;  %v5195_v54 = vmul.f32 18.0, %v7738_v52  ;;  %v7824_v21 = vpop.permute.xlu1 %6691  ;;  %v7830_v47 = vadd.f32 %v3554_v28, %v3125_v61  ;;  %v7832_v16 = vadd.f32 %v3575_v39, %v3146_v51 }
  0xc6   :  { %v7822_v9 = vrot.slane %v4317_v10, %v7099_v23  ;;  %11343 = vst [vmem:[#allocation80_spill] sm:$0xff] %v7824_v21  ;;  %v7826_v31 = vpop.permute.xlu0 %4874  ;;  %v7828_v19 = vadd.f32 %v4024_v18, %v3595_v62  ;;  %v10958_v27 = vunpack.i.l.bf16 %v7824_v21  ;;  %v7839_v52 = vadd.f32 %v4045_v36, %v3616_v48 }
  0xc7   :  { %11344 = vst [vmem:[#allocation81_spill] sm:$0xff] %v7826_v31  ;;  %11345 = vst [vmem:[#allocation82_spill] sm:$0xff] %v7830_v47  ;;  %7001 = vrot.lane.b32.xlu1 %v7367_v1, %s7033_s9  ;;  %6996 = vrot.lane.b32.xlu0 %v7371_v35, %s7033_s9  ;;  %v7841_v10 = vadd.f32 %v3553_v40, %v3124_v32  ;;  %v5216_v43 = vsub.f32 %v7629_v13, %v5195_v54  ;;  %v7850_v28 = vadd.s32 1280, %v7304_v15 }
  0xc8   :  { %11342 = vst [vmem:[#allocation79_spill] sm:$0xff] %v7822_v9  ;;  %11346 = vst [vmem:[#allocation83_spill] sm:$0xff] %v7832_v16  ;;  %v4538_v61 = vmul.f32 %v7720_v44, %v7822_v9  ;;  %v4559_v51 = vmul.f32 %v7718_v12, %v7822_v9  ;;  %v4318_v48 = vsel %vm4308_vm7, %v10958_v27, %v6688_v55  ;;  %v11355_v27 = vunpack.i.h.bf16 %v7418_v56 }
  0xc9   :  { %11347 = vst [vmem:[#allocation84_spill] sm:$0xff] %v7841_v10  ;;  %11348 = vst [vmem:[#allocation85_spill] sm:$0xff] %v7850_v28  ;;  %v7856_v39 = vadd.f32 %v3574_v63, %v3145_v60  ;;  %vm5300_vm11 = vcmp.ge.f32.partialorder %v5216_v43, 1.0  ;;  %vm5342_vm12 = vcmp.le.f32.partialorder %v5216_v43, 16.0  ;;  %v7859_v13 = vrot.slane %v4318_v48, %v7099_v23  ;;  %v7861_v32 = vpop.permute.xlu1 %6701  ;;  %v11371_v10 = vld [vmem:[#allocation25_spill] sm:$0xff] }
  0xca   :  { %11351 = vst [vmem:[#allocation88_spill] sm:$0xff] %v7861_v32  ;;  %v7863_v18 = vpop.permute.xlu0 %6696  ;;  %v4622_v36 = vadd.f32 %v4538_v61, %v4109_v4  ;;  %v4643_v40 = vadd.f32 %v4559_v51, %v4130_v50  ;;  %vm5321_vm13 = vmand %vm5279_vm10, %vm5300_vm11  ;;  %v7867_v54 = vmul.f32 %v7457_v41, %v7394_v5  ;;  %v10964_v55 = vunpack.i.h.bf16 %v7861_v32 }
  0xcb   :  { %11349 = vst [vmem:[#allocation86_spill] sm:$0xff] %v7856_v39  ;;  %11350 = vst [vmem:[#allocation87_spill] sm:$0xff] %v7859_v13  ;;  %v10967_v60 = vunpack.i.l.bf16 %v7861_v32  ;;  %v6699_v43 = vunpack.i.h.bf16 %v7863_v18  ;;  %v10968_v63 = vunpack.i.l.bf16 %v7863_v18  ;;  %7011 = vrot.lane.b32.xlu1 %v7367_v1, %s7034_s12  ;;  %7006 = vrot.lane.b32.xlu0 %v7371_v35, %s7034_s12  ;;  %v10959_v61 = vmov 1.0   ;;  %v11362_v32 = vld [vmem:[#allocation27_spill] sm:$0xff] }
  0xcc   :  { %11352 = vst [vmem:[#allocation89_spill] sm:$0xff] %v7863_v18  ;;  %11353 = vst [vmem:[#allocation90_spill] sm:$0xff] %v7867_v54  ;;  %v7878_v4 = vadd.f32 %v7796_v26, %v4622_v36  ;;  %v7881_v50 = vadd.f32 %v7826_v31, %v4643_v40  ;;  %v7887_v48 = vmul.f32 %v7673_v42, %v7380_v38  ;;  %v11357_v0 = vmov %v11355_v27  ;;  %v11361_v18 = vld [vmem:[#allocation18_spill] sm:$0xff] }
  0xcd   :  { %vm5363_vm14 = vmand %vm5321_vm13, %vm5342_vm12  ;;  %v290_v36 = vsel %vm269_vm1, %v10964_v55, %v11355_v27  ;;  %v277_v40 = vsel %vm269_vm1, %v6699_v43, %v10967_v60  ;;  %v289_v62 = vsel %vm269_vm1, %v11357_v0, %v10968_v63  ;;  %v7912_v41 = vpop.permute.xlu1 %6711  ;;  %v11363_v25 = vunpack.i.h.bf16 %v11362_v32 }
  0xce   :  { %6284 = vmatprep.mubr.msk.f32.mxu0 %vm5363_vm14, %v10959_v61  ;;  %11354 = vst [vmem:[#allocation91_spill] sm:$0xff] %v7887_v48  ;;  %v11356_v61 = vunpack.i.h.bf16 %v7375_v37  ;;  %v406_v5 = vrot.slane %v290_v36, %v7099_v23  ;;  %v458_v55 = vrot.slane %v277_v40, %v7099_v23  ;;  %11358 = vst [vmem:[#allocation92_spill] sm:$0xff] %v7912_v41  ;;  %v7914_v60 = vpop.permute.xlu0 %6706  ;;  %v11364_v14 = vunpack.i.h.bf16 %v7912_v41 }
  0xcf   :  { %11359 = vst [vmem:[#allocation93_spill] sm:$0xff] %v7914_v60  ;;  %v7918_v37 = vmul.f32 %v7720_v44, %v7859_v13  ;;  %v7925_v36 = vmul.f32 %v7718_v12, %v7859_v13  ;;  %7021 = vrot.lane.b32.xlu1 %v7367_v1, %s7035_s18  ;;  %7016 = vrot.lane.b32.xlu0 %v7371_v35, %s7035_s18  ;;  %v11365_v21 = vunpack.i.l.bf16 %v7912_v41  ;;  %v11368_v59 = vunpack.i.l.bf16 %v7914_v60 }
  0xd0   :  { %v278_v51 = vsel %vm269_vm1, %v11356_v61, %v6699_v43  ;;  %v410_v43 = vrot.slane %v289_v62, %v7099_v23  ;;  %v508_v40 = vmul.f32 %v7420_v57, %v406_v5  ;;  %v6709_v62 = vunpack.i.h.bf16 %v7914_v60  ;;  %v11360_v61 = vld [vmem:[#allocation37_spill] sm:$0xff] }
  0xd1   :  { %v454_v27 = vrot.slane %v278_v51, %v7099_v23  ;;  %v487_v51 = vmul.f32 %v7422_v58, %v406_v5  ;;  %v529_v0 = vmul.f32 %v7496_v8, %v406_v5  ;;  %v550_v56 = vmul.f32 %v11360_v61, %v406_v5  ;;  %v7951_v44 = vpop.permute.xlu1 %6721 }
  0xd2   :  { %v500_v48 = vmul.f32 %v7422_v58, %v458_v55  ;;  %v521_v35 = vmul.f32 %v7420_v57, %v458_v55  ;;  %v542_v28 = vmul.f32 %v7496_v8, %v458_v55  ;;  %v7947_v63 = vmul.f32 %v11360_v61, %v458_v55  ;;  %v6717_v41 = vpop.permute.xlu0 %6716 }
  0xd3   :  { %v499_v42 = vmul.f32 %v7422_v58, %v454_v27  ;;  %v520_v1 = vmul.f32 %v7420_v57, %v454_v27  ;;  %v541_v38 = vmul.f32 %v7496_v8, %v454_v27  ;;  %v7944_v54 = vmul.f32 %v11360_v61, %v454_v27  ;;  %755 = vrot.lane.b32.xlu1 %v11361_v18, %s7028_s7 }
  0xd4   :  { %v488_v5 = vmul.f32 %v7422_v58, %v410_v43  ;;  %v509_v12 = vmul.f32 %v7420_v57, %v410_v43  ;;  %v802_v27 = vsel %vm781_vm0, %v11364_v14, %v11363_v25  ;;  %v789_v55 = vsel %vm781_vm0, %v6709_v62, %v11365_v21  ;;  %v11366_v58 = vld [vmem:[#allocation19_spill] sm:$0xff]  ;;  %241 = vrot.lane.b32.xlu0 %v11361_v18, %s7029_s8 }
  0xd5   :  { %v11367_v45 = vunpack.i.h.bf16 %v11366_v58  ;;  %v11369_v46 = vmov %v11363_v25  ;;  %v530_v14 = vmul.f32 %v7496_v8, %v410_v43  ;;  %v919_v25 = vrot.slane %v802_v27, %v7099_v23  ;;  %v11372_v8 = vld [vmem:[#allocation43_spill] sm:$0xff]  ;;  %v11373_v27 = vld [vmem:[#allocation42_spill] sm:$0xff] }
  0xd6   :  { %v801_v39 = vsel %vm781_vm0, %v11369_v46, %v11368_v59  ;;  %v971_v58 = vrot.slane %v789_v55, %v7099_v23  ;;  %v11370_v46 = vld [vmem:[#allocation26_spill] sm:$0xff]  ;;  %v7995_v55 = vunpack.i.l.bf16 %v6717_v41  ;;  %v8025_v24 = vpop.permute.xlu0 %6726 }
  0xd7   :  { %v790_v57 = vsel %vm781_vm0, %v11367_v45, %v6709_v62  ;;  %v551_v45 = vmul.f32 %v11360_v61, %v410_v43  ;;  %v923_v62 = vrot.slane %v801_v39, %v7099_v23  ;;  %v1000_v60 = vmul.f32 %v11370_v46, %v919_v25  ;;  %1781 = vrot.lane.b32.xlu1 %v11361_v18, %s7031_s20 }
  0xd8   :  { %v967_v21 = vrot.slane %v790_v57, %v7099_v23  ;;  %v1021_v13 = vmul.f32 %v11371_v10, %v919_v25  ;;  %v1042_v53 = vmul.f32 %v11372_v8, %v919_v25  ;;  %v1063_v16 = vmul.f32 %v11373_v27, %v919_v25  ;;  %11375 = vst [vmem:[#allocation94_spill] sm:$0xff] %v7995_v55 }
  0xd9   :  { %v1013_v43 = vmul.f32 %v11370_v46, %v971_v58  ;;  %v7993_v39 = vunpack.i.h.bf16 %v6717_v41  ;;  %1268 = vrot.lane.b32.xlu0 %v11361_v18, %s7030_s13  ;;  %v7999_v59 = vadd.f32 %v1000_v60, %v487_v51  ;;  %v1034_v61 = vmul.f32 %v11371_v10, %v971_v58  ;;  %v11376_v51 = vld [vmem:[#allocation3_spill] sm:$0xff]  ;;  %11377 = vst [vmem:[#allocation95_spill] sm:$0xff] %v8025_v24 }
  0xda   :  { %v1012_v57 = vmul.f32 %v11370_v46, %v967_v21  ;;  %v8001_v32 = vadd.f32 %v1021_v13, %v508_v40  ;;  %v1033_v25 = vmul.f32 %v11371_v10, %v967_v21  ;;  %v1001_v47 = vmul.f32 %v11370_v46, %v923_v62 }
  0xdb   :  { %11374 = vst [vmem:[#allocation19_spill] sm:$0xff] %v7993_v39  ;;  %v1022_v9 = vmul.f32 %v11371_v10, %v923_v62  ;;  %v1043_v30 = vmul.f32 %v11372_v8, %v923_v62  ;;  %v1054_v41 = vmul.f32 %v11372_v8, %v967_v21  ;;  %v6732_v39 = vpop.permute.xlu1 %6731  ;;  %v8009_v55 = vadd.f32 %v1042_v53, %v529_v0 }
  0xdc   :  { %v8011_v18 = vadd.f32 %v1063_v16, %v550_v56  ;;  %v1055_v13 = vmul.f32 %v11372_v8, %v971_v58  ;;  %v1064_v60 = vmul.f32 %v11373_v27, %v923_v62  ;;  %3258 = vrot.lane.b32.xlu1 %v11376_v51, %s7033_s9  ;;  %v1075_v40 = vmul.f32 %v11373_v27, %v967_v21 }
  0xdd   :  { %v1076_v10 = vmul.f32 %v11373_v27, %v971_v58  ;;  %v8019_v46 = vadd.f32 %v1001_v47, %v488_v5  ;;  %v1096_v17 = vadd.f32 %v1012_v57, %v499_v42  ;;  %2745 = vrot.lane.b32.xlu0 %v11376_v51, %s7032_s27  ;;  %v1097_v53 = vadd.f32 %v1013_v43, %v500_v48  ;;  %v11379_v58 = vld [vmem:[#allocation33_spill] sm:$0xff]  ;;  %v11382_v48 = vld [vmem:[#allocation36_spill] sm:$0xff] }
  0xde   :  { %v8023_v56 = vadd.f32 %v1022_v9, %v509_v12  ;;  %v1117_v16 = vadd.f32 %v1033_v25, %v520_v1  ;;  %v1118_v0 = vadd.f32 %v1034_v61, %v521_v35  ;;  %v1127_v8 = vadd.f32 %v1043_v30, %v530_v14 }
  0xdf   :  { %v1138_v62 = vadd.f32 %v1054_v41, %v541_v38  ;;  %v1139_v34 = vadd.f32 %v1055_v13, %v542_v28  ;;  %v1148_v29 = vadd.f32 %v1064_v60, %v551_v45  ;;  %v11378_v21 = vunpack.i.h.bf16 %v7951_v44  ;;  %v8049_v14 = vpop.permute.xlu1 %6741 }
  0xe0   :  { %v11380_v47 = vunpack.i.h.bf16 %v11379_v58  ;;  %v11381_v5 = vunpack.i.l.bf16 %v7951_v44  ;;  %v11383_v12 = vunpack.i.h.bf16 %v11382_v48  ;;  %v4982_v38 = vmax.f32 %v7878_v4, 0.0  ;;  %4284 = vrot.lane.b32.xlu1 %v11376_v51, %s7035_s18  ;;  %11384 = vst [vmem:[#allocation33_spill] sm:$0xff] %v8049_v14 }
  0xe1   :  { %v5003_v30 = vmax.f32 %v7881_v50, 0.0  ;;  %v1159_v28 = vadd.f32 %v1075_v40, %v7944_v54  ;;  %v8045_v61 = vadd.f32 %v1076_v10, %v7947_v63  ;;  %3771 = vrot.lane.b32.xlu0 %v11376_v51, %s7034_s12  ;;  %v8053_v45 = vunpack.i.h.bf16 %v6732_v39  ;;  %v11386_v54 = vld [vmem:[#allocation24_spill] sm:$0xff]  ;;  %v11387_v10 = vld [vmem:[#allocation23_spill] sm:$0xff] }
  0xe2   :  { %v1303_v42 = vsel %vm11175_vm2, %v11380_v47, %v11378_v21  ;;  %v1314_v9 = vsel %vm11175_vm2, %v11383_v12, %v11381_v5  ;;  %v11021_v50 = vunpack.i.h.bf16 %v8025_v24  ;;  %v11022_v57 = vunpack.i.l.bf16 %v8025_v24  ;;  %v8085_v5 = vpop.permute.xlu0 %6736 }
  0xe3   :  { %v1436_v1 = vrot.slane %v1314_v9, %v7099_v23  ;;  %v1480_v35 = vrot.slane %v1303_v42, %v7099_v23  ;;  %v6455_v4 = vpack.c.bf16 %v5003_v30, %v4982_v38  ;;  %11385 = vst [vmem:[#allocation96_spill] sm:$0xff] %v8053_v45  ;;  %v8059_v25 = vunpack.i.l.bf16 %v6732_v39 }
  0xe4   :  { %v4621_v41 = vadd.f32 %v7918_v37, %v7828_v19  ;;  %v11389_v39 = vunpack.i.h.bf16 %v7951_v44  ;;  %v11390_v37 = vmov %v11383_v12 }
  0xe5   :  { %v1525_v43 = vmul.f32 %v11386_v54, %v1480_v35  ;;  %v1546_v63 = vmul.f32 %v11387_v10, %v1480_v35  ;;  %11388 = vst [vmem:[#allocation97_spill] sm:$0xff] %v8059_v25  ;;  %v8064_v13 = vmul.f32 %v11386_v54, %v1436_v1  ;;  %v1556_v60 = vmul.f32 %v7587_v6, %v1436_v1 }
  0xe6   :  { %v1567_v40 = vmul.f32 %v7587_v6, %v1480_v35  ;;  %v1577_v21 = vmul.f32 %v7585_v22, %v1436_v1  ;;  %6456 = vmatprep.subr.bf16.mxu0 %v6455_v4  ;;  %v8070_v58 = vmul.f32 %v11387_v10, %v1436_v1  ;;  %v1588_v47 = vmul.f32 %v7585_v22, %v1480_v35 }
  0xe7   :  { %v1302_v19 = vsel %vm11175_vm2, %v11389_v39, %v11022_v57  ;;  %v1315_v42 = vsel %vm11175_vm2, %v11021_v50, %v11390_v37  ;;  %v8087_v12 = vadd.f32 %v1525_v43, %v1096_v17  ;;  %v8089_v9 = vadd.f32 %v1546_v63, %v1117_v16  ;;  %v8101_v37 = vpop.permute.xlu1 %4884 }
  0xe8   :  { %v8091_v38 = vadd.f32 %v1556_v60, %v1127_v8  ;;  %v8093_v30 = vadd.f32 %v1567_v40, %v1138_v62  ;;  %v8095_v1 = vadd.f32 %v1577_v21, %v1148_v29  ;;  %v1432_v35 = vrot.slane %v1315_v42, %v7099_v23  ;;  %11391 = vst [vmem:[#allocation98_spill] sm:$0xff] %v8101_v37 }
  0xe9   :  { %v1484_v4 = vrot.slane %v1302_v19, %v7099_v23  ;;  %v4642_v39 = vadd.f32 %v7925_v36, %v7839_v52  ;;  %v4897_v17 = vadd.f32 %v7796_v26, %v4621_v41  ;;  %v6739_v62 = vunpack.i.h.bf16 %v8085_v5 }
  0xea   :  { %v1513_v29 = vmul.f32 %v11386_v54, %v1432_v35  ;;  %v1534_v63 = vmul.f32 %v11387_v10, %v1432_v35  ;;  %v1672_v40 = vadd.f32 %v1588_v47, %v1159_v28  ;;  %v1555_v52 = vmul.f32 %v7587_v6, %v1432_v35 }
  0xeb   :  { %v1526_v43 = vmul.f32 %v11386_v54, %v1484_v4  ;;  %v1547_v60 = vmul.f32 %v11387_v10, %v1484_v4  ;;  %v1568_v36 = vmul.f32 %v7587_v6, %v1484_v4  ;;  %v1576_v21 = vmul.f32 %v7585_v22, %v1432_v35 }
  0xec   :  { %v1589_v19 = vmul.f32 %v7585_v22, %v1484_v4  ;;  %v8117_v42 = vadd.f32 %v1513_v29, %v7999_v59  ;;  %v8120_v57 = vadd.f32 %v1534_v63, %v8001_v32  ;;  %v1639_v28 = vadd.f32 %v1555_v52, %v8009_v55  ;;  %v11399_v55 = vld [vmem:[#allocation41_spill] sm:$0xff] }
  0xed   :  { %v1610_v50 = vadd.f32 %v1526_v43, %v1097_v53  ;;  %v1631_v8 = vadd.f32 %v1547_v60, %v1118_v0  ;;  %v1652_v47 = vadd.f32 %v1568_v36, %v1139_v34  ;;  %v4918_v16 = vadd.f32 %v7826_v31, %v4642_v39  ;;  %v8134_v53 = vpop.permute.xlu0 %4879  ;;  %v8136_v0 = vpop.permute.xlu1 %6751 }
  0xee   :  { %11392 = vst [vmem:[#allocation99_spill] sm:$0xff] %v8117_v42  ;;  %11393 = vst [vmem:[#allocation100_spill] sm:$0xff] %v8120_v57  ;;  %v4981_v51 = vmax.f32 %v4897_v17, 0.0  ;;  %v11394_v41 = vunpack.i.h.bf16 %v7558_v49  ;;  %v11395_v35 = vunpack.i.h.bf16 %v8049_v14  ;;  %v11396_v59 = vunpack.i.l.bf16 %v8049_v14 }
  0xef   :  { %11397 = vst [vmem:[#allocation101_spill] sm:$0xff] %v8134_v53  ;;  %11398 = vst [vmem:[#allocation102_spill] sm:$0xff] %v8136_v0  ;;  %v11400_v39 = vunpack.i.h.bf16 %v11399_v55  ;;  %v11401_v43 = vunpack.i.l.bf16 %v8085_v5  ;;  %v1660_v52 = vadd.f32 %v1576_v21, %v8011_v18  ;;  %v5002_v36 = vmax.f32 %v4918_v16, 0.0 }
  0xf0   :  { %v1828_v4 = vsel %vm11174_vm3, %v11395_v35, %v11394_v41  ;;  %v1815_v32 = vsel %vm11174_vm3, %v6739_v62, %v11396_v59  ;;  %v11402_v63 = vmov %v11394_v41 }
  0xf1   :  { %v1945_v34 = vrot.slane %v1828_v4, %v7099_v23  ;;  %v1816_v17 = vsel %vm11174_vm3, %v11400_v39, %v6739_v62  ;;  %v1997_v29 = vrot.slane %v1815_v32, %v7099_v23  ;;  %v1827_v60 = vsel %vm11174_vm3, %v11402_v63, %v11401_v43  ;;  %v8195_v26 = vpop.permute.xlu1 %6761 }
  0xf2   :  { %v1993_v41 = vrot.slane %v1816_v17, %v7099_v23  ;;  %v1949_v35 = vrot.slane %v1827_v60, %v7099_v23  ;;  %v1673_v4 = vadd.f32 %v1589_v19, %v8045_v61  ;;  %v6457_v55 = vpack.c.bf16 %v5002_v36, %v4981_v51  ;;  %v8174_v36 = vpop.permute.xlu0 %6746  ;;  %11413 = vst [vmem:[#allocation112_spill] sm:$0xff] %v8195_v26 }
  0xf3   :  { %v2068_v62 = vmul.f32 %v7620_v7, %v1945_v34  ;;  %v2089_v59 = vmul.f32 %v7618_v11, %v1945_v34  ;;  %v2039_v43 = vmul.f32 %v7432_v3, %v1997_v29  ;;  %v8161_v16 = vmul.f32 %v7432_v3, %v1945_v34  ;;  %11407 = vst [vmem:[#allocation106_spill] sm:$0xff] %v8174_v36 }
  0xf4   :  { %v2038_v39 = vmul.f32 %v7432_v3, %v1993_v41  ;;  %v2059_v18 = vmul.f32 %v7430_v2, %v1993_v41  ;;  %v8164_v21 = vmul.f32 %v7430_v2, %v1945_v34  ;;  %v2060_v19 = vmul.f32 %v7430_v2, %v1997_v29  ;;  %6458 = vmatpush1.bf16.xpose.msra.mxu0 %v6457_v55 }
  0xf5   :  { %11403 = vst [vmem:[#allocation41_spill] sm:$0xff] %v8161_v16  ;;  %v8166_v61 = vadd.f32 %v2068_v62, %v1639_v28  ;;  %v8169_v17 = vadd.f32 %v2089_v59, %v1660_v52  ;;  %v2069_v51 = vmul.f32 %v7620_v7, %v1949_v35  ;;  %v2080_v63 = vmul.f32 %v7620_v7, %v1993_v41 }
  0xf6   :  { %11404 = vst [vmem:[#allocation103_spill] sm:$0xff] %v8164_v21  ;;  %v2081_v60 = vmul.f32 %v7620_v7, %v1997_v29  ;;  %v8177_v32 = vmul.f32 %v7432_v3, %v1949_v35  ;;  %v8180_v34 = vmul.f32 %v7430_v2, %v1949_v35  ;;  %v2101_v28 = vmul.f32 %v7618_v11, %v1993_v41 }
  0xf7   :  { %11405 = vst [vmem:[#allocation104_spill] sm:$0xff] %v8166_v61  ;;  %11406 = vst [vmem:[#allocation105_spill] sm:$0xff] %v8169_v17  ;;  %v2122_v62 = vadd.f32 %v2038_v39, %v8087_v12  ;;  %v2090_v52 = vmul.f32 %v7618_v11, %v1949_v35  ;;  %v2102_v59 = vmul.f32 %v7618_v11, %v1997_v29  ;;  %v11030_v12 = vunpack.i.l.bf16 %v8136_v0 }
  0xf8   :  { %11408 = vst [vmem:[#allocation107_spill] sm:$0xff] %v8177_v32  ;;  %11409 = vst [vmem:[#allocation108_spill] sm:$0xff] %v8180_v34  ;;  %v8186_v55 = vadd.f32 %v2039_v43, %v1610_v50  ;;  %v2143_v48 = vadd.f32 %v2059_v18, %v8089_v9  ;;  %v8189_v49 = vadd.f32 %v2060_v19, %v1631_v8  ;;  %v11415_v29 = vunpack.i.h.bf16 %v7640_v33 }
  0xf9   :  { %v8192_v17 = vadd.f32 %v2069_v51, %v8091_v38  ;;  %v2164_v61 = vadd.f32 %v2080_v63, %v8093_v30  ;;  %v2185_v31 = vadd.f32 %v2101_v28, %v1672_v40  ;;  %v8197_v41 = vadd.f32 %v2081_v60, %v1652_v47  ;;  %v11418_v40 = vld [vmem:[#allocation39_spill] sm:$0xff]  ;;  %v11419_v47 = vld [vmem:[#allocation40_spill] sm:$0xff]  ;;  %v11422_v60 = vld [vmem:[#allocation65_spill] sm:$0xff] }
  0xfa   :  { %11410 = vst [vmem:[#allocation109_spill] sm:$0xff] %v8186_v55  ;;  %11411 = vst [vmem:[#allocation110_spill] sm:$0xff] %v8189_v49  ;;  %v11416_v50 = vunpack.i.h.bf16 %v8136_v0  ;;  %v6749_v8 = vunpack.i.h.bf16 %v8174_v36  ;;  %v11032_v30 = vunpack.i.l.bf16 %v8174_v36  ;;  %v2571_v35 = vadd.f32 %v11418_v40, %v2122_v62  ;;  %v11421_v51 = vld [vmem:[#allocation64_spill] sm:$0xff]  ;;  %v11519_v49 = vld [vmem:[#allocation26_spill] sm:$0xff] }
  0xfb   :  { %11412 = vst [vmem:[#allocation111_spill] sm:$0xff] %v8192_v17  ;;  %11414 = vst [vmem:[#allocation113_spill] sm:$0xff] %v8197_v41  ;;  %v2592_v39 = vadd.f32 %v11419_v47, %v2143_v48  ;;  %v11420_v18 = vunpack.i.h.bf16 %v7609_v20  ;;  %v2613_v63 = vadd.f32 %v11421_v51, %v2164_v61  ;;  %v2634_v28 = vadd.f32 %v11422_v60, %v2185_v31  ;;  %v11426_v20 = vld [vmem:[#allocation70_spill] sm:$0xff]  ;;  %v11435_v60 = vld [vmem:[#allocation19_spill] sm:$0xff] }
  0xfc   :  { %v2789_v9 = vsel %vm2769_vm4, %v11416_v50, %v11415_v29  ;;  %v2776_v43 = vsel %vm2769_vm4, %v6749_v8, %v11030_v12  ;;  %v8223_v29 = vpop.permute.xlu0 %6756  ;;  %v8226_v62 = vadd.f32 %v2090_v52, %v8095_v1  ;;  %v8228_v48 = vadd.f32 %v2102_v59, %v1673_v4  ;;  %v11431_v4 = vld [vmem:[#allocation72_spill] sm:$0xff]  ;;  %v11432_v52 = vld [vmem:[#allocation94_spill] sm:$0xff] }
  0xfd   :  { %v8208_v38 = vrot.slane %v2789_v9, %v7099_v23  ;;  %v2777_v19 = vsel %vm2769_vm4, %v11420_v18, %v6749_v8  ;;  %11423 = vst [vmem:[#allocation39_spill] sm:$0xff] %v8223_v29  ;;  %v2959_v9 = vrot.slane %v2776_v43, %v7099_v23  ;;  %v11428_v8 = vld [vmem:[#allocation69_spill] sm:$0xff]  ;;  %v11430_v31 = vunpack.i.h.bf16 %v7640_v33  ;;  %v11433_v43 = vld [vmem:[#allocation47_spill] sm:$0xff] }
  0xfe   :  { %11424 = vst [vmem:[#allocation40_spill] sm:$0xff] %v8226_v62  ;;  %11425 = vst [vmem:[#allocation64_spill] sm:$0xff] %v8228_v48  ;;  %v2955_v50 = vrot.slane %v2777_v19, %v7099_v23  ;;  %v4067_v59 = vmul.f32 %v11432_v52, %v11431_v4  ;;  %v11434_v19 = vld [vmem:[#allocation46_spill] sm:$0xff]  ;;  %v4088_v12 = vmul.f32 %v11435_v60, %v11431_v4 }
  0xff   :  { %11417 = vst [vmem:[#allocation114_spill] sm:$0xff] %v8208_v38  ;;  %v8234_v40 = vmul.f32 %v11426_v20, %v8208_v38  ;;  %v8238_v61 = vmul.f32 %v11428_v8, %v8208_v38  ;;  %v2788_v1 = vsel %vm2769_vm4, %v11430_v31, %v11032_v30  ;;  %v8258_v33 = vmul.f32 %v11433_v43, %v2959_v9  ;;  %v11446_v38 = vld [vmem:[#allocation82_spill] sm:$0xff] }
 0x100   :  { %v8249_v47 = vrot.slane %v2788_v1, %v7099_v23  ;;  %v3000_v18 = vmul.f32 %v11433_v43, %v2955_v50  ;;  %v3021_v51 = vmul.f32 %v11434_v19, %v2955_v50  ;;  %v8261_v31 = vmul.f32 %v11434_v19, %v2959_v9  ;;  %v8286_v57 = vpop.permute.xlu0 %6766 }
 0x101   :  { %11427 = vst [vmem:[#allocation65_spill] sm:$0xff] %v8234_v40  ;;  %11429 = vst [vmem:[#allocation115_spill] sm:$0xff] %v8238_v61  ;;  %v8255_v61 = vpop.permute.xlu1 %6771  ;;  %v3042_v30 = vmul.f32 %v11426_v20, %v2955_v50  ;;  %v11439_v40 = vld [vmem:[#allocation79_spill] sm:$0xff]  ;;  %v8271_v0 = vmul.f32 %v11426_v20, %v2959_v9  ;;  %v3063_v48 = vmul.f32 %v11428_v8, %v2955_v50  ;;  %v11042_v50 = vunpack.i.l.bf16 %v8195_v26 }
 0x102   :  { %11436 = vst [vmem:[#allocation72_spill] sm:$0xff] %v8255_v61  ;;  %11437 = vst [vmem:[#allocation116_spill] sm:$0xff] %v8258_v33  ;;  %v4580_v1 = vmul.f32 %v8059_v25, %v11439_v40  ;;  %v8268_v36 = vmul.f32 %v11426_v20, %v8249_v47  ;;  %v8275_v4 = vmul.f32 %v11428_v8, %v8249_v47 }
 0x103   :  { %11438 = vst [vmem:[#allocation117_spill] sm:$0xff] %v8261_v31  ;;  %11441 = vst [vmem:[#allocation118_spill] sm:$0xff] %v8271_v0  ;;  %v8279_v41 = vmul.f32 %v11428_v8, %v2959_v9  ;;  %v8281_v62 = vadd.f32 %v3000_v18, %v2571_v35  ;;  %v8283_v17 = vadd.f32 %v3021_v51, %v2592_v39  ;;  %v6759_v9 = vunpack.i.h.bf16 %v8223_v29  ;;  %v11449_v39 = vld [vmem:[#allocation76_spill] sm:$0xff]  ;;  %v11451_v51 = vld [vmem:[#allocation63_spill] sm:$0xff] }
 0x104   :  { %11440 = vst [vmem:[#allocation79_spill] sm:$0xff] %v8268_v36  ;;  %11442 = vst [vmem:[#allocation119_spill] sm:$0xff] %v8275_v4  ;;  %v4151_v21 = vadd.f32 %v4067_v59, %v11446_v38  ;;  %v11448_v36 = vld [vmem:[#allocation83_spill] sm:$0xff]  ;;  %v4601_v0 = vmul.f32 %v8053_v45, %v11439_v40  ;;  %v11039_v4 = vunpack.i.h.bf16 %v8195_v26  ;;  %v4066_v18 = vmul.f32 %v11432_v52, %v11449_v39  ;;  %v11516_v31 = vld [vmem:[#allocation93_spill] sm:$0xff] }
 0x105   :  { %11443 = vst [vmem:[#allocation120_spill] sm:$0xff] %v8279_v41  ;;  %11444 = vst [vmem:[#allocation121_spill] sm:$0xff] %v8281_v62  ;;  %v4172_v20 = vadd.f32 %v4088_v12, %v11448_v36  ;;  %v8297_v38 = vadd.f32 %v3042_v30, %v2613_v63  ;;  %v11452_v36 = vunpack.i.h.bf16 %v11451_v51  ;;  %v8307_v40 = vpop.permute.xlu1 %6781  ;;  %v3289_v30 = vsel %vm3282_vm5, %v6759_v9, %v11042_v50  ;;  %v11456_v35 = vld [vmem:[#allocation87_spill] sm:$0xff] }
 0x106   :  { %11445 = vst [vmem:[#allocation122_spill] sm:$0xff] %v8283_v17  ;;  %11447 = vst [vmem:[#allocation82_spill] sm:$0xff] %v8286_v57  ;;  %v4664_v16 = vadd.f32 %v4580_v1, %v4151_v21  ;;  %v4087_v21 = vmul.f32 %v11435_v60, %v11449_v39  ;;  %v11459_v26 = vunpack.i.h.bf16 %v11451_v51  ;;  %v6769_v41 = vunpack.i.h.bf16 %v8286_v57 }
 0x107   :  { %11450 = vst [vmem:[#allocation83_spill] sm:$0xff] %v8297_v38  ;;  %v4685_v59 = vadd.f32 %v4601_v0, %v4172_v20  ;;  %v3302_v12 = vsel %vm3282_vm5, %v11039_v4, %v11452_v36  ;;  %11453 = vst [vmem:[#allocation76_spill] sm:$0xff] %v8307_v40  ;;  %v11454_v0 = vld [vmem:[#allocation58_spill] sm:$0xff]  ;;  %v4579_v36 = vmul.f32 %v8059_v25, %v11456_v35  ;;  %v11054_v25 = vunpack.i.l.bf16 %v8286_v57 }
 0x108   :  { %v4940_v1 = vadd.f32 %v8134_v53, %v4664_v16  ;;  %v11455_v63 = vunpack.i.h.bf16 %v11454_v0  ;;  %v8320_v4 = vadd.f32 %v3063_v48, %v2634_v28  ;;  %v11458_v16 = vunpack.i.l.bf16 %v8223_v29  ;;  %v11462_v28 = vld [vmem:[#allocation84_spill] sm:$0xff]  ;;  %v11467_v29 = vld [vmem:[#allocation86_spill] sm:$0xff] }
 0x109   :  { %v4961_v39 = vadd.f32 %v8101_v37, %v4685_v59  ;;  %v8331_v8 = vrot.slane %v3302_v12, %v7099_v23  ;;  %v4150_v48 = vadd.f32 %v4066_v18, %v11462_v28  ;;  %v4600_v12 = vmul.f32 %v8053_v45, %v11456_v35 }
 0x10a   :  { %v3290_v20 = vsel %vm3282_vm5, %v11455_v63, %v6759_v9  ;;  %11457 = vst [vmem:[#allocation58_spill] sm:$0xff] %v8320_v4  ;;  %v3301_v50 = vsel %vm3282_vm5, %v11459_v26, %v11458_v16  ;;  %v5024_v0 = vmax.f32 %v4940_v1, 0.0  ;;  %v8334_v9 = vrot.slane %v3289_v30, %v7099_v23  ;;  %v8337_v63 = vpop.permute.xlu0 %6776  ;;  %v11468_v1 = vld [vmem:[#allocation51_spill] sm:$0xff] }
 0x10b   :  { %v3468_v38 = vrot.slane %v3290_v20, %v7099_v23  ;;  %11460 = vst [vmem:[#allocation87_spill] sm:$0xff] %v8331_v8  ;;  %11463 = vst [vmem:[#allocation84_spill] sm:$0xff] %v8337_v63  ;;  %v5045_v59 = vmax.f32 %v4961_v39, 0.0  ;;  %v11464_v20 = vld [vmem:[#allocation52_spill] sm:$0xff]  ;;  %v8343_v51 = vrot.slane %v3301_v50, %v7099_v23  ;;  %v4171_v26 = vadd.f32 %v4087_v21, %v11467_v29  ;;  %v8355_v50 = vpop.permute.xlu1 %6791  ;;  %v11471_v21 = vld [vmem:[#allocation73_spill] sm:$0xff] }
 0x10c   :  { %11461 = vst [vmem:[#allocation123_spill] sm:$0xff] %v8334_v9  ;;  %v4663_v30 = vadd.f32 %v4579_v36, %v4150_v48  ;;  %v11048_v18 = vunpack.i.h.bf16 %v8255_v61  ;;  %v11051_v39 = vunpack.i.l.bf16 %v8255_v61  ;;  %11470 = vst [vmem:[#allocation126_spill] sm:$0xff] %v8355_v50  ;;  %v11487_v57 = vunpack.i.h.bf16 %v8307_v40 }
 0x10d   :  { %v8340_v4 = vmul.f32 %v11464_v20, %v3468_v38  ;;  %11466 = vst [vmem:[#allocation125_spill] sm:$0xff] %v8343_v51  ;;  %v8347_v16 = vmul.f32 %v11468_v1, %v3468_v38  ;;  %v6459_v28 = vpack.c.bf16 %v5045_v59, %v5024_v0  ;;  %v4684_v17 = vadd.f32 %v4600_v12, %v4171_v26  ;;  %v11473_v0 = vld [vmem:[#allocation75_spill] sm:$0xff]  ;;  %v11475_v26 = vld [vmem:[#allocation68_spill] sm:$0xff] }
 0x10e   :  { %v4939_v29 = vadd.f32 %v8134_v53, %v4663_v30  ;;  %v8366_v48 = vmul.f32 %v11473_v0, %v3468_v38  ;;  %v3802_v59 = vsel %vm3795_vm6, %v6769_v41, %v11051_v39  ;;  %v11476_v12 = vunpack.i.h.bf16 %v11475_v26  ;;  %v8387_v53 = vpop.permute.xlu0 %6786 }
 0x10f   :  { %11465 = vst [vmem:[#allocation124_spill] sm:$0xff] %v8340_v4  ;;  %11469 = vst [vmem:[#allocation86_spill] sm:$0xff] %v8347_v16  ;;  %v11472_v16 = vunpack.i.h.bf16 %v11471_v21  ;;  %6460 = vmatprep.subr.bf16.mxu0 %v6459_v28  ;;  %v4960_v61 = vadd.f32 %v8101_v37, %v4684_v17  ;;  %v11483_v17 = vld [vmem:[#allocation57_spill] sm:$0xff]  ;;  %v11064_v37 = vunpack.i.l.bf16 %v8337_v63  ;;  %v8420_v45 = vpop.permute.xlu1 %6801  ;;  %v11517_v33 = vunpack.i.l.bf16 %v11516_v31 }
 0x110   :  { %11474 = vst [vmem:[#allocation127_spill] sm:$0xff] %v8366_v48  ;;  %v3803_v30 = vsel %vm3795_vm6, %v11476_v12, %v6769_v41  ;;  %v5023_v48 = vmax.f32 %v4939_v29, 0.0  ;;  %11479 = vst [vmem:[#allocation128_spill] sm:$0xff] %v8387_v53  ;;  %v8393_v41 = vrot.slane %v3802_v59, %v7099_v23  ;;  %v11488_v59 = vld [vmem:[#allocation56_spill] sm:$0xff] }
 0x111   :  { %v3815_v35 = vsel %vm3795_vm6, %v11048_v18, %v11472_v16  ;;  %v3814_v28 = vsel %vm3795_vm6, %v11472_v16, %v11054_v25  ;;  %v11477_v18 = vld [vmem:[#allocation74_spill] sm:$0xff]  ;;  %v3981_v39 = vrot.slane %v3803_v30, %v7099_v23  ;;  %v6779_v16 = vunpack.i.h.bf16 %v8337_v63  ;;  %v11485_v30 = vld [vmem:[#allocation80_spill] sm:$0xff]  ;;  %11492 = vst [vmem:[#allocation135_spill] sm:$0xff] %v8420_v45 }
 0x112   :  { %v8383_v36 = vmul.f32 %v11477_v18, %v3468_v38  ;;  %v8390_v26 = vrot.slane %v3815_v35, %v7099_v23  ;;  %11481 = vst [vmem:[#allocation130_spill] sm:$0xff] %v8393_v41  ;;  %v5044_v25 = vmax.f32 %v4960_v61, 0.0  ;;  %v8398_v38 = vrot.slane %v3814_v28, %v7099_v23 }
 0x113   :  { %v8401_v29 = vmul.f32 %v11483_v17, %v3981_v39  ;;  %v11486_v21 = vunpack.i.h.bf16 %v11485_v30  ;;  %v8413_v12 = vmul.f32 %v11432_v52, %v3981_v39  ;;  %v11491_v61 = vunpack.i.l.bf16 %v8307_v40  ;;  %v8509_v9 = vpop.permute.xlu1 %6811 }
 0x114   :  { %11478 = vst [vmem:[#allocation68_spill] sm:$0xff] %v8383_v36  ;;  %11480 = vst [vmem:[#allocation129_spill] sm:$0xff] %v8390_v26  ;;  %v8410_v36 = vmul.f32 %v11488_v59, %v3981_v39  ;;  %v6461_v18 = vpack.c.bf16 %v5044_v25, %v5023_v48  ;;  %v8423_v0 = vmul.f32 %v11435_v60, %v3981_v39  ;;  %v6793_v39 = vunpack.i.l.bf16 %v8355_v50  ;;  %v11506_v60 = vld [vmem:[#allocation89_spill] sm:$0xff]  ;;  %v11521_v59 = vld [vmem:[#allocation43_spill] sm:$0xff] }
 0x115   :  { %11482 = vst [vmem:[#allocation131_spill] sm:$0xff] %v8398_v38  ;;  %11484 = vst [vmem:[#allocation132_spill] sm:$0xff] %v8401_v29  ;;  %v4328_v35 = vsel %vm4308_vm7, %v11487_v57, %v11486_v21  ;;  %v4315_v28 = vsel %vm4308_vm7, %v6779_v16, %v11491_v61  ;;  %v11494_v57 = vld [vmem:[#allocation78_spill] sm:$0xff]  ;;  %v11497_v61 = vunpack.i.h.bf16 %v11485_v30  ;;  %v11507_v52 = vunpack.i.l.bf16 %v11506_v60 }
 0x116   :  { %11489 = vst [vmem:[#allocation133_spill] sm:$0xff] %v8410_v36  ;;  %11490 = vst [vmem:[#allocation134_spill] sm:$0xff] %v8413_v12  ;;  %v11495_v21 = vunpack.i.h.bf16 %v11494_v57  ;;  %v8431_v40 = vrot.slane %v4328_v35, %v7099_v23  ;;  %6462 = vmatpush1.bf16.xpose.msra.mxu0 %v6461_v18  ;;  %v8442_v57 = vrot.slane %v4315_v28, %v7099_v23  ;;  %v8447_v12 = vpop.permute.xlu0 %6796  ;;  %v11503_v28 = vld [vmem:[#allocation88_spill] sm:$0xff] }
 0x117   :  { %11493 = vst [vmem:[#allocation136_spill] sm:$0xff] %v8423_v0  ;;  %v4327_v25 = vsel %vm4308_vm7, %v11497_v61, %v11064_v37  ;;  %11499 = vst [vmem:[#allocation138_spill] sm:$0xff] %v8447_v12  ;;  %v11502_v37 = vunpack.i.h.bf16 %v8355_v50  ;;  %v11504_v48 = vunpack.i.l.bf16 %v11503_v28 }
 0x118   :  { %v4316_v36 = vsel %vm4308_vm7, %v11495_v21, %v6779_v16  ;;  %11496 = vst [vmem:[#allocation78_spill] sm:$0xff] %v8431_v40  ;;  %11498 = vst [vmem:[#allocation137_spill] sm:$0xff] %v8442_v57  ;;  %v6788_v16 = vunpack.i.l.bf16 %v8387_v53  ;;  %v6803_v21 = vunpack.i.l.bf16 %v8420_v45  ;;  %v8450_v30 = vrot.slane %v4327_v25, %v7099_v23  ;;  %v11514_v40 = vld [vmem:[#allocation37_spill] sm:$0xff] }
 0x119   :  { %v8453_v61 = vrot.slane %v4316_v36, %v7099_v23  ;;  %v275_v18 = vsel %vm269_vm1, %v6793_v39, %v11502_v37  ;;  %v276_v35 = vsel %vm269_vm1, %v11504_v48, %v6793_v39  ;;  %v11505_v25 = vunpack.i.h.bf16 %v8387_v53  ;;  %v11513_v39 = vld [vmem:[#allocation38_spill] sm:$0xff]  ;;  %11518 = vst [vmem:[#allocation89_spill] sm:$0xff] %v8509_v9 }
 0x11a   :  { %11500 = vst [vmem:[#allocation139_spill] sm:$0xff] %v8450_v30  ;;  %v462_v63 = vrot.slane %v276_v35, %v7099_v23  ;;  %v466_v0 = vrot.slane %v275_v18, %v7099_v23  ;;  %v288_v50 = vsel %vm269_vm1, %v11507_v52, %v6788_v16  ;;  %v6798_v48 = vunpack.i.l.bf16 %v8447_v12  ;;  %v11508_v35 = vld [vmem:[#allocation30_spill] sm:$0xff]  ;;  %v8529_v43 = vpop.permute.xlu0 %6806 }
 0x11b   :  { %11501 = vst [vmem:[#allocation140_spill] sm:$0xff] %v8453_v61  ;;  %v287_v36 = vsel %vm269_vm1, %v6788_v16, %v11505_v25  ;;  %v414_v37 = vrot.slane %v288_v50, %v7099_v23  ;;  %v11509_v61 = vunpack.i.h.bf16 %v8420_v45  ;;  %v11510_v25 = vld [vmem:[#allocation92_spill] sm:$0xff]  ;;  %v11512_v50 = vld [vmem:[#allocation29_spill] sm:$0xff]  ;;  %11522 = vst [vmem:[#allocation93_spill] sm:$0xff] %v8529_v43 }
 0x11c   :  { %v418_v28 = vrot.slane %v287_v36, %v7099_v23  ;;  %v501_v18 = vmul.f32 %v11508_v35, %v462_v63  ;;  %v502_v53 = vmul.f32 %v11508_v35, %v466_v0  ;;  %v11511_v29 = vunpack.i.l.bf16 %v11510_v25 }
 0x11d   :  { %v787_v60 = vsel %vm781_vm0, %v6803_v21, %v11509_v61  ;;  %v522_v16 = vmul.f32 %v11512_v50, %v462_v63  ;;  %v523_v36 = vmul.f32 %v11512_v50, %v466_v0  ;;  %v543_v4 = vmul.f32 %v11513_v39, %v462_v63 }
 0x11e   :  { %v788_v52 = vsel %vm781_vm0, %v11511_v29, %v6803_v21  ;;  %v544_v62 = vmul.f32 %v11513_v39, %v466_v0  ;;  %v564_v26 = vmul.f32 %v11514_v40, %v462_v63  ;;  %v565_v45 = vmul.f32 %v11514_v40, %v466_v0 }
 0x11f   :  { %v489_v8 = vmul.f32 %v11508_v35, %v414_v37  ;;  %v490_v61 = vmul.f32 %v11508_v35, %v418_v28  ;;  %v510_v25 = vmul.f32 %v11512_v50, %v414_v37  ;;  %v511_v29 = vmul.f32 %v11512_v50, %v418_v28 }
 0x120   :  { %v531_v21 = vmul.f32 %v11513_v39, %v414_v37  ;;  %v532_v42 = vmul.f32 %v11513_v39, %v418_v28  ;;  %v975_v57 = vrot.slane %v788_v52, %v7099_v23  ;;  %v979_v41 = vrot.slane %v787_v60, %v7099_v23 }
 0x121   :  { %v11515_v63 = vunpack.i.h.bf16 %v8447_v12  ;;  %v800_v35 = vsel %vm781_vm0, %v11517_v33, %v6798_v48  ;;  %v552_v50 = vmul.f32 %v11514_v40, %v414_v37  ;;  %v553_v39 = vmul.f32 %v11514_v40, %v418_v28 }
 0x122   :  { %v927_v52 = vrot.slane %v800_v35, %v7099_v23  ;;  %v1014_v12 = vmul.f32 %v11519_v49, %v975_v57  ;;  %v1015_v55 = vmul.f32 %v11519_v49, %v979_v41  ;;  %v1056_v33 = vmul.f32 %v11521_v59, %v975_v57 }
 0x123   :  { %v799_v0 = vsel %vm781_vm0, %v6798_v48, %v11515_v63  ;;  %v11520_v63 = vld [vmem:[#allocation25_spill] sm:$0xff]  ;;  %v1057_v48 = vmul.f32 %v11521_v59, %v979_v41  ;;  %v6813_v28 = vunpack.i.l.bf16 %v8509_v9  ;;  %v1077_v35 = vmul.f32 %v11373_v27, %v975_v57 }
 0x124   :  { %v931_v60 = vrot.slane %v799_v0, %v7099_v23  ;;  %v1035_v30 = vmul.f32 %v11520_v63, %v975_v57  ;;  %v1036_v31 = vmul.f32 %v11520_v63, %v979_v41  ;;  %v1078_v0 = vmul.f32 %v11373_v27, %v979_v41 }
 0x125   :  { %v1098_v40 = vadd.f32 %v1014_v12, %v501_v18  ;;  %v1099_v17 = vadd.f32 %v1015_v55, %v502_v53  ;;  %v1140_v32 = vadd.f32 %v1056_v33, %v543_v4  ;;  %v1141_v1 = vadd.f32 %v1057_v48, %v544_v62  ;;  %v8535_v33 = vpop.permute.xlu1 %6821 }
 0x126   :  { %v1119_v38 = vadd.f32 %v1035_v30, %v522_v16  ;;  %v1120_v34 = vadd.f32 %v1036_v31, %v523_v36  ;;  %v1002_v20 = vmul.f32 %v11519_v49, %v927_v52  ;;  %v1003_v51 = vmul.f32 %v11519_v49, %v931_v60  ;;  %11523 = vst [vmem:[#allocation141_spill] sm:$0xff] %v8535_v33 }
 0x127   :  { %v1023_v19 = vmul.f32 %v11520_v63, %v927_v52  ;;  %v1024_v37 = vmul.f32 %v11520_v63, %v931_v60  ;;  %v1044_v57 = vmul.f32 %v11521_v59, %v927_v52  ;;  %v1045_v41 = vmul.f32 %v11521_v59, %v931_v60 }
 0x128   :  { %v1065_v53 = vmul.f32 %v11373_v27, %v927_v52  ;;  %v1066_v55 = vmul.f32 %v11373_v27, %v931_v60  ;;  %v1161_v4 = vadd.f32 %v1077_v35, %v564_v26  ;;  %v1162_v62 = vadd.f32 %v1078_v0, %v565_v45 }
 0x129   :  { %v1086_v12 = vadd.f32 %v1002_v20, %v489_v8  ;;  %v1087_v30 = vadd.f32 %v1003_v51, %v490_v61  ;;  %v1107_v18 = vadd.f32 %v1023_v19, %v510_v25  ;;  %v1108_v16 = vadd.f32 %v1024_v37, %v511_v29 }
 0x12a   :  { %v1128_v36 = vadd.f32 %v1044_v57, %v531_v21  ;;  %v1129_v31 = vadd.f32 %v1045_v41, %v532_v42  ;;  %v11524_v48 = vunpack.i.h.bf16 %v8509_v9  ;;  %v11525_v59 = vunpack.i.l.bf16 %v8025_v24  ;;  %v11545_v24 = vld [vmem:[#allocation57_spill] sm:$0xff] }
 0x12b   :  { %v11090_v45 = vunpack.i.h.bf16 %v8529_v43  ;;  %v6808_v8 = vunpack.i.l.bf16 %v8529_v43  ;;  %v1149_v19 = vadd.f32 %v1065_v53, %v552_v50  ;;  %v1150_v51 = vadd.f32 %v1066_v55, %v553_v39  ;;  %v8559_v50 = vpop.permute.xlu0 %6816 }
 0x12c   :  { %v1300_v63 = vsel %vm11175_vm2, %v6813_v28, %v11524_v48  ;;  %v1301_v52 = vsel %vm11175_vm2, %v11525_v59, %v6813_v28  ;;  %v11526_v25 = vunpack.i.l.bf16 %v7951_v44  ;;  %v11091_v61 = vunpack.i.h.bf16 %v8535_v33  ;;  %11527 = vst [vmem:[#allocation142_spill] sm:$0xff] %v8559_v50 }
 0x12d   :  { %v1488_v42 = vrot.slane %v1301_v52, %v7099_v23  ;;  %v1492_v20 = vrot.slane %v1300_v63, %v7099_v23  ;;  %v1312_v26 = vsel %vm11175_vm2, %v6808_v8, %v11090_v45  ;;  %v6823_v29 = vunpack.i.l.bf16 %v8535_v33 }
 0x12e   :  { %v1313_v59 = vsel %vm11175_vm2, %v11526_v25, %v6808_v8  ;;  %v11093_v41 = vunpack.i.h.bf16 %v8559_v50  ;;  %v6818_v53 = vunpack.i.l.bf16 %v8559_v50  ;;  %v1444_v45 = vrot.slane %v1312_v26, %v7099_v23  ;;  %v11559_v50 = vld [vmem:[#allocation130_spill] sm:$0xff] }
 0x12f   :  { %v1527_v39 = vmul.f32 %v11386_v54, %v1488_v42  ;;  %v1528_v21 = vmul.f32 %v11386_v54, %v1492_v20  ;;  %v1548_v60 = vmul.f32 %v11387_v10, %v1488_v42  ;;  %v1549_v63 = vmul.f32 %v11387_v10, %v1492_v20 }
 0x130   :  { %v1569_v37 = vmul.f32 %v7587_v6, %v1488_v42  ;;  %v1570_v44 = vmul.f32 %v7587_v6, %v1492_v20  ;;  %v1590_v28 = vmul.f32 %v7585_v22, %v1488_v42  ;;  %v1591_v35 = vmul.f32 %v7585_v22, %v1492_v20 }
 0x131   :  { %v1611_v0 = vadd.f32 %v1527_v39, %v1098_v40  ;;  %v1632_v57 = vadd.f32 %v1548_v60, %v1119_v38  ;;  %v1612_v55 = vadd.f32 %v1528_v21, %v1099_v17  ;;  %v1633_v48 = vadd.f32 %v1549_v63, %v1120_v34 }
 0x132   :  { %v1653_v52 = vadd.f32 %v1569_v37, %v1140_v32  ;;  %v1674_v8 = vadd.f32 %v1590_v28, %v1161_v4  ;;  %v1440_v25 = vrot.slane %v1313_v59, %v7099_v23  ;;  %v1813_v42 = vsel %vm11174_vm3, %v6823_v29, %v11091_v61 }
 0x133   :  { %v11528_v40 = vunpack.i.l.bf16 %v8049_v14  ;;  %v1654_v20 = vadd.f32 %v1570_v44, %v1141_v1  ;;  %v1675_v39 = vadd.f32 %v1591_v35, %v1162_v62  ;;  %v2005_v32 = vrot.slane %v1813_v42, %v7099_v23 }
 0x134   :  { %v1515_v17 = vmul.f32 %v11386_v54, %v1440_v25  ;;  %v1516_v4 = vmul.f32 %v11386_v54, %v1444_v45  ;;  %v1536_v26 = vmul.f32 %v11387_v10, %v1440_v25  ;;  %v1537_v59 = vmul.f32 %v11387_v10, %v1444_v45  ;;  %v11566_v10 = vld [vmem:[#allocation71_spill] sm:$0xff] }
 0x135   :  { %v1814_v38 = vsel %vm11174_vm3, %v11528_v40, %v6823_v29  ;;  %v1557_v21 = vmul.f32 %v7587_v6, %v1440_v25  ;;  %v1558_v60 = vmul.f32 %v7587_v6, %v1444_v45  ;;  %v1825_v1 = vsel %vm11174_vm3, %v6818_v53, %v11093_v41  ;;  %v11565_v6 = vld [vmem:[#allocation114_spill] sm:$0xff] }
 0x136   :  { %v2001_v34 = vrot.slane %v1814_v38, %v7099_v23  ;;  %v11529_v62 = vunpack.i.l.bf16 %v8085_v5  ;;  %v1578_v63 = vmul.f32 %v7585_v22, %v1440_v25  ;;  %v1579_v37 = vmul.f32 %v7585_v22, %v1444_v45 }
 0x137   :  { %v1599_v44 = vadd.f32 %v1515_v17, %v1086_v12  ;;  %v1600_v28 = vadd.f32 %v1516_v4, %v1087_v30  ;;  %v1620_v35 = vadd.f32 %v1536_v26, %v1107_v18  ;;  %v1621_v42 = vadd.f32 %v1537_v59, %v1108_v16 }
 0x138   :  { %v1826_v29 = vsel %vm11174_vm3, %v11529_v62, %v6818_v53  ;;  %v1641_v40 = vadd.f32 %v1557_v21, %v1128_v36  ;;  %v1642_v38 = vadd.f32 %v1558_v60, %v1129_v31  ;;  %v2040_v61 = vmul.f32 %v7432_v3, %v2001_v34 }
 0x139   :  { %v2041_v14 = vmul.f32 %v7432_v3, %v2005_v32  ;;  %v2061_v41 = vmul.f32 %v7430_v2, %v2001_v34  ;;  %v2062_v5 = vmul.f32 %v7430_v2, %v2005_v32  ;;  %v2082_v53 = vmul.f32 %v7620_v7, %v2001_v34 }
 0x13a   :  { %v2083_v25 = vmul.f32 %v7620_v7, %v2005_v32  ;;  %v2103_v45 = vmul.f32 %v7618_v11, %v2001_v34  ;;  %v2104_v12 = vmul.f32 %v7618_v11, %v2005_v32  ;;  %v8607_v30 = vadd.f32 %v1578_v63, %v1149_v19  ;;  %v11538_v32 = vld [vmem:[#allocation51_spill] sm:$0xff] }
 0x13b   :  { %v8609_v18 = vadd.f32 %v1579_v37, %v1150_v51  ;;  %v8611_v16 = vadd.f32 %v2040_v61, %v1611_v0  ;;  %v8613_v36 = vadd.f32 %v2061_v41, %v1632_v57  ;;  %v8615_v31 = vadd.f32 %v2041_v14, %v1612_v55  ;;  %v11534_v0 = vld [vmem:[#allocation47_spill] sm:$0xff]  ;;  %v11535_v41 = vld [vmem:[#allocation46_spill] sm:$0xff] }
 0x13c   :  { %v8617_v17 = vadd.f32 %v2062_v5, %v1633_v48  ;;  %v8619_v4 = vadd.f32 %v2082_v53, %v1653_v52  ;;  %v8621_v26 = vadd.f32 %v2103_v45, %v1674_v8  ;;  %v8623_v59 = vadd.f32 %v2083_v25, %v1654_v20  ;;  %v11542_v53 = vld [vmem:[#allocation107_spill] sm:$0xff]  ;;  %v11543_v45 = vld [vmem:[#allocation108_spill] sm:$0xff] }
 0x13d   :  { %11530 = vst [vmem:[#allocation143_spill] sm:$0xff] %v8615_v31  ;;  %v8625_v34 = vadd.f32 %v2104_v12, %v1675_v39  ;;  %v1953_v19 = vrot.slane %v1826_v29, %v7099_v23  ;;  %v1957_v51 = vrot.slane %v1825_v1, %v7099_v23  ;;  %v1598_v61 = vadd.f32 %v8064_v13, %v8019_v46  ;;  %v11536_v13 = vld [vmem:[#allocation125_spill] sm:$0xff]  ;;  %v11557_v31 = vld [vmem:[#allocation116_spill] sm:$0xff] }
 0x13e   :  { %11531 = vst [vmem:[#allocation144_spill] sm:$0xff] %v8617_v17  ;;  %11532 = vst [vmem:[#allocation145_spill] sm:$0xff] %v8623_v59  ;;  %v1619_v14 = vadd.f32 %v8070_v58, %v8023_v56  ;;  %v2989_v57 = vmul.f32 %v11534_v0, %v8249_v47  ;;  %v3010_v55 = vmul.f32 %v11535_v41, %v8249_v47  ;;  %v11537_v56 = vld [vmem:[#allocation52_spill] sm:$0xff]  ;;  %v11556_v59 = vld [vmem:[#allocation123_spill] sm:$0xff] }
 0x13f   :  { %11533 = vst [vmem:[#allocation146_spill] sm:$0xff] %v8625_v34  ;;  %v2028_v48 = vmul.f32 %v7432_v3, %v1953_v19  ;;  %v2029_v52 = vmul.f32 %v7432_v3, %v1957_v51  ;;  %v2049_v8 = vmul.f32 %v7430_v2, %v1953_v19  ;;  %v2050_v20 = vmul.f32 %v7430_v2, %v1957_v51  ;;  %v11561_v2 = vld [vmem:[#allocation99_spill] sm:$0xff] }
 0x140   :  { %v2070_v39 = vmul.f32 %v7620_v7, %v1953_v19  ;;  %v2071_v46 = vmul.f32 %v7620_v7, %v1957_v51  ;;  %v3502_v58 = vmul.f32 %v11537_v56, %v11536_v13  ;;  %v3523_v21 = vmul.f32 %v11538_v32, %v11536_v13 }
 0x141   :  { %v8648_v47 = vmul.f32 %v7618_v11, %v1953_v19  ;;  %v8651_v60 = vmul.f32 %v7618_v11, %v1957_v51  ;;  %v8653_v1 = vadd.f32 %v2028_v48, %v1599_v44  ;;  %v8655_v62 = vadd.f32 %v2029_v52, %v1600_v28  ;;  %v11544_v19 = vld [vmem:[#allocation131_spill] sm:$0xff]  ;;  %v11546_v44 = vld [vmem:[#allocation56_spill] sm:$0xff] }
 0x142   :  { %v8657_v29 = vadd.f32 %v2049_v8, %v1620_v35  ;;  %v8659_v63 = vadd.f32 %v2050_v20, %v1621_v42  ;;  %v8661_v37 = vadd.f32 %v2070_v39, %v1641_v40  ;;  %v8663_v5 = vadd.f32 %v2071_v46, %v1642_v38  ;;  %v11547_v28 = vld [vmem:[#allocation139_spill] sm:$0xff]  ;;  %v11549_v42 = vld [vmem:[#allocation66_spill] sm:$0xff]  ;;  %v11550_v40 = vld [vmem:[#allocation109_spill] sm:$0xff] }
 0x143   :  { %11539 = vst [vmem:[#allocation125_spill] sm:$0xff] %v8655_v62  ;;  %v2111_v25 = vadd.f32 %v11542_v53, %v1598_v61  ;;  %v2132_v12 = vadd.f32 %v11543_v45, %v1619_v14  ;;  %v4015_v51 = vmul.f32 %v11545_v24, %v11544_v19  ;;  %v4036_v48 = vmul.f32 %v11546_v44, %v11544_v19  ;;  %v11548_v52 = vld [vmem:[#allocation67_spill] sm:$0xff]  ;;  %v11551_v20 = vld [vmem:[#allocation61_spill] sm:$0xff]  ;;  %v11552_v39 = vld [vmem:[#allocation110_spill] sm:$0xff] }
 0x144   :  { %11540 = vst [vmem:[#allocation147_spill] sm:$0xff] %v8659_v63  ;;  %11541 = vst [vmem:[#allocation148_spill] sm:$0xff] %v8663_v5  ;;  %v4528_v35 = vmul.f32 %v11548_v52, %v11547_v28  ;;  %v4549_v8 = vmul.f32 %v11549_v42, %v11547_v28  ;;  %v2572_v38 = vadd.f32 %v11551_v20, %v11550_v40  ;;  %v11553_v46 = vld [vmem:[#allocation62_spill] sm:$0xff]  ;;  %v11554_v53 = vld [vmem:[#allocation45_spill] sm:$0xff] }
 0x145   :  { %v2593_v61 = vadd.f32 %v11553_v46, %v11552_v39  ;;  %v2560_v14 = vadd.f32 %v11554_v53, %v2111_v25  ;;  %v11555_v45 = vld [vmem:[#allocation50_spill] sm:$0xff]  ;;  %v3514_v5 = vmul.f32 %v11537_v56, %v11556_v59  ;;  %v3535_v17 = vmul.f32 %v11538_v32, %v11556_v59  ;;  %v11558_v62 = vld [vmem:[#allocation117_spill] sm:$0xff] }
 0x146   :  { %v2581_v34 = vadd.f32 %v11555_v45, %v2132_v12  ;;  %v3085_v63 = vadd.f32 %v11557_v31, %v2572_v38  ;;  %v4027_v40 = vmul.f32 %v11545_v24, %v11559_v50  ;;  %v4048_v20 = vmul.f32 %v11546_v44, %v11559_v50  ;;  %v11560_v46 = vld [vmem:[#allocation137_spill] sm:$0xff] }
 0x147   :  { %v3106_v11 = vadd.f32 %v11558_v62, %v2593_v61  ;;  %v3073_v39 = vadd.f32 %v2989_v57, %v2560_v14  ;;  %v4540_v12 = vmul.f32 %v11548_v52, %v11560_v46  ;;  %v4561_v53 = vmul.f32 %v11549_v42, %v11560_v46  ;;  %v11562_v31 = vld [vmem:[#allocation41_spill] sm:$0xff]  ;;  %v11563_v62 = vld [vmem:[#allocation100_spill] sm:$0xff]  ;;  %v11564_v61 = vld [vmem:[#allocation103_spill] sm:$0xff] }
 0x148   :  { %v3094_v25 = vadd.f32 %v3010_v55, %v2581_v34  ;;  %v3598_v45 = vadd.f32 %v3514_v5, %v3085_v63  ;;  %v2110_v38 = vadd.f32 %v11562_v31, %v11561_v2  ;;  %v2131_v3 = vadd.f32 %v11564_v61, %v11563_v62  ;;  %v11567_v63 = vld [vmem:[#allocation90_spill] sm:$0xff]  ;;  %v11568_v2 = vld [vmem:[#allocation87_spill] sm:$0xff] }
 0x149   :  { %v3619_v7 = vadd.f32 %v3535_v17, %v3106_v11  ;;  %v3586_v33 = vadd.f32 %v3502_v58, %v3073_v39  ;;  %v2988_v57 = vmul.f32 %v11534_v0, %v11565_v6  ;;  %v3009_v34 = vmul.f32 %v11535_v41, %v11565_v6 }
 0x14a   :  { %v3607_v22 = vadd.f32 %v3523_v21, %v3094_v25  ;;  %v4111_v55 = vadd.f32 %v4027_v40, %v3598_v45  ;;  %v2559_v54 = vadd.f32 %v11566_v10, %v2110_v38  ;;  %v2580_v11 = vadd.f32 %v11567_v63, %v2131_v3  ;;  %v11569_v40 = vld [vmem:[#allocation129_spill] sm:$0xff]  ;;  %v11573_v63 = vld [vmem:[#allocation15_spill] sm:$0xff] }
 0x14b   :  { %v4132_v14 = vadd.f32 %v4048_v20, %v3619_v7  ;;  %v4099_v17 = vadd.f32 %v4015_v51, %v3586_v33  ;;  %v3501_v31 = vmul.f32 %v11537_v56, %v11568_v2  ;;  %v3522_v58 = vmul.f32 %v11538_v32, %v11568_v2  ;;  %v11570_v10 = vld [vmem:[#allocation77_spill] sm:$0xff] }
 0x14c   :  { %v4120_v5 = vadd.f32 %v4036_v48, %v3607_v22  ;;  %v4624_v21 = vadd.f32 %v4540_v12, %v4111_v55  ;;  %v3072_v25 = vadd.f32 %v2988_v57, %v2559_v54  ;;  %v3093_v62 = vadd.f32 %v3009_v34, %v2580_v11  ;;  %v11571_v33 = vld [vmem:[#allocation81_spill] sm:$0xff]  ;;  %v11572_v54 = vld [vmem:[#allocation78_spill] sm:$0xff] }
 0x14d   :  { %v4645_v39 = vadd.f32 %v4561_v53, %v4132_v14  ;;  %v4612_v61 = vadd.f32 %v4528_v35, %v4099_v17  ;;  %v4014_v7 = vmul.f32 %v11545_v24, %v11569_v40  ;;  %v4035_v3 = vmul.f32 %v11546_v44, %v11569_v40  ;;  %v11574_v11 = vld [vmem:[#allocation85_spill] sm:$0xff] }
 0x14e   :  { %v4633_v6 = vadd.f32 %v4549_v8, %v4120_v5  ;;  %v4900_v22 = vadd.f32 %v11570_v10, %v4624_v21  ;;  %v3585_v48 = vadd.f32 %v3501_v31, %v3072_v25  ;;  %v3606_v20 = vadd.f32 %v3522_v58, %v3093_v62  ;;  %v11576_v31 = vld [vmem:[#allocation121_spill] sm:$0xff]  ;;  %v11577_v58 = vld [vmem:[#allocation124_spill] sm:$0xff] }
 0x14f   :  { %v4921_v51 = vadd.f32 %v11571_v33, %v4645_v39  ;;  %v4888_v45 = vadd.f32 %v11570_v10, %v4612_v61  ;;  %v4527_v35 = vmul.f32 %v11548_v52, %v11572_v54  ;;  %v4548_v8 = vmul.f32 %v11549_v42, %v11572_v54  ;;  %v11578_v61 = vld [vmem:[#allocation122_spill] sm:$0xff] }
 0x150   :  { %v4909_v12 = vadd.f32 %v11571_v33, %v4633_v6  ;;  %v4984_v53 = vmax.f32 %v4900_v22, 0.0  ;;  %v4098_v57 = vadd.f32 %v4014_v7, %v3585_v48  ;;  %v4119_v34 = vadd.f32 %v4035_v3, %v3606_v20  ;;  %v11579_v6 = vld [vmem:[#allocation86_spill] sm:$0xff]  ;;  %v11581_v3 = vld [vmem:[#allocation140_spill] sm:$0xff] }
 0x151   :  { %v5005_v38 = vmax.f32 %v4921_v51, 0.0  ;;  %v4972_v55 = vmax.f32 %v4888_v45, 0.0  ;;  %v11575_v17 = vcvt.s32.f32 %v11574_v11  ;;  %v3597_v21 = vadd.f32 %v11577_v58, %v11576_v31  ;;  %v11580_v51 = vld [vmem:[#allocation132_spill] sm:$0xff] }
 0x152   :  { %v4993_v14 = vmax.f32 %v4909_v12, 0.0  ;;  %v4611_v25 = vadd.f32 %v4527_v35, %v4098_v57  ;;  %v4632_v62 = vadd.f32 %v4548_v8, %v4119_v34  ;;  %v3618_v43 = vadd.f32 %v11579_v6, %v11578_v61  ;;  %v11582_v12 = vld [vmem:[#allocation133_spill] sm:$0xff]  ;;  %v11584_v57 = vld [vmem:[#allocation59_spill] sm:$0xff]  ;;  %v11588_v61 = vld [vmem:[#allocation40_spill] sm:$0xff] }
 0x153   :  { %v5110_v5 = vsub.f32 %v11575_v17, %v11573_v63  ;;  %v6463_v39 = vpack.c.bf16 %v5005_v38, %v4984_v53  ;;  %v4110_v7 = vadd.f32 %v11580_v51, %v3597_v21  ;;  %v4539_v48 = vmul.f32 %v11548_v52, %v11581_v3  ;;  %v11583_v38 = vld [vmem:[#allocation20_spill] sm:$0xff] }
 0x154   :  { %v6415_v9 = vpack.c.bf16 %v4993_v14, %v4972_v55  ;;  %v4887_v20 = vadd.f32 %v11570_v10, %v4611_v25  ;;  %v4908_v45 = vadd.f32 %v11571_v33, %v4632_v62  ;;  %v4131_v11 = vadd.f32 %v11582_v12, %v3618_v43  ;;  %v11585_v55 = vld [vmem:[#allocation111_spill] sm:$0xff] }
 0x155   :  { %v5131_v22 = vadd.f32 0.5, %v5110_v5  ;;  %6464 = vmatprep.subr.bf16.mxu0 %v6463_v39  ;;  %v4560_v35 = vmul.f32 %v11549_v42, %v11581_v3  ;;  %v4623_v53 = vadd.f32 %v4539_v48, %v4110_v7  ;;  %v2539_v34 = vmul.f32 %v11584_v57, %v11583_v38  ;;  %v11586_v14 = vld [vmem:[#allocation91_spill] sm:$0xff]  ;;  %v11590_v48 = vld [vmem:[#allocation74_spill] sm:$0xff] }
 0x156   :  { %6416 = vmatprep.subr.bf16.mxu1 %v6415_v9  ;;  %v2602_v17 = vadd.f32 %v11586_v14, %v11585_v55  ;;  %v4971_v31 = vmax.f32 %v4887_v20, 0.0  ;;  %v4992_v58 = vmax.f32 %v4908_v45, 0.0  ;;  %v11587_v39 = vld [vmem:[#allocation75_spill] sm:$0xff]  ;;  %v3565_v12 = vmul.f32 %v11590_v48, %v11536_v13  ;;  %v11591_v20 = vld [vmem:[#allocation94_spill] sm:$0xff] }
 0x157   :  { %v5152_v8 = vmul.f32 0.055555556, %v5131_v22  ;;  %v4644_v21 = vadd.f32 %v4560_v35, %v4131_v11  ;;  %v3544_v25 = vmul.f32 %v11587_v39, %v11536_v13  ;;  %v4899_v43 = vadd.f32 %v11570_v10, %v4623_v53  ;;  %v11589_v9 = vld [vmem:[#allocation79_spill] sm:$0xff] }
 0x158   :  { %v2623_v6 = vadd.f32 %v2539_v34, %v11588_v61  ;;  %v3115_v22 = vadd.f32 %v11589_v9, %v2602_v17  ;;  %v6417_v51 = vpack.c.bf16 %v4992_v58, %v4971_v31  ;;  %v4057_v45 = vmul.f32 %v11591_v20, %v11544_v19  ;;  %v11592_v53 = vld [vmem:[#allocation119_spill] sm:$0xff]  ;;  %v11594_v31 = vld [vmem:[#allocation97_spill] sm:$0xff]  ;;  %v11595_v58 = vld [vmem:[#allocation96_spill] sm:$0xff] }
 0x159   :  { %v5173_v62 = vfloor.f32 %v5152_v8  ;;  %v4920_v7 = vadd.f32 %v11571_v33, %v4644_v21  ;;  %v4983_v35 = vmax.f32 %v4899_v43, 0.0  ;;  %v11593_v55 = vld [vmem:[#allocation19_spill] sm:$0xff]  ;;  %v4570_v13 = vmul.f32 %v11594_v31, %v11547_v28  ;;  %v11596_v61 = vld [vmem:[#allocation21_spill] sm:$0xff]  ;;  %v11597_v9 = vld [vmem:[#allocation60_spill] sm:$0xff] }
 0x15a   :  { %6418 = vmatpush1.bf16.xpose.msra.mxu1 %v6417_v51  ;;  %v3136_v38 = vadd.f32 %v11592_v53, %v2623_v6  ;;  %v3628_v34 = vadd.f32 %v3544_v25, %v3115_v22  ;;  %v4078_v14 = vmul.f32 %v11593_v55, %v11544_v19  ;;  %v4591_v21 = vmul.f32 %v11595_v58, %v11547_v28  ;;  %v11598_v19 = vld [vmem:[#allocation113_spill] sm:$0xff]  ;;  %v11599_v28 = vld [vmem:[#allocation64_spill] sm:$0xff]  ;;  %v11610_v33 = vld [vmem:[#allocation34_spill] sm:$0xff] }
 0x15b   :  { %v5194_v11 = vmul.f32 18.0, %v5173_v62  ;;  %vm5236_vm15 = vcmp.ge.f32.partialorder %v5173_v62, 1.0  ;;  %vm5257_vm8 = vcmp.le.f32.partialorder %v5173_v62, 16.0  ;;  %v5004_v8 = vmax.f32 %v4920_v7, 0.0 }
 0x15c   :  { %vm5278_vm9 = vmand %vm5236_vm15, %vm5257_vm8  ;;  %v2530_v62 = vmul.f32 %v11597_v9, %v11596_v61  ;;  %v3649_v51 = vadd.f32 %v3565_v12, %v3136_v38  ;;  %v4141_v7 = vadd.f32 %v4057_v45, %v3628_v34  ;;  %v2551_v25 = vmul.f32 %v11584_v57, %v11596_v61  ;;  %v8767_v12 = vpop.permute.xlu1 %6831  ;;  %v11603_v61 = vld [vmem:[#allocation101_spill] sm:$0xff] }
 0x15d   :  { %v5215_v17 = vsub.f32 %v5110_v5, %v5194_v11  ;;  %v6465_v43 = vpack.c.bf16 %v5004_v8, %v4983_v35  ;;  %v3556_v6 = vmul.f32 %v11587_v39, %v11556_v59  ;;  %v3577_v35 = vmul.f32 %v11590_v48, %v11556_v59  ;;  %11600 = vst [vmem:[#allocation107_spill] sm:$0xff] %v8767_v12  ;;  %v11601_v8 = vld [vmem:[#allocation118_spill] sm:$0xff] }
 0x15e   :  { %v2614_v5 = vadd.f32 %v2530_v62, %v11598_v19  ;;  %v4162_v22 = vadd.f32 %v4078_v14, %v3649_v51  ;;  %v4654_v11 = vadd.f32 %v4570_v13, %v4141_v7  ;;  %v2635_v53 = vadd.f32 %v2551_v25, %v11599_v28  ;;  %v11604_v62 = vld [vmem:[#allocation120_spill] sm:$0xff]  ;;  %v11605_v7 = vld [vmem:[#allocation11_spill] sm:$0xff] }
 0x15f   :  { %vm5299_vm10 = vcmp.ge.f32.partialorder %v5215_v17, 1.0  ;;  %vm5341_vm11 = vcmp.le.f32.partialorder %v5215_v17, 16.0  ;;  %v8771_v45 = vadd.f32 %v8648_v47, %v8607_v30  ;;  %v4069_v34 = vmul.f32 %v11591_v20, %v11559_v50 }
 0x160   :  { %vm5320_vm12 = vmand %vm5278_vm9, %vm5299_vm10  ;;  %v3127_v38 = vadd.f32 %v11601_v8, %v2614_v5  ;;  %v4090_v14 = vmul.f32 %v11593_v55, %v11559_v50  ;;  %v11602_v17 = vmov 1.0   ;;  %v4675_v13 = vadd.f32 %v4591_v21, %v4162_v22  ;;  %v11606_v50 = vld [vmem:[#allocation98_spill] sm:$0xff] }
 0x161   :  { %vm5362_vm13 = vmand %vm5320_vm12, %vm5341_vm11  ;;  %v4930_v59 = vadd.f32 %v11603_v61, %v4654_v11  ;;  %v3148_v51 = vadd.f32 %v11604_v62, %v2635_v53  ;;  %v4582_v30 = vmul.f32 %v11594_v31, %v11560_v46  ;;  %v2450_v25 = vrot.slane %v11605_v7, %v7099_v23 }
 0x162   :  { %6285 = vmatmul.mubr.msk.f32.vlgmr.msra.gmra.mrb[0].mxu0 %vm5362_vm13, %v11602_v17  ;;  %v3640_v47 = vadd.f32 %v3556_v6, %v3127_v38  ;;  %v6833_v5 = vunpack.i.l.bf16 %v8767_v12  ;;  %v4951_v28 = vadd.f32 %v11606_v50, %v4675_v13  ;;  %v4603_v22 = vmul.f32 %v11595_v58, %v11560_v46  ;;  %v11608_v6 = vld [vmem:[#allocation35_spill] sm:$0xff]  ;;  %v11609_v38 = vld [vmem:[#allocation4_spill] sm:$0xff] }
 0x163   :  { %6466 = vmatpush1.bf16.xpose.msra.mxu0 %v6465_v43  ;;  %v5014_v8 = vmax.f32 %v4930_v59, 0.0  ;;  %v3661_v21 = vadd.f32 %v3577_v35, %v3148_v51  ;;  %v8792_v11 = vadd.f32 %v8651_v60, %v8609_v18  ;;  %v2489_v53 = vmul.f32 %v11608_v6, %v2450_v25 }
 0x164   :  { %v4153_v43 = vadd.f32 %v4069_v34, %v3640_v47  ;;  %v2402_v62 = vrot.slane %v11609_v38, %v7099_v23  ;;  %v5035_v7 = vmax.f32 %v4951_v28, 0.0  ;;  %v2510_v10 = vmul.f32 %v11610_v33, %v2450_v25  ;;  %v8805_v34 = vpop.permute.xlu0 %6826  ;;  %v11613_v28 = vld [vmem:[#allocation102_spill] sm:$0xff] }
 0x165   :  { %11607 = vst [vmem:[#allocation108_spill] sm:$0xff] %v8792_v11  ;;  %v4174_v19 = vadd.f32 %v4090_v14, %v3661_v21  ;;  %v11611_v13 = vunpack.i.h.bf16 %v8767_v12  ;;  %v2531_v59 = vmul.f32 %v11597_v9, %v2450_v25  ;;  %v2552_v18 = vmul.f32 %v11584_v57, %v2450_v25  ;;  %11612 = vst [vmem:[#allocation131_spill] sm:$0xff] %v8805_v34 }
 0x166   :  { %v4666_v46 = vadd.f32 %v4582_v30, %v4153_v43  ;;  %v2573_v60 = vadd.f32 %v2489_v53, %v8611_v16  ;;  %v6419_v51 = vpack.c.bf16 %v5035_v7, %v5014_v8  ;;  %v2594_v14 = vadd.f32 %v2510_v10, %v8613_v36 }
 0x167   :  { %v2774_v35 = vsel %vm2769_vm4, %v6833_v5, %v11611_v13  ;;  %v4687_v47 = vadd.f32 %v4603_v22, %v4174_v19  ;;  %v11614_v21 = vunpack.i.l.bf16 %v11613_v28  ;;  %v2615_v30 = vadd.f32 %v2531_v59, %v8619_v4 }
 0x168   :  { %v4942_v13 = vadd.f32 %v11603_v61, %v4666_v46  ;;  %v2967_v25 = vrot.slane %v2774_v35, %v7099_v23  ;;  %6420 = vmatprep.subr.bf16.mxu1 %v6419_v51  ;;  %v2636_v19 = vadd.f32 %v2552_v18, %v8621_v26  ;;  %v2477_v36 = vmul.f32 %v11608_v6, %v2402_v62  ;;  %v11616_v35 = vld [vmem:[#allocation70_spill] sm:$0xff]  ;;  %v11619_v51 = vld [vmem:[#allocation69_spill] sm:$0xff] }
 0x169   :  { %v2775_v38 = vsel %vm2769_vm4, %v11614_v21, %v6833_v5  ;;  %v4963_v16 = vadd.f32 %v11606_v50, %v4687_v47  ;;  %v6828_v4 = vunpack.i.l.bf16 %v8805_v34  ;;  %v2498_v59 = vmul.f32 %v11610_v33, %v2402_v62 }
 0x16a   :  { %v2963_v43 = vrot.slane %v2775_v38, %v7099_v23  ;;  %v5026_v8 = vmax.f32 %v4942_v13, 0.0  ;;  %v8824_v7 = vmul.f32 %v11534_v0, %v2967_v25  ;;  %v8829_v26 = vmul.f32 %v11535_v41, %v2967_v25  ;;  %v8838_v38 = vpop.permute.xlu1 %6841 }
 0x16b   :  { %v5047_v53 = vmax.f32 %v4963_v16, 0.0  ;;  %v8832_v18 = vmul.f32 %v11616_v35, %v2967_v25  ;;  %v8836_v21 = vmul.f32 %v11619_v51, %v2967_v25  ;;  %11621 = vst [vmem:[#allocation62_spill] sm:$0xff] %v8838_v38  ;;  %v2519_v11 = vmul.f32 %v11597_v9, %v2402_v62 }
 0x16c   :  { %v3002_v5 = vmul.f32 %v11534_v0, %v2963_v43  ;;  %v3023_v22 = vmul.f32 %v11535_v41, %v2963_v43  ;;  %11615 = vst [vmem:[#allocation139_spill] sm:$0xff] %v8824_v7  ;;  %v3044_v46 = vmul.f32 %v11616_v35, %v2963_v43  ;;  %11617 = vst [vmem:[#allocation109_spill] sm:$0xff] %v8829_v26 }
 0x16d   :  { %11618 = vst [vmem:[#allocation61_spill] sm:$0xff] %v8832_v18  ;;  %v3065_v47 = vmul.f32 %v11619_v51, %v2963_v43  ;;  %11620 = vst [vmem:[#allocation110_spill] sm:$0xff] %v8836_v21  ;;  %v6467_v13 = vpack.c.bf16 %v5047_v53, %v5026_v8  ;;  %v2540_v18 = vmul.f32 %v11584_v57, %v2402_v62  ;;  %v11626_v43 = vunpack.i.h.bf16 %v8805_v34  ;;  %v8854_v21 = vpop.permute.xlu0 %6836 }
 0x16e   :  { %v8840_v16 = vadd.f32 %v3002_v5, %v2573_v60  ;;  %v8842_v10 = vadd.f32 %v3023_v22, %v2594_v14  ;;  %v8844_v28 = vadd.f32 %v3044_v46, %v2615_v30  ;;  %11627 = vst [vmem:[#allocation117_spill] sm:$0xff] %v8854_v21  ;;  %v2561_v60 = vadd.f32 %v2477_v36, %v8653_v1  ;;  %v11628_v30 = vld [vmem:[#allocation106_spill] sm:$0xff] }
 0x16f   :  { %v8846_v12 = vadd.f32 %v3065_v47, %v2636_v19  ;;  %v2786_v25 = vsel %vm2769_vm4, %v6828_v4, %v11626_v43  ;;  %6468 = vmatprep.subr.bf16.mxu0 %v6467_v13  ;;  %v2582_v14 = vadd.f32 %v2498_v59, %v8657_v29  ;;  %v11629_v8 = vunpack.i.l.bf16 %v11628_v30  ;;  %v8879_v13 = vpop.permute.xlu1 %6851  ;;  %v11634_v43 = vld [vmem:[#allocation112_spill] sm:$0xff] }
 0x170   :  { %11622 = vst [vmem:[#allocation45_spill] sm:$0xff] %v8840_v16  ;;  %11623 = vst [vmem:[#allocation50_spill] sm:$0xff] %v8842_v10  ;;  %v2919_v5 = vrot.slane %v2786_v25, %v7099_v23  ;;  %v2603_v62 = vadd.f32 %v2519_v11, %v8661_v37  ;;  %v11117_v53 = vunpack.i.h.bf16 %v8838_v38  ;;  %v6843_v46 = vunpack.i.l.bf16 %v8838_v38 }
 0x171   :  { %11624 = vst [vmem:[#allocation123_spill] sm:$0xff] %v8844_v28  ;;  %11625 = vst [vmem:[#allocation116_spill] sm:$0xff] %v8846_v12  ;;  %v2787_v19 = vsel %vm2769_vm4, %v11629_v8, %v6828_v4  ;;  %v2624_v47 = vadd.f32 %v2540_v18, %v8771_v45  ;;  %v11635_v25 = vunpack.i.l.bf16 %v11634_v43  ;;  %v6838_v8 = vunpack.i.l.bf16 %v8854_v21  ;;  %v11639_v12 = vld [vmem:[#allocation22_spill] sm:$0xff] }
 0x172   :  { %v2915_v22 = vrot.slane %v2787_v19, %v7099_v23  ;;  %v8869_v1 = vmul.f32 %v11534_v0, %v2919_v5  ;;  %v8872_v29 = vmul.f32 %v11535_v41, %v2919_v5  ;;  %11632 = vst [vmem:[#allocation99_spill] sm:$0xff] %v8879_v13  ;;  %v8882_v45 = vmul.f32 %v11616_v35, %v2919_v5 }
 0x173   :  { %v3287_v18 = vsel %vm3282_vm5, %v6843_v46, %v11117_v53  ;;  %v3288_v30 = vsel %vm3282_vm5, %v11635_v25, %v6843_v46  ;;  %v8894_v19 = vmul.f32 %v11619_v51, %v2919_v5  ;;  %v2517_v28 = vmul.f32 %v11597_v9, %v11639_v12  ;;  %v11642_v25 = vld [vmem:[#allocation39_spill] sm:$0xff] }
 0x174   :  { %11630 = vst [vmem:[#allocation130_spill] sm:$0xff] %v8869_v1  ;;  %11631 = vst [vmem:[#allocation137_spill] sm:$0xff] %v8872_v29  ;;  %v2990_v4 = vmul.f32 %v11534_v0, %v2915_v22  ;;  %v3011_v37 = vmul.f32 %v11535_v41, %v2915_v22  ;;  %v3032_v11 = vmul.f32 %v11616_v35, %v2915_v22  ;;  %v11641_v43 = vunpack.i.h.bf16 %v8854_v21  ;;  %v11660_v41 = vld [vmem:[#allocation58_spill] sm:$0xff] }
 0x175   :  { %v3053_v59 = vmul.f32 %v11619_v51, %v2915_v22  ;;  %11633 = vst [vmem:[#allocation41_spill] sm:$0xff] %v8882_v45  ;;  %11636 = vst [vmem:[#allocation100_spill] sm:$0xff] %v8894_v19  ;;  %v3476_v53 = vrot.slane %v3288_v30, %v7099_v23  ;;  %v11643_v34 = vunpack.i.l.bf16 %v11642_v25  ;;  %v8945_v25 = vpop.permute.xlu1 %6861  ;;  %v11659_v51 = vld [vmem:[#allocation127_spill] sm:$0xff]  ;;  %v4581_v19 = vmul.f32 %v11594_v31, %v11581_v3 }
 0x176   :  { %v8896_v22 = vadd.f32 %v2990_v4, %v2561_v60  ;;  %v8898_v36 = vadd.f32 %v3011_v37, %v2582_v14  ;;  %v8902_v38 = vadd.f32 %v3032_v11, %v2603_v62  ;;  %v3299_v46 = vsel %vm3282_vm5, %v6838_v8, %v11641_v43  ;;  %v8922_v37 = vpop.permute.xlu0 %6846  ;;  %11654 = vst [vmem:[#allocation132_spill] sm:$0xff] %v8945_v25 }
 0x177   :  { %v3300_v60 = vsel %vm3282_vm5, %v11643_v34, %v6838_v8  ;;  %v8913_v5 = vadd.f32 %v3053_v59, %v2624_v47  ;;  %v8916_v14 = vrot.slane %v3287_v18, %v7099_v23  ;;  %v8920_v4 = vrot.slane %v3299_v46, %v7099_v23  ;;  %11646 = vst [vmem:[#allocation129_spill] sm:$0xff] %v8922_v37  ;;  %v11649_v47 = vld [vmem:[#allocation104_spill] sm:$0xff] }
 0x178   :  { %11637 = vst [vmem:[#allocation103_spill] sm:$0xff] %v8896_v22  ;;  %11638 = vst [vmem:[#allocation114_spill] sm:$0xff] %v8898_v36  ;;  %v3428_v62 = vrot.slane %v3300_v60, %v7099_v23  ;;  %v8925_v11 = vmul.f32 %v11537_v56, %v3476_v53  ;;  %v8928_v43 = vmul.f32 %v11538_v32, %v3476_v53  ;;  %v11655_v60 = vld [vmem:[#allocation105_spill] sm:$0xff]  ;;  %v11128_v45 = vunpack.i.h.bf16 %v8879_v13 }
 0x179   :  { %11640 = vst [vmem:[#allocation71_spill] sm:$0xff] %v8902_v38  ;;  %11644 = vst [vmem:[#allocation90_spill] sm:$0xff] %v8913_v5  ;;  %v2538_v34 = vmul.f32 %v11584_v57, %v11639_v12  ;;  %v2601_v59 = vadd.f32 %v2517_v28, %v11649_v47  ;;  %v8934_v18 = vmul.f32 %v11587_v39, %v3476_v53  ;;  %v11656_v5 = vld [vmem:[#allocation65_spill] sm:$0xff]  ;;  %v11658_v38 = vld [vmem:[#allocation83_spill] sm:$0xff]  ;;  %v6853_v57 = vunpack.i.l.bf16 %v8879_v13 }
 0x17a   :  { %11645 = vst [vmem:[#allocation87_spill] sm:$0xff] %v8916_v14  ;;  %11647 = vst [vmem:[#allocation78_spill] sm:$0xff] %v8925_v11  ;;  %v8937_v30 = vmul.f32 %v11590_v48, %v3476_v53  ;;  %v8940_v8 = vmul.f32 %v11537_v56, %v3428_v62  ;;  %v8943_v46 = vmul.f32 %v11538_v32, %v3428_v62  ;;  %v6848_v9 = vunpack.i.l.bf16 %v8922_v37 }
 0x17b   :  { %11648 = vst [vmem:[#allocation85_spill] sm:$0xff] %v8928_v43  ;;  %11650 = vst [vmem:[#allocation121_spill] sm:$0xff] %v8934_v18  ;;  %v2622_v21 = vadd.f32 %v2538_v34, %v11655_v60  ;;  %v3114_v12 = vadd.f32 %v11656_v5, %v2601_v59  ;;  %v3543_v28 = vmul.f32 %v11587_v39, %v11568_v2  ;;  %v11657_v60 = vld [vmem:[#allocation115_spill] sm:$0xff]  ;;  %v11708_v43 = vld [vmem:[#allocation138_spill] sm:$0xff] }
 0x17c   :  { %11651 = vst [vmem:[#allocation124_spill] sm:$0xff] %v8937_v30  ;;  %11652 = vst [vmem:[#allocation122_spill] sm:$0xff] %v8940_v8  ;;  %v3564_v47 = vmul.f32 %v11590_v48, %v11568_v2  ;;  %v4056_v53 = vmul.f32 %v11591_v20, %v11569_v40  ;;  %v4077_v30 = vmul.f32 %v11593_v55, %v11569_v40  ;;  %v11661_v2 = vld [vmem:[#allocation68_spill] sm:$0xff]  ;;  %v11709_v10 = vunpack.i.h.bf16 %v11708_v43 }
 0x17d   :  { %11653 = vst [vmem:[#allocation86_spill] sm:$0xff] %v8943_v46  ;;  %v4569_v18 = vmul.f32 %v11594_v31, %v11572_v54  ;;  %v4590_v34 = vmul.f32 %v11595_v58, %v11572_v54  ;;  %v3135_v5 = vadd.f32 %v11657_v60, %v2622_v21  ;;  %v3627_v59 = vadd.f32 %v3543_v28, %v3114_v12  ;;  %v8972_v54 = vpop.permute.xlu0 %6856  ;;  %v11663_v28 = vld [vmem:[#allocation134_spill] sm:$0xff] }
 0x17e   :  { %v3639_v35 = vadd.f32 %v11659_v51, %v11658_v38  ;;  %v3660_v0 = vadd.f32 %v11661_v2, %v11660_v41  ;;  %v4602_v40 = vmul.f32 %v11595_v58, %v11581_v3  ;;  %11662 = vst [vmem:[#allocation140_spill] sm:$0xff] %v8972_v54  ;;  %v11664_v51 = vld [vmem:[#allocation136_spill] sm:$0xff]  ;;  %v3800_v41 = vsel %vm3795_vm6, %v6853_v57, %v11128_v45  ;;  %v11670_v45 = vld [vmem:[#allocation82_spill] sm:$0xff] }
 0x17f   :  { %v3648_v21 = vadd.f32 %v3564_v47, %v3135_v5  ;;  %v4140_v12 = vadd.f32 %v4056_v53, %v3627_v59  ;;  %v11665_v2 = vld [vmem:[#allocation72_spill] sm:$0xff]  ;;  %v8986_v47 = vpop.permute.xlu1 %6871  ;;  %v8989_v59 = vmul.f32 %v11587_v39, %v3428_v62 }
 0x180   :  { %v4152_v60 = vadd.f32 %v11663_v28, %v3639_v35  ;;  %v4173_v38 = vadd.f32 %v11664_v51, %v3660_v0  ;;  %v11666_v31 = vunpack.i.l.bf16 %v11665_v2  ;;  %11667 = vst [vmem:[#allocation133_spill] sm:$0xff] %v8986_v47  ;;  %v8992_v28 = vmul.f32 %v11590_v48, %v3428_v62 }
 0x181   :  { %v4161_v53 = vadd.f32 %v4077_v30, %v3648_v21  ;;  %v4653_v35 = vadd.f32 %v4569_v18, %v4140_v12  ;;  %11668 = vst [vmem:[#allocation20_spill] sm:$0xff] %v8989_v59  ;;  %v9003_v30 = vrot.slane %v3800_v41, %v7099_v23  ;;  %v9015_v21 = vpop.permute.xlu0 %6866 }
 0x182   :  { %v3801_v3 = vsel %vm3795_vm6, %v11666_v31, %v6853_v57  ;;  %v4665_v5 = vadd.f32 %v4581_v19, %v4152_v60  ;;  %v4686_v0 = vadd.f32 %v4602_v40, %v4173_v38  ;;  %11669 = vst [vmem:[#allocation111_spill] sm:$0xff] %v8992_v28  ;;  %v11671_v57 = vunpack.i.l.bf16 %v11670_v45  ;;  %11676 = vst [vmem:[#allocation119_spill] sm:$0xff] %v9015_v21 }
 0x183   :  { %v3989_v51 = vrot.slane %v3801_v3, %v7099_v23  ;;  %v4674_v58 = vadd.f32 %v4590_v34, %v4161_v53  ;;  %v4929_v2 = vadd.f32 %v11603_v61, %v4653_v35  ;;  %11672 = vst [vmem:[#allocation91_spill] sm:$0xff] %v9003_v30  ;;  %v11675_v45 = vunpack.i.h.bf16 %v8922_v37 }
 0x184   :  { %v3813_v31 = vsel %vm3795_vm6, %v11671_v57, %v6848_v9  ;;  %v4941_v18 = vadd.f32 %v11603_v61, %v4665_v5  ;;  %v4962_v19 = vadd.f32 %v11606_v50, %v4686_v0  ;;  %v6863_v5 = vunpack.i.l.bf16 %v8945_v25  ;;  %v9024_v0 = vpop.permute.xlu1 %6881  ;;  %v11705_v61 = vld [vmem:[#allocation38_spill] sm:$0xff] }
 0x185   :  { %v9006_v62 = vmul.f32 %v11545_v24, %v3989_v51  ;;  %v9009_v40 = vmul.f32 %v11546_v44, %v3989_v51  ;;  %v3812_v34 = vsel %vm3795_vm6, %v6848_v9, %v11675_v45  ;;  %v4950_v12 = vadd.f32 %v11606_v50, %v4674_v58  ;;  %11678 = vst [vmem:[#allocation113_spill] sm:$0xff] %v9024_v0 }
 0x186   :  { %v5013_v60 = vmax.f32 %v4929_v2, 0.0  ;;  %v5025_v38 = vmax.f32 %v4941_v18, 0.0  ;;  %v5046_v3 = vmax.f32 %v4962_v19, 0.0  ;;  %v9019_v41 = vmul.f32 %v11591_v20, %v3989_v51 }
 0x187   :  { %11673 = vst [vmem:[#allocation40_spill] sm:$0xff] %v9006_v62  ;;  %11674 = vst [vmem:[#allocation79_spill] sm:$0xff] %v9009_v40  ;;  %v3941_v53 = vrot.slane %v3813_v31, %v7099_v23  ;;  %v5034_v57 = vmax.f32 %v4950_v12, 0.0  ;;  %v6858_v58 = vunpack.i.l.bf16 %v8972_v54  ;;  %v9029_v2 = vmul.f32 %v11593_v55, %v3989_v51 }
 0x188   :  { %11677 = vst [vmem:[#allocation21_spill] sm:$0xff] %v9019_v41  ;;  %v6469_v9 = vpack.c.bf16 %v5046_v3, %v5025_v38  ;;  %v9032_v18 = vrot.slane %v3812_v34, %v7099_v23  ;;  %v11682_v12 = vunpack.i.h.bf16 %v8945_v25  ;;  %v11683_v3 = vld [vmem:[#allocation76_spill] sm:$0xff]  ;;  %v11685_v34 = vunpack.i.h.bf16 %v8972_v54  ;;  %v11700_v41 = vld [vmem:[#allocation30_spill] sm:$0xff] }
 0x189   :  { %11679 = vst [vmem:[#allocation64_spill] sm:$0xff] %v9029_v2  ;;  %v9035_v31 = vmul.f32 %v11545_v24, %v3941_v53  ;;  %v9038_v19 = vmul.f32 %v11546_v44, %v3941_v53  ;;  %v6421_v35 = vpack.c.bf16 %v5034_v57, %v5013_v60  ;;  %v11684_v45 = vunpack.i.l.bf16 %v11683_v3 }
 0x18a   :  { %6470 = vmatpush1.bf16.xpose.msra.mxu0 %v6469_v9  ;;  %v4313_v38 = vsel %vm4308_vm7, %v6863_v5, %v11682_v12  ;;  %v4325_v37 = vsel %vm4308_vm7, %v6858_v58, %v11685_v34  ;;  %v9053_v13 = vmul.f32 %v11591_v20, %v3941_v53  ;;  %v9056_v60 = vmul.f32 %v11593_v55, %v3941_v53  ;;  %v11689_v9 = vld [vmem:[#allocation84_spill] sm:$0xff]  ;;  %v11695_v53 = vld [vmem:[#allocation126_spill] sm:$0xff]  ;;  %v11706_v20 = vld [vmem:[#allocation37_spill] sm:$0xff] }
 0x18b   :  { %11680 = vst [vmem:[#allocation118_spill] sm:$0xff] %v9035_v31  ;;  %11681 = vst [vmem:[#allocation120_spill] sm:$0xff] %v9038_v19  ;;  %v4314_v51 = vsel %vm4308_vm7, %v11684_v45, %v6863_v5  ;;  %v11690_v12 = vunpack.i.l.bf16 %v11689_v9  ;;  %v9065_v5 = vpop.permute.xlu0 %6876  ;;  %6422 = vmatpush1.bf16.xpose.msra.mxu1 %v6421_v35  ;;  %v9068_v45 = vrot.slane %v4313_v38, %v7099_v23  ;;  %v11134_v34 = vunpack.i.h.bf16 %v8986_v47  ;;  %v11712_v19 = vld [vmem:[#allocation43_spill] sm:$0xff] }
 0x18c   :  { %11686 = vst [vmem:[#allocation11_spill] sm:$0xff] %v9053_v13  ;;  %11687 = vst [vmem:[#allocation35_spill] sm:$0xff] %v9056_v60  ;;  %v9059_v57 = vrot.slane %v4314_v51, %v7099_v23  ;;  %v6873_v54 = vunpack.i.l.bf16 %v8986_v47  ;;  %v9074_v51 = vrot.slane %v4325_v37, %v7099_v23  ;;  %v6868_v9 = vunpack.i.l.bf16 %v9015_v21  ;;  %v11698_v47 = vld [vmem:[#allocation128_spill] sm:$0xff] }
 0x18d   :  { %v4326_v3 = vsel %vm4308_vm7, %v11690_v12, %v6858_v58  ;;  %11691 = vst [vmem:[#allocation34_spill] sm:$0xff] %v9065_v5  ;;  %11692 = vst [vmem:[#allocation106_spill] sm:$0xff] %v9068_v45  ;;  %v6883_v58 = vunpack.i.l.bf16 %v9024_v0  ;;  %v9079_v12 = vpop.permute.xlu1 %6891  ;;  %v11696_v2 = vunpack.i.h.bf16 %v11695_v53  ;;  %v11697_v13 = vunpack.i.h.bf16 %v9015_v21 }
 0x18e   :  { %11688 = vst [vmem:[#allocation4_spill] sm:$0xff] %v9059_v57  ;;  %11693 = vst [vmem:[#allocation22_spill] sm:$0xff] %v9079_v12  ;;  %v9082_v35 = vrot.slane %v4326_v3, %v7099_v23  ;;  %v273_v38 = vsel %vm269_vm1, %v6873_v54, %v11134_v34  ;;  %v11699_v28 = vunpack.i.h.bf16 %v11698_v47  ;;  %v11701_v59 = vunpack.i.h.bf16 %v9024_v0  ;;  %v11702_v47 = vld [vmem:[#allocation135_spill] sm:$0xff] }
 0x18f   :  { %v274_v37 = vsel %vm269_vm1, %v11696_v2, %v6873_v54  ;;  %v474_v60 = vrot.slane %v273_v38, %v7099_v23  ;;  %v285_v3 = vsel %vm269_vm1, %v6868_v9, %v11697_v13  ;;  %v6878_v2 = vunpack.i.l.bf16 %v9065_v5  ;;  %v9143_v16 = vpop.permute.xlu0 %6886 }
 0x190   :  { %11694 = vst [vmem:[#allocation39_spill] sm:$0xff] %v9082_v35  ;;  %v470_v25 = vrot.slane %v274_v37, %v7099_v23  ;;  %v286_v34 = vsel %vm269_vm1, %v11699_v28, %v6868_v9  ;;  %v426_v54 = vrot.slane %v285_v3, %v7099_v23  ;;  %v785_v13 = vsel %vm781_vm0, %v6883_v58, %v11701_v59 }
 0x191   :  { %v422_v53 = vrot.slane %v286_v34, %v7099_v23  ;;  %v504_v21 = vmul.f32 %v11700_v41, %v474_v60  ;;  %v11703_v50 = vunpack.i.h.bf16 %v11702_v47  ;;  %v11704_v34 = vld [vmem:[#allocation29_spill] sm:$0xff]  ;;  %v546_v55 = vmul.f32 %v11705_v61, %v474_v60  ;;  %11710 = vst [vmem:[#allocation104_spill] sm:$0xff] %v9143_v16 }
 0x192   :  { %v503_v38 = vmul.f32 %v11700_v41, %v470_v25  ;;  %v524_v9 = vmul.f32 %v11704_v34, %v470_v25  ;;  %v525_v3 = vmul.f32 %v11704_v34, %v474_v60  ;;  %v545_v37 = vmul.f32 %v11705_v61, %v470_v25 }
 0x193   :  { %v786_v28 = vsel %vm781_vm0, %v11703_v50, %v6883_v58  ;;  %v566_v48 = vmul.f32 %v11706_v20, %v470_v25  ;;  %v567_v0 = vmul.f32 %v11706_v20, %v474_v60  ;;  %v491_v39 = vmul.f32 %v11700_v41, %v422_v53 }
 0x194   :  { %v492_v59 = vmul.f32 %v11700_v41, %v426_v54  ;;  %v512_v47 = vmul.f32 %v11704_v34, %v422_v53  ;;  %v513_v50 = vmul.f32 %v11704_v34, %v426_v54  ;;  %v533_v58 = vmul.f32 %v11705_v61, %v422_v53 }
 0x195   :  { %v534_v40 = vmul.f32 %v11705_v61, %v426_v54  ;;  %v983_v62 = vrot.slane %v786_v28, %v7099_v23  ;;  %v987_v57 = vrot.slane %v785_v13, %v7099_v23  ;;  %v11707_v25 = vunpack.i.h.bf16 %v9065_v5 }
 0x196   :  { %v798_v41 = vsel %vm781_vm0, %v11709_v10, %v6878_v2  ;;  %v554_v34 = vmul.f32 %v11706_v20, %v422_v53  ;;  %v555_v11 = vmul.f32 %v11706_v20, %v426_v54  ;;  %v11152_v31 = vunpack.i.h.bf16 %v9143_v16 }
 0x197   :  { %v797_v60 = vsel %vm781_vm0, %v6878_v2, %v11707_v25  ;;  %v935_v61 = vrot.slane %v798_v41, %v7099_v23  ;;  %v1016_v13 = vmul.f32 %v11519_v49, %v983_v62  ;;  %v1017_v5 = vmul.f32 %v11519_v49, %v987_v57  ;;  %v11711_v25 = vld [vmem:[#allocation25_spill] sm:$0xff] }
 0x198   :  { %v939_v28 = vrot.slane %v797_v60, %v7099_v23  ;;  %v1037_v35 = vmul.f32 %v11711_v25, %v983_v62  ;;  %v1038_v43 = vmul.f32 %v11711_v25, %v987_v57  ;;  %v1058_v10 = vmul.f32 %v11712_v19, %v983_v62 }
 0x199   :  { %v1059_v53 = vmul.f32 %v11712_v19, %v987_v57  ;;  %v1079_v54 = vmul.f32 %v11373_v27, %v983_v62  ;;  %v6893_v41 = vunpack.i.l.bf16 %v9079_v12  ;;  %v1080_v2 = vmul.f32 %v11373_v27, %v987_v57 }
 0x19a   :  { %v1100_v60 = vadd.f32 %v1016_v13, %v503_v38  ;;  %v1101_v20 = vadd.f32 %v1017_v5, %v504_v21  ;;  %v1121_v26 = vadd.f32 %v1037_v35, %v524_v9  ;;  %v1122_v7 = vadd.f32 %v1038_v43, %v525_v3  ;;  %v9163_v38 = vpop.permute.xlu1 %6901 }
 0x19b   :  { %v1142_v46 = vadd.f32 %v1058_v10, %v545_v37  ;;  %v1143_v36 = vadd.f32 %v1059_v53, %v546_v55  ;;  %v1004_v8 = vmul.f32 %v11519_v49, %v935_v61  ;;  %v1005_v22 = vmul.f32 %v11519_v49, %v939_v28  ;;  %11713 = vst [vmem:[#allocation105_spill] sm:$0xff] %v9163_v38  ;;  %v11715_v53 = vld [vmem:[#allocation89_spill] sm:$0xff] }
 0x19c   :  { %v1025_v45 = vmul.f32 %v11711_v25, %v935_v61  ;;  %v1026_v62 = vmul.f32 %v11711_v25, %v939_v28  ;;  %v1163_v30 = vadd.f32 %v1079_v54, %v566_v48  ;;  %v1046_v29 = vmul.f32 %v11712_v19, %v935_v61 }
 0x19d   :  { %v1047_v57 = vmul.f32 %v11712_v19, %v939_v28  ;;  %v1067_v21 = vmul.f32 %v11373_v27, %v935_v61  ;;  %v1164_v5 = vadd.f32 %v1080_v2, %v567_v0  ;;  %v1068_v35 = vmul.f32 %v11373_v27, %v939_v28 }
 0x19e   :  { %v1088_v37 = vadd.f32 %v1004_v8, %v491_v39  ;;  %v1089_v55 = vadd.f32 %v1005_v22, %v492_v59  ;;  %v1109_v9 = vadd.f32 %v1025_v45, %v512_v47  ;;  %v1110_v3 = vadd.f32 %v1026_v62, %v513_v50  ;;  %v11717_v59 = vld [vmem:[#allocation93_spill] sm:$0xff] }
 0x19f   :  { %v1130_v13 = vadd.f32 %v1046_v29, %v533_v58  ;;  %v1131_v43 = vadd.f32 %v1047_v57, %v534_v40  ;;  %v11714_v10 = vunpack.i.h.bf16 %v9079_v12  ;;  %v11716_v54 = vunpack.i.h.bf16 %v11715_v53  ;;  %v11721_v57 = vld [vmem:[#allocation23_spill] sm:$0xff] }
 0x1a0   :  { %v6888_v0 = vunpack.i.l.bf16 %v9143_v16  ;;  %v5055_v39 = vadd.s32 128, %v7304_v15  ;;  %v1151_v22 = vadd.f32 %v1067_v21, %v554_v34  ;;  %v11718_v47 = vunpack.i.h.bf16 %v11717_v59  ;;  %v9187_v34 = vpop.permute.xlu0 %6896 }
 0x1a1   :  { %v1298_v48 = vsel %vm11175_vm2, %v6893_v41, %v11714_v10  ;;  %v1299_v61 = vsel %vm11175_vm2, %v11716_v54, %v6893_v41  ;;  %v6903_v28 = vunpack.i.l.bf16 %v9163_v38  ;;  %11719 = vst [vmem:[#allocation65_spill] sm:$0xff] %v9187_v34  ;;  %v11720_v41 = vld [vmem:[#allocation24_spill] sm:$0xff]  ;;  %v11724_v1 = vunpack.i.h.bf16 %v9163_v38 }
 0x1a2   :  { %v1496_v8 = vrot.slane %v1299_v61, %v7099_v23  ;;  %v1500_v29 = vrot.slane %v1298_v48, %v7099_v23  ;;  %v1310_v45 = vsel %vm11175_vm2, %v6888_v0, %v11152_v31  ;;  %v1311_v50 = vsel %vm11175_vm2, %v11718_v47, %v6888_v0  ;;  %v11722_v48 = vld [vmem:[#allocation49_spill] sm:$0xff]  ;;  %v11723_v61 = vld [vmem:[#allocation48_spill] sm:$0xff] }
 0x1a3   :  { %v5076_v58 = vcvt.s32.f32 %v5055_v39  ;;  %v1152_v39 = vadd.f32 %v1068_v35, %v555_v11  ;;  %v1448_v49 = vrot.slane %v1311_v50, %v7099_v23  ;;  %v1452_v14 = vrot.slane %v1310_v45, %v7099_v23 }
 0x1a4   :  { %v1529_v2 = vmul.f32 %v11720_v41, %v1496_v8  ;;  %v1530_v62 = vmul.f32 %v11720_v41, %v1500_v29  ;;  %v1550_v21 = vmul.f32 %v11721_v57, %v1496_v8  ;;  %v1551_v10 = vmul.f32 %v11721_v57, %v1500_v29 }
 0x1a5   :  { %v1571_v53 = vmul.f32 %v11722_v48, %v1496_v8  ;;  %v1572_v54 = vmul.f32 %v11722_v48, %v1500_v29  ;;  %v1592_v59 = vmul.f32 %v11723_v61, %v1496_v8  ;;  %v1593_v0 = vmul.f32 %v11723_v61, %v1500_v29 }
 0x1a6   :  { %v1613_v47 = vadd.f32 %v1529_v2, %v1100_v60  ;;  %v1614_v31 = vadd.f32 %v1530_v62, %v1101_v20  ;;  %v1634_v16 = vadd.f32 %v1550_v21, %v1121_v26  ;;  %v1635_v12 = vadd.f32 %v1551_v10, %v1122_v7  ;;  %v11725_v20 = vld [vmem:[#allocation141_spill] sm:$0xff]  ;;  %v11727_v62 = vld [vmem:[#allocation6_spill] sm:$0xff] }
 0x1a7   :  { %v1655_v27 = vadd.f32 %v1571_v53, %v1142_v46  ;;  %v1656_v19 = vadd.f32 %v1572_v54, %v1143_v36  ;;  %v1676_v25 = vadd.f32 %v1592_v59, %v1163_v30  ;;  %v1811_v8 = vsel %vm11174_vm3, %v6903_v28, %v11724_v1 }
 0x1a8   :  { %v1677_v29 = vadd.f32 %v1593_v0, %v1164_v5  ;;  %v5101_v11 = vsub.f32 %v5076_v58, %v11573_v63  ;;  %v11726_v60 = vunpack.i.h.bf16 %v11725_v20  ;;  %v2013_v26 = vrot.slane %v1811_v8, %v7099_v23  ;;  %v11728_v20 = vld [vmem:[#allocation32_spill] sm:$0xff] }
 0x1a9   :  { %v1517_v36 = vmul.f32 %v11720_v41, %v1448_v49  ;;  %v1518_v46 = vmul.f32 %v11720_v41, %v1452_v14  ;;  %v1538_v30 = vmul.f32 %v11721_v57, %v1448_v49  ;;  %v1539_v35 = vmul.f32 %v11721_v57, %v1452_v14  ;;  %v11756_v41 = vld [vmem:[#allocation139_spill] sm:$0xff] }
 0x1aa   :  { %v1812_v7 = vsel %vm11174_vm3, %v11726_v60, %v6903_v28  ;;  %v1559_v1 = vmul.f32 %v11722_v48, %v1448_v49  ;;  %v1560_v5 = vmul.f32 %v11722_v48, %v1452_v14  ;;  %v1580_v45 = vmul.f32 %v11723_v61, %v1448_v49  ;;  %v11729_v49 = vld [vmem:[#allocation31_spill] sm:$0xff] }
 0x1ab   :  { %v6898_v50 = vunpack.i.l.bf16 %v9187_v34  ;;  %v1581_v58 = vmul.f32 %v11723_v61, %v1452_v14  ;;  %v1601_v28 = vadd.f32 %v1517_v36, %v1088_v37  ;;  %v1602_v2 = vadd.f32 %v1518_v46, %v1089_v55  ;;  %v11730_v14 = vld [vmem:[#allocation54_spill] sm:$0xff] }
 0x1ac   :  { %v9221_v21 = vrot.slane %v11727_v62, %v7099_v23  ;;  %v1622_v10 = vadd.f32 %v1538_v30, %v1109_v9  ;;  %v1623_v53 = vadd.f32 %v1539_v35, %v1110_v3  ;;  %v1643_v54 = vadd.f32 %v1559_v1, %v1130_v13  ;;  %v11732_v9 = vld [vmem:[#allocation142_spill] sm:$0xff]  ;;  %v11734_v35 = vld [vmem:[#allocation53_spill] sm:$0xff] }
 0x1ad   :  { %v1644_v59 = vadd.f32 %v1560_v5, %v1131_v43  ;;  %v5122_v0 = vadd.f32 0.5, %v5101_v11  ;;  %v2009_v8 = vrot.slane %v1812_v7, %v7099_v23  ;;  %v2043_v60 = vmul.f32 %v11728_v20, %v2013_v26 }
 0x1ae   :  { %v2064_v40 = vmul.f32 %v11729_v49, %v2013_v26  ;;  %v9226_v38 = vadd.f32 %v1580_v45, %v1151_v22  ;;  %v2085_v37 = vmul.f32 %v11730_v14, %v2013_v26  ;;  %v11731_v55 = vunpack.i.h.bf16 %v9187_v34  ;;  %v11755_v34 = vld [vmem:[#allocation86_spill] sm:$0xff] }
 0x1af   :  { %v11733_v3 = vunpack.i.h.bf16 %v11732_v9  ;;  %v5143_v43 = vmul.f32 0.055555556, %v5122_v0  ;;  %v2042_v7 = vmul.f32 %v11728_v20, %v2009_v8  ;;  %v2063_v46 = vmul.f32 %v11729_v49, %v2009_v8 }
 0x1b0   :  { %v1823_v36 = vsel %vm11174_vm3, %v6898_v50, %v11731_v55  ;;  %v2084_v22 = vmul.f32 %v11730_v14, %v2009_v8  ;;  %v9240_v30 = vadd.f32 %v1581_v58, %v1152_v39  ;;  %v2105_v1 = vmul.f32 %v11734_v35, %v2009_v8 }
 0x1b1   :  { %v1824_v13 = vsel %vm11174_vm3, %v11733_v3, %v6898_v50  ;;  %v2106_v5 = vmul.f32 %v11734_v35, %v2013_v26  ;;  %v9244_v45 = vadd.f32 %v2043_v60, %v1614_v31  ;;  %v5164_v62 = vfloor.f32 %v5143_v43 }
 0x1b2   :  { %v9246_v55 = vadd.f32 %v2042_v7, %v1613_v47  ;;  %v9248_v9 = vadd.f32 %v2064_v40, %v1635_v12  ;;  %v9250_v50 = vadd.f32 %v2085_v37, %v1656_v19  ;;  %v9252_v0 = vadd.f32 %v2063_v46, %v1634_v16 }
 0x1b3   :  { %11735 = vst [vmem:[#allocation115_spill] sm:$0xff] %v9244_v45  ;;  %v9254_v3 = vadd.f32 %v2084_v22, %v1655_v27  ;;  %v1961_v39 = vrot.slane %v1824_v13, %v7099_v23  ;;  %v1965_v58 = vrot.slane %v1823_v36, %v7099_v23  ;;  %v5185_v8 = vmul.f32 18.0, %v5164_v62  ;;  %v11742_v22 = vld [vmem:[#allocation125_spill] sm:$0xff] }
 0x1b4   :  { %11736 = vst [vmem:[#allocation83_spill] sm:$0xff] %v9248_v9  ;;  %11737 = vst [vmem:[#allocation127_spill] sm:$0xff] %v9250_v50  ;;  %vm5227_vm14 = vcmp.ge.f32.partialorder %v5164_v62, 1.0  ;;  %vm5248_vm15 = vcmp.le.f32.partialorder %v5164_v62, 16.0  ;;  %v9258_v31 = vadd.f32 %v2105_v1, %v1676_v25  ;;  %v9264_v27 = vadd.f32 %v2106_v5, %v1677_v29 }
 0x1b5   :  { %v2030_v47 = vmul.f32 %v11728_v20, %v1961_v39  ;;  %v2031_v12 = vmul.f32 %v11728_v20, %v1965_v58  ;;  %v2051_v19 = vmul.f32 %v11729_v49, %v1961_v39  ;;  %v2052_v16 = vmul.f32 %v11729_v49, %v1965_v58  ;;  %vm5269_vm8 = vmand %vm5227_vm14, %vm5248_vm15  ;;  %v11752_v49 = vld [vmem:[#allocation103_spill] sm:$0xff]  ;;  %v11754_v20 = vld [vmem:[#allocation114_spill] sm:$0xff] }
 0x1b6   :  { %v5206_v40 = vsub.f32 %v5101_v11, %v5185_v8  ;;  %11738 = vst [vmem:[#allocation58_spill] sm:$0xff] %v9264_v27  ;;  %v2072_v26 = vmul.f32 %v11730_v14, %v1961_v39  ;;  %v2073_v60 = vmul.f32 %v11730_v14, %v1965_v58  ;;  %v9269_v37 = vmul.f32 %v11734_v35, %v1961_v39 }
 0x1b7   :  { %v9272_v25 = vmul.f32 %v11734_v35, %v1965_v58  ;;  %v9274_v36 = vadd.f32 %v2030_v47, %v1601_v28  ;;  %v2478_v13 = vmul.f32 %v11608_v6, %v9221_v21  ;;  %v9278_v11 = vadd.f32 %v2031_v12, %v1602_v2  ;;  %v11744_v58 = vld [vmem:[#allocation130_spill] sm:$0xff]  ;;  %v11745_v12 = vld [vmem:[#allocation5_spill] sm:$0xff] }
 0x1b8   :  { %vm5290_vm9 = vcmp.ge.f32.partialorder %v5206_v40, 1.0  ;;  %vm5332_vm10 = vcmp.le.f32.partialorder %v5206_v40, 16.0  ;;  %v9280_v29 = vadd.f32 %v2051_v19, %v1622_v10  ;;  %v9282_v43 = vadd.f32 %v2052_v16, %v1623_v53  ;;  %v11743_v53 = vld [vmem:[#allocation147_spill] sm:$0xff] }
 0x1b9   :  { %11739 = vst [vmem:[#allocation68_spill] sm:$0xff] %v9278_v11  ;;  %vm5311_vm11 = vmand %vm5269_vm8, %vm5290_vm9  ;;  %v9284_v7 = vadd.f32 %v2072_v26, %v1643_v54  ;;  %v9286_v46 = vadd.f32 %v2073_v60, %v1644_v59  ;;  %v2499_v28 = vmul.f32 %v11610_v33, %v9221_v21  ;;  %v2562_v1 = vadd.f32 %v2478_v13, %v11742_v22  ;;  %v11746_v16 = vld [vmem:[#allocation87_spill] sm:$0xff]  ;;  %v11747_v26 = vld [vmem:[#allocation137_spill] sm:$0xff] }
 0x1ba   :  { %11740 = vst [vmem:[#allocation134_spill] sm:$0xff] %v9282_v43  ;;  %vm5353_vm12 = vmand %vm5311_vm11, %vm5332_vm10  ;;  %v3504_v5 = vmul.f32 %v11537_v56, %v8920_v4  ;;  %v3525_v2 = vmul.f32 %v11538_v32, %v8920_v4  ;;  %v4017_v10 = vmul.f32 %v11545_v24, %v9032_v18  ;;  %v4038_v59 = vmul.f32 %v11546_v44, %v9032_v18 }
 0x1bb   :  { %11741 = vst [vmem:[#allocation136_spill] sm:$0xff] %v9286_v46  ;;  %6274 = vmatprep.mubr.msk.f32.mxu1 %vm5353_vm12, %v11602_v17  ;;  %v2583_v54 = vadd.f32 %v2499_v28, %v11743_v53  ;;  %v4530_v62 = vmul.f32 %v11548_v52, %v9074_v51  ;;  %v4551_v39 = vmul.f32 %v11549_v42, %v9074_v51  ;;  %v5067_v47 = vadd.s32 1664, %v7304_v15  ;;  %v11748_v28 = vld [vmem:[#allocation91_spill] sm:$0xff]  ;;  %v11749_v46 = vld [vmem:[#allocation106_spill] sm:$0xff] }
 0x1bc   :  { %v3075_v8 = vadd.f32 %v11744_v58, %v2562_v1  ;;  %v9309_v19 = vrot.slane %v11745_v12, %v7099_v23  ;;  %v3516_v40 = vmul.f32 %v11537_v56, %v11746_v16  ;;  %v3537_v13 = vmul.f32 %v11538_v32, %v11746_v16 }
 0x1bd   :  { %v3096_v60 = vadd.f32 %v11747_v26, %v2583_v54  ;;  %v4029_v22 = vmul.f32 %v11545_v24, %v11748_v28  ;;  %v4050_v1 = vmul.f32 %v11546_v44, %v11748_v28  ;;  %v5088_v58 = vcvt.s32.f32 %v5067_v47  ;;  %v11751_v47 = vld [vmem:[#allocation144_spill] sm:$0xff] }
 0x1be   :  { %v3588_v53 = vadd.f32 %v3504_v5, %v3075_v8  ;;  %v2490_v12 = vmul.f32 %v11608_v6, %v9309_v19  ;;  %v2511_v27 = vmul.f32 %v11610_v33, %v9309_v19  ;;  %v4542_v54 = vmul.f32 %v11548_v52, %v11749_v46  ;;  %v11750_v5 = vld [vmem:[#allocation143_spill] sm:$0xff] }
 0x1bf   :  { %v3609_v50 = vadd.f32 %v3525_v2, %v3096_v60  ;;  %v4563_v26 = vmul.f32 %v11549_v42, %v11749_v46  ;;  %v5075_v9 = vcvt.s32.f32 %v7304_v15  ;;  %v5113_v43 = vsub.f32 %v5088_v58, %v11573_v63  ;;  %v11753_v2 = vld [vmem:[#allocation122_spill] sm:$0xff] }
 0x1c0   :  { %v4101_v45 = vadd.f32 %v4017_v10, %v3588_v53  ;;  %v2574_v8 = vadd.f32 %v2490_v12, %v11750_v5  ;;  %v2595_v11 = vadd.f32 %v2511_v27, %v11751_v47  ;;  %v3587_v60 = vadd.f32 %v11753_v2, %v11752_v49  ;;  %v11757_v10 = vld [vmem:[#allocation109_spill] sm:$0xff]  ;;  %v11758_v12 = vld [vmem:[#allocation118_spill] sm:$0xff]  ;;  %v11759_v27 = vld [vmem:[#allocation120_spill] sm:$0xff] }
 0x1c1   :  { %v4122_v35 = vadd.f32 %v4038_v59, %v3609_v50  ;;  %v5100_v14 = vsub.f32 %v5075_v9, %v11573_v63  ;;  %v3608_v61 = vadd.f32 %v11755_v34, %v11754_v20  ;;  %v5134_v57 = vadd.f32 0.5, %v5113_v43  ;;  %v11760_v59 = vld [vmem:[#allocation77_spill] sm:$0xff]  ;;  %v11762_v20 = vld [vmem:[#allocation39_spill] sm:$0xff] }
 0x1c2   :  { %v4614_v48 = vadd.f32 %v4530_v62, %v4101_v45  ;;  %v3087_v44 = vadd.f32 %v11756_v41, %v2574_v8  ;;  %v3108_v53 = vadd.f32 %v11757_v10, %v2595_v11  ;;  %v4100_v5 = vadd.f32 %v11758_v12, %v3587_v60  ;;  %v11761_v2 = vld [vmem:[#allocation81_spill] sm:$0xff] }
 0x1c3   :  { %v4635_v58 = vadd.f32 %v4551_v39, %v4122_v35  ;;  %v5121_v24 = vadd.f32 0.5, %v5100_v14  ;;  %v4121_v50 = vadd.f32 %v11759_v27, %v3608_v61  ;;  %v5155_v47 = vmul.f32 0.055555556, %v5134_v57 }
 0x1c4   :  { %v4890_v9 = vadd.f32 %v11760_v59, %v4614_v48  ;;  %v3600_v32 = vadd.f32 %v3516_v40, %v3087_v44  ;;  %v3621_v49 = vadd.f32 %v3537_v13, %v3108_v53  ;;  %v4529_v45 = vmul.f32 %v11548_v52, %v11762_v20 }
 0x1c5   :  { %v4911_v56 = vadd.f32 %v11761_v2, %v4635_v58  ;;  %v5142_v34 = vmul.f32 0.055555556, %v5121_v24  ;;  %v4550_v41 = vmul.f32 %v11549_v42, %v11762_v20  ;;  %v5176_v11 = vfloor.f32 %v5155_v47  ;;  %v11767_v47 = vld [vmem:[#allocation50_spill] sm:$0xff] }
 0x1c6   :  { %v4974_v35 = vmax.f32 %v4890_v9, 0.0  ;;  %v4113_v62 = vadd.f32 %v4029_v22, %v3600_v32  ;;  %v4134_v39 = vadd.f32 %v4050_v1, %v3621_v49  ;;  %v4613_v60 = vadd.f32 %v4529_v45, %v4100_v5  ;;  %v11768_v49 = vld [vmem:[#allocation85_spill] sm:$0xff]  ;;  %v11769_v45 = vld [vmem:[#allocation4_spill] sm:$0xff] }
 0x1c7   :  { %v4995_v8 = vmax.f32 %v4911_v56, 0.0  ;;  %v5163_v61 = vfloor.f32 %v5142_v34  ;;  %v4634_v48 = vadd.f32 %v4550_v41, %v4121_v50  ;;  %v5197_v57 = vmul.f32 18.0, %v5176_v11  ;;  %v11766_v50 = vld [vmem:[#allocation78_spill] sm:$0xff] }
 0x1c8   :  { %vm5239_vm13 = vcmp.ge.f32.partialorder %v5176_v11, 1.0  ;;  %vm5260_vm14 = vcmp.le.f32.partialorder %v5176_v11, 16.0  ;;  %v4626_v44 = vadd.f32 %v4542_v54, %v4113_v62  ;;  %v4647_v24 = vadd.f32 %v4563_v26, %v4134_v39 }
 0x1c9   :  { %v6423_v40 = vpack.c.bf16 %v4995_v8, %v4974_v35  ;;  %v5184_v13 = vmul.f32 18.0, %v5163_v61  ;;  %vm5226_vm15 = vcmp.ge.f32.partialorder %v5163_v61, 1.0  ;;  %v5218_v10 = vsub.f32 %v5113_v43, %v5197_v57  ;;  %vm5281_vm8 = vmand %vm5239_vm13, %vm5260_vm14  ;;  %v9362_v35 = vpop.permute.xlu1 %6911  ;;  %v11771_v8 = vld [vmem:[#allocation60_spill] sm:$0xff] }
 0x1ca   :  { %v4902_v53 = vadd.f32 %v11760_v59, %v4626_v44  ;;  %vm5247_vm9 = vcmp.le.f32.partialorder %v5163_v61, 16.0  ;;  %v4889_v32 = vadd.f32 %v11760_v59, %v4613_v60  ;;  %v4923_v56 = vadd.f32 %v11761_v2, %v4647_v24  ;;  %11770 = vst [vmem:[#allocation82_spill] sm:$0xff] %v9362_v35  ;;  %v11773_v44 = vld [vmem:[#allocation79_spill] sm:$0xff] }
 0x1cb   :  { %6424 = vmatprep.subr.bf16.mxu1 %v6423_v40  ;;  %v5205_v22 = vsub.f32 %v5100_v14, %v5184_v13  ;;  %v4910_v1 = vadd.f32 %v11761_v2, %v4634_v48  ;;  %v5066_v58 = vadd.s32 1536, %v7304_v15  ;;  %vm5302_vm10 = vcmp.ge.f32.partialorder %v5218_v10, 1.0  ;;  %vm9352_vm12 = vmand %vm5226_vm15, %vm5247_vm9  ;;  %v11765_v14 = vld [vmem:[#allocation45_spill] sm:$0xff]  ;;  %v11772_v48 = vld [vmem:[#allocation40_spill] sm:$0xff] }
 0x1cc   :  { %vm5344_vm11 = vcmp.le.f32.partialorder %v5218_v10, 16.0  ;;  %v4986_v54 = vmax.f32 %v4902_v53, 0.0  ;;  %v4973_v43 = vmax.f32 %v4889_v32, 0.0  ;;  %vm5323_vm13 = vmand %vm5281_vm8, %vm5302_vm10  ;;  %v5007_v12 = vmax.f32 %v4923_v56, 0.0  ;;  %v11774_v24 = vld [vmem:[#allocation59_spill] sm:$0xff]  ;;  %v11775_v10 = vld [vmem:[#allocation148_spill] sm:$0xff] }
 0x1cd   :  { %vm5289_vm14 = vcmp.ge.f32.partialorder %v5205_v22, 1.0  ;;  %vm5331_vm3 = vcmp.le.f32.partialorder %v5205_v22, 16.0  ;;  %v4994_v5 = vmax.f32 %v4910_v1, 0.0  ;;  %vm5365_vm2 = vmand %vm5323_vm13, %vm5344_vm11  ;;  %v5087_v27 = vcvt.s32.f32 %v5066_v58  ;;  %v11776_v32 = vld [vmem:[#allocation75_spill] sm:$0xff]  ;;  %v11777_v22 = vld [vmem:[#allocation74_spill] sm:$0xff] }
 0x1ce   :  { %v3599_v9 = vadd.f32 %v11766_v50, %v11765_v14  ;;  %v3620_v34 = vadd.f32 %v11768_v49, %v11767_v47  ;;  %v4541_v41 = vmul.f32 %v11548_v52, %v11769_v45  ;;  %6286 = vmatprep.mubr.msk.f32.mxu0 %vm5365_vm2, %v11602_v17  ;;  %v6471_v11 = vpack.c.bf16 %v5007_v12, %v4986_v54  ;;  %vm5310_vm15 = vmand %vm9352_vm12, %vm5289_vm14  ;;  %v11778_v12 = vld [vmem:[#allocation108_spill] sm:$0xff]  ;;  %v11780_v14 = vld [vmem:[#allocation94_spill] sm:$0xff] }
 0x1cf   :  { %v6425_v62 = vpack.c.bf16 %v4994_v5, %v4973_v43  ;;  %v4562_v39 = vmul.f32 %v11549_v42, %v11769_v45  ;;  %v2520_v61 = vmul.f32 %v11771_v8, %v9221_v21  ;;  %vm5352_vm8 = vmand %vm5310_vm15, %vm5331_vm3  ;;  %v5112_v60 = vsub.f32 %v5087_v27, %v11573_v63  ;;  %v11782_v49 = vld [vmem:[#allocation97_spill] sm:$0xff] }
 0x1d0   :  { %v4112_v57 = vadd.f32 %v11772_v48, %v3599_v9  ;;  %v4133_v40 = vadd.f32 %v11773_v44, %v3620_v34  ;;  %v2541_v13 = vmul.f32 %v11774_v24, %v9221_v21  ;;  %6472 = vmatprep.subr.bf16.mxu0 %v6471_v11  ;;  %6275 = vmatmul.mubr.msk.f32.vlgmr.msra.gmra.mrb[0].mxu1 %vm5352_vm8, %v11602_v17  ;;  %v11779_v21 = vld [vmem:[#allocation41_spill] sm:$0xff]  ;;  %v11781_v9 = vld [vmem:[#allocation19_spill] sm:$0xff]  ;;  %v11784_v48 = vld [vmem:[#allocation96_spill] sm:$0xff]  ;;  %vm11907_vm14 = vcmp.lt.s32.totalorder %v7304_v15, 17 }
 0x1d1   :  { %v2604_v53 = vadd.f32 %v2520_v61, %v11775_v10  ;;  %v3546_v56 = vmul.f32 %v11776_v32, %v8920_v4  ;;  %v3567_v1 = vmul.f32 %v11777_v22, %v8920_v4  ;;  %6426 = vmatpush1.bf16.xpose.msra.mxu1 %v6425_v62  ;;  %v5133_v54 = vadd.f32 0.5, %v5112_v60  ;;  %v11787_v58 = vld [vmem:[#allocation61_spill] sm:$0xff]  ;;  %vm11908_vm15 = vmmov %vm11907_vm14 }
 0x1d2   :  { %v4625_v26 = vadd.f32 %v4541_v41, %v4112_v57  ;;  %v4646_v43 = vadd.f32 %v4562_v39, %v4133_v40  ;;  %v2625_v5 = vadd.f32 %v2541_v13, %v11778_v12  ;;  %v4059_v50 = vmul.f32 %v11780_v14, %v9032_v18  ;;  %v11783_v41 = vld [vmem:[#allocation100_spill] sm:$0xff]  ;;  %vm11911_vm8 = vmmov %vm11907_vm14 }
 0x1d3   :  { %v3117_v27 = vadd.f32 %v11779_v21, %v2604_v53  ;;  %v4080_v47 = vmul.f32 %v11781_v9, %v9032_v18  ;;  %v4572_v34 = vmul.f32 %v11782_v49, %v9074_v51  ;;  %v5154_v4 = vmul.f32 0.055555556, %v5133_v54 }
 0x1d4   :  { %v4901_v11 = vadd.f32 %v11760_v59, %v4625_v26  ;;  %v4922_v62 = vadd.f32 %v11761_v2, %v4646_v43  ;;  %v3138_v39 = vadd.f32 %v11783_v41, %v2625_v5  ;;  %v4593_v57 = vmul.f32 %v11784_v48, %v9074_v51  ;;  %v11785_v26 = vld [vmem:[#allocation145_spill] sm:$0xff]  ;;  %v11786_v43 = vld [vmem:[#allocation146_spill] sm:$0xff] }
 0x1d5   :  { %v3630_v61 = vadd.f32 %v3546_v56, %v3117_v27  ;;  %v2532_v44 = vmul.f32 %v11771_v8, %v9309_v19  ;;  %v2553_v18 = vmul.f32 %v11774_v24, %v9309_v19  ;;  %v5175_v40 = vfloor.f32 %v5154_v4  ;;  %v11788_v4 = vld [vmem:[#allocation110_spill] sm:$0xff] }
 0x1d6   :  { %v4985_v13 = vmax.f32 %v4901_v11, 0.0  ;;  %v5006_v10 = vmax.f32 %v4922_v62, 0.0  ;;  %v3651_v53 = vadd.f32 %v3567_v1, %v3138_v39  ;;  %v3558_v56 = vmul.f32 %v11776_v32, %v11746_v16  ;;  %v11901_v59 = vld [vmem:[#allocation42_spill] sm:$0xff] }
 0x1d7   :  { %v4143_v54 = vadd.f32 %v4059_v50, %v3630_v61  ;;  %v2616_v12 = vadd.f32 %v2532_v44, %v11785_v26  ;;  %v2637_v21 = vadd.f32 %v2553_v18, %v11786_v43  ;;  %v5196_v5 = vmul.f32 18.0, %v5175_v40  ;;  %v11789_v44 = vld [vmem:[#allocation101_spill] sm:$0xff] }
 0x1d8   :  { %vm5238_vm2 = vcmp.ge.f32.partialorder %v5175_v40, 1.0  ;;  %vm5259_vm3 = vcmp.le.f32.partialorder %v5175_v40, 16.0  ;;  %v6473_v51 = vpack.c.bf16 %v5006_v10, %v4985_v13  ;;  %v4164_v27 = vadd.f32 %v4080_v47, %v3651_v53  ;;  %v11791_v40 = vld [vmem:[#allocation98_spill] sm:$0xff] }
 0x1d9   :  { %v4656_v41 = vadd.f32 %v4572_v34, %v4143_v54  ;;  %v3129_v19 = vadd.f32 %v11787_v58, %v2616_v12  ;;  %v3150_v11 = vadd.f32 %v11788_v4, %v2637_v21  ;;  %v5217_v62 = vsub.f32 %v5112_v60, %v5196_v5  ;;  %vm5280_vm9 = vmand %vm5238_vm2, %vm5259_vm3 }
 0x1da   :  { %v3579_v1 = vmul.f32 %v11777_v22, %v11746_v16  ;;  %v4071_v50 = vmul.f32 %v11780_v14, %v11748_v28  ;;  %v4092_v39 = vmul.f32 %v11781_v9, %v11748_v28  ;;  %v4677_v61 = vadd.f32 %v4593_v57, %v4164_v27  ;;  %v9417_v16 = vpop.permute.xlu0 %6906  ;;  %v11792_v57 = vld [vmem:[#allocation12_spill] sm:$0xff]  ;;  %vm11913_vm2 = vmmov %vm11911_vm8 }
 0x1db   :  { %v4932_v18 = vadd.f32 %v11789_v44, %v4656_v41  ;;  %v3642_v47 = vadd.f32 %v3558_v56, %v3129_v19  ;;  %v4584_v58 = vmul.f32 %v11782_v49, %v11749_v46  ;;  %vm5301_vm10 = vcmp.ge.f32.partialorder %v5217_v62, 1.0  ;;  %11790 = vst [vmem:[#allocation84_spill] sm:$0xff] %v9417_v16  ;;  %v11794_v56 = vld [vmem:[#allocation13_spill] sm:$0xff]  ;;  %vm11916_vm3 = vmmov %vm11913_vm2 }
 0x1dc   :  { %vm5343_vm11 = vcmp.le.f32.partialorder %v5217_v62, 16.0  ;;  %v3663_v60 = vadd.f32 %v3579_v1, %v3150_v11  ;;  %v4605_v34 = vmul.f32 %v11784_v48, %v11749_v46  ;;  %vm5322_vm12 = vmand %vm5280_vm9, %vm5301_vm10  ;;  %v4953_v13 = vadd.f32 %v11791_v40, %v4677_v61 }
 0x1dd   :  { %v5016_v10 = vmax.f32 %v4932_v18, 0.0  ;;  %v4155_v28 = vadd.f32 %v4071_v50, %v3642_v47  ;;  %v2458_v53 = vrot.slane %v11792_v57, %v7099_v23  ;;  %v2177_v54 = vadd.f32 %v9269_v37, %v9226_v38  ;;  %vm5364_vm13 = vmand %vm5322_vm12, %vm5343_vm11 }
 0x1de   :  { %v9426_v26 = vadd.f32 %v9272_v25, %v9240_v30  ;;  %v4176_v12 = vadd.f32 %v4092_v39, %v3663_v60  ;;  %v6913_v46 = vunpack.i.l.bf16 %v9362_v35  ;;  %6287 = vmatmul.mubr.msk.f32.vlgmr.msra.gmra.mrb[0].mxu0 %vm5364_vm13, %v11602_v17  ;;  %v5037_v43 = vmax.f32 %v4953_v13, 0.0  ;;  %v11796_v39 = vld [vmem:[#allocation107_spill] sm:$0xff] }
 0x1df   :  { %v4668_v21 = vadd.f32 %v4584_v58, %v4155_v28  ;;  %v2410_v5 = vrot.slane %v11794_v56, %v7099_v23  ;;  %v11176_v27 = vunpack.i.h.bf16 %v9417_v16  ;;  %6474 = vmatpush1.bf16.xpose.msra.mxu0 %v6473_v51  ;;  %v2491_v38 = vmul.f32 %v11608_v6, %v2458_v53  ;;  %v11798_v28 = vld [vmem:[#allocation47_spill] sm:$0xff]  ;;  %v11801_v56 = vld [vmem:[#allocation70_spill] sm:$0xff] }
 0x1e0   :  { %11793 = vst [vmem:[#allocation126_spill] sm:$0xff] %v9426_v26  ;;  %v4689_v41 = vadd.f32 %v4605_v34, %v4176_v12  ;;  %v2512_v30 = vmul.f32 %v11610_v33, %v2458_v53  ;;  %v11795_v37 = vunpack.i.h.bf16 %v9362_v35  ;;  %v6427_v19 = vpack.c.bf16 %v5037_v43, %v5016_v10 }
 0x1e1   :  { %v4944_v4 = vadd.f32 %v11789_v44, %v4668_v21  ;;  %v2533_v11 = vmul.f32 %v11771_v8, %v2458_v53  ;;  %v2554_v62 = vmul.f32 %v11774_v24, %v2458_v53  ;;  %v2575_v51 = vadd.f32 %v2491_v38, %v9246_v55  ;;  %v11799_v53 = vld [vmem:[#allocation46_spill] sm:$0xff]  ;;  %v11802_v38 = vld [vmem:[#allocation69_spill] sm:$0xff] }
 0x1e2   :  { %v2772_v25 = vsel %vm2769_vm4, %v6913_v46, %v11795_v37  ;;  %v4965_v1 = vadd.f32 %v11791_v40, %v4689_v41  ;;  %v2596_v50 = vadd.f32 %v2512_v30, %v9252_v0  ;;  %v11797_v61 = vunpack.i.h.bf16 %v11796_v39  ;;  %6428 = vmatprep.subr.bf16.mxu1 %v6427_v19 }
 0x1e3   :  { %v5028_v47 = vmax.f32 %v4944_v4, 0.0  ;;  %v2617_v58 = vadd.f32 %v2533_v11, %v9254_v3  ;;  %v2975_v34 = vrot.slane %v2772_v25, %v7099_v23  ;;  %v2638_v10 = vadd.f32 %v2554_v62, %v9258_v31  ;;  %v9475_v4 = vpop.permute.xlu1 %6921 }
 0x1e4   :  { %v2773_v18 = vsel %vm2769_vm4, %v11797_v61, %v6913_v46  ;;  %v5049_v13 = vmax.f32 %v4965_v1, 0.0  ;;  %v2479_v55 = vmul.f32 %v11608_v6, %v2410_v5  ;;  %v2500_v0 = vmul.f32 %v11610_v33, %v2410_v5  ;;  %11807 = vst [vmem:[#allocation141_spill] sm:$0xff] %v9475_v4  ;;  %v9484_v61 = vpop.permute.xlu0 %6916 }
 0x1e5   :  { %v2971_v60 = vrot.slane %v2773_v18, %v7099_v23  ;;  %v6908_v46 = vunpack.i.l.bf16 %v9417_v16  ;;  %v2521_v43 = vmul.f32 %v11771_v8, %v2410_v5  ;;  %v9460_v21 = vmul.f32 %v11798_v28, %v2975_v34  ;;  %11811 = vst [vmem:[#allocation147_spill] sm:$0xff] %v9484_v61  ;;  %v11843_v16 = vld [vmem:[#allocation116_spill] sm:$0xff] }
 0x1e6   :  { %v6475_v3 = vpack.c.bf16 %v5049_v13, %v5028_v47  ;;  %v9465_v30 = vmul.f32 %v11799_v53, %v2975_v34  ;;  %v9468_v37 = vmul.f32 %v11801_v56, %v2975_v34  ;;  %v9471_v25 = vmul.f32 %v11802_v38, %v2975_v34 }
 0x1e7   :  { %v3004_v57 = vmul.f32 %v11798_v28, %v2971_v60  ;;  %v3025_v12 = vmul.f32 %v11799_v53, %v2971_v60  ;;  %11800 = vst [vmem:[#allocation128_spill] sm:$0xff] %v9460_v21  ;;  %v3046_v41 = vmul.f32 %v11801_v56, %v2971_v60  ;;  %v3067_v31 = vmul.f32 %v11802_v38, %v2971_v60  ;;  %v11812_v60 = vld [vmem:[#allocation131_spill] sm:$0xff] }
 0x1e8   :  { %11803 = vst [vmem:[#allocation135_spill] sm:$0xff] %v9465_v30  ;;  %11804 = vst [vmem:[#allocation138_spill] sm:$0xff] %v9468_v37  ;;  %6476 = vmatprep.subr.bf16.mxu0 %v6475_v3  ;;  %v2542_v39 = vmul.f32 %v11774_v24, %v2410_v5  ;;  %v2563_v18 = vadd.f32 %v2479_v55, %v9274_v36  ;;  %v2584_v47 = vadd.f32 %v2500_v0, %v9280_v29  ;;  %v11815_v3 = vld [vmem:[#allocation20_spill] sm:$0xff] }
 0x1e9   :  { %11805 = vst [vmem:[#allocation89_spill] sm:$0xff] %v9471_v25  ;;  %v9473_v19 = vadd.f32 %v3004_v57, %v2575_v51  ;;  %v9477_v11 = vadd.f32 %v3025_v12, %v2596_v50  ;;  %v9479_v62 = vadd.f32 %v3046_v41, %v2617_v58  ;;  %v9481_v1 = vadd.f32 %v3067_v31, %v2638_v10  ;;  %v11816_v31 = vld [vmem:[#allocation90_spill] sm:$0xff] }
 0x1ea   :  { %v2784_v51 = vsel %vm2769_vm4, %v6908_v46, %v11176_v27  ;;  %v11813_v50 = vunpack.i.h.bf16 %v11812_v60  ;;  %v11177_v13 = vunpack.i.h.bf16 %v9475_v4  ;;  %v6923_v36 = vunpack.i.l.bf16 %v9475_v4  ;;  %v11830_v4 = vld [vmem:[#allocation117_spill] sm:$0xff] }
 0x1eb   :  { %11806 = vst [vmem:[#allocation93_spill] sm:$0xff] %v9473_v19  ;;  %11808 = vst [vmem:[#allocation6_spill] sm:$0xff] %v9477_v11  ;;  %v2927_v5 = vrot.slane %v2784_v51, %v7099_v23  ;;  %v2605_v29 = vadd.f32 %v2521_v43, %v9284_v7  ;;  %v2626_v10 = vadd.f32 %v2542_v39, %v2177_v54  ;;  %v6918_v0 = vunpack.i.l.bf16 %v9484_v61  ;;  %v11817_v51 = vld [vmem:[#allocation111_spill] sm:$0xff] }
 0x1ec   :  { %11809 = vst [vmem:[#allocation142_spill] sm:$0xff] %v9479_v62  ;;  %11810 = vst [vmem:[#allocation125_spill] sm:$0xff] %v9481_v1  ;;  %v2785_v58 = vsel %vm2769_vm4, %v11813_v50, %v6908_v46  ;;  %v11814_v46 = vld [vmem:[#allocation71_spill] sm:$0xff]  ;;  %v3650_v60 = vadd.f32 %v11817_v51, %v11816_v31  ;;  %vm11925_vm9 = vcmp.lt.s32.totalorder %v7304_v15, 1 }
 0x1ed   :  { %v2923_v34 = vrot.slane %v2785_v58, %v7099_v23  ;;  %v3629_v41 = vadd.f32 %v11815_v3, %v11814_v46  ;;  %v9510_v50 = vmul.f32 %v11798_v28, %v2927_v5  ;;  %v9513_v7 = vmul.f32 %v11799_v53, %v2927_v5  ;;  %v11822_v3 = vld [vmem:[#allocation62_spill] sm:$0xff]  ;;  %vm11926_vm10 = vmmov %vm11925_vm9 }
 0x1ee   :  { %v9518_v39 = vmul.f32 %v11801_v56, %v2927_v5  ;;  %v9521_v58 = vmul.f32 %v11802_v38, %v2927_v5  ;;  %v3285_v46 = vsel %vm3282_vm5, %v6923_v36, %v11177_v13  ;;  %v11823_v31 = vunpack.i.h.bf16 %v11822_v3  ;;  %vm11929_vm11 = vmmov %vm11925_vm9 }
 0x1ef   :  { %v2992_v57 = vmul.f32 %v11798_v28, %v2923_v34  ;;  %v3013_v12 = vmul.f32 %v11799_v53, %v2923_v34  ;;  %11818 = vst [vmem:[#allocation130_spill] sm:$0xff] %v9510_v50  ;;  %11819 = vst [vmem:[#allocation5_spill] sm:$0xff] %v9513_v7  ;;  %v3034_v54 = vmul.f32 %v11801_v56, %v2923_v34  ;;  %v11829_v13 = vunpack.i.h.bf16 %v9484_v61  ;;  %v11842_v61 = vld [vmem:[#allocation121_spill] sm:$0xff] }
 0x1f0   :  { %v3055_v43 = vmul.f32 %v11802_v38, %v2923_v34  ;;  %11820 = vst [vmem:[#allocation87_spill] sm:$0xff] %v9518_v39  ;;  %11821 = vst [vmem:[#allocation137_spill] sm:$0xff] %v9521_v58  ;;  %v3286_v51 = vsel %vm3282_vm5, %v11823_v31, %v6923_v36  ;;  %v9541_v62 = vrot.slane %v3285_v46, %v7099_v23  ;;  %v11831_v36 = vunpack.i.h.bf16 %v11830_v4  ;;  %v11839_v31 = vld [vmem:[#allocation35_spill] sm:$0xff]  ;;  %v11844_v38 = vld [vmem:[#allocation124_spill] sm:$0xff] }
 0x1f1   :  { %v9531_v27 = vadd.f32 %v2992_v57, %v2563_v18  ;;  %v9533_v55 = vadd.f32 %v3013_v12, %v2584_v47  ;;  %v9535_v34 = vadd.f32 %v3034_v54, %v2605_v29  ;;  %v3484_v1 = vrot.slane %v3286_v51, %v7099_v23  ;;  %v9551_v47 = vpop.permute.xlu1 %6931  ;;  %v9553_v29 = vpop.permute.xlu0 %6926  ;;  %v11834_v57 = vld [vmem:[#allocation52_spill] sm:$0xff]  ;;  %v11836_v12 = vld [vmem:[#allocation51_spill] sm:$0xff]  ;;  %v11889_v58 = vld [vmem:[#allocation29_spill] sm:$0xff] }
 0x1f2   :  { %v9538_v5 = vadd.f32 %v3055_v43, %v2626_v10  ;;  %11828 = vst [vmem:[#allocation103_spill] sm:$0xff] %v9541_v62  ;;  %v3297_v3 = vsel %vm3282_vm5, %v6918_v0, %v11829_v13  ;;  %v3298_v18 = vsel %vm3282_vm5, %v11831_v36, %v6918_v0  ;;  %11832 = vst [vmem:[#allocation122_spill] sm:$0xff] %v9551_v47  ;;  %v11838_v43 = vld [vmem:[#allocation11_spill] sm:$0xff]  ;;  %v11891_v39 = vld [vmem:[#allocation38_spill] sm:$0xff] }
 0x1f3   :  { %11824 = vst [vmem:[#allocation91_spill] sm:$0xff] %v9531_v27  ;;  %11825 = vst [vmem:[#allocation106_spill] sm:$0xff] %v9533_v55  ;;  %v9556_v10 = vmul.f32 %v11834_v57, %v3484_v1  ;;  %v9559_v54 = vmul.f32 %v11836_v12, %v3484_v1  ;;  %v4142_v46 = vadd.f32 %v11838_v43, %v3629_v41 }
 0x1f4   :  { %11826 = vst [vmem:[#allocation143_spill] sm:$0xff] %v9535_v34  ;;  %11827 = vst [vmem:[#allocation144_spill] sm:$0xff] %v9538_v5  ;;  %v4163_v51 = vadd.f32 %v11839_v31, %v3650_v60  ;;  %v9564_v13 = vmul.f32 %v11776_v32, %v3484_v1  ;;  %v3436_v4 = vrot.slane %v3298_v18, %v7099_v23  ;;  %v11841_v5 = vld [vmem:[#allocation123_spill] sm:$0xff] }
 0x1f5   :  { %11833 = vst [vmem:[#allocation114_spill] sm:$0xff] %v9553_v29  ;;  %11835 = vst [vmem:[#allocation86_spill] sm:$0xff] %v9556_v10  ;;  %v4571_v0 = vmul.f32 %v11782_v49, %v11762_v20  ;;  %v4592_v36 = vmul.f32 %v11784_v48, %v11762_v20  ;;  %v3641_v34 = vadd.f32 %v11842_v61, %v11841_v5  ;;  %v9597_v28 = vpop.permute.xlu1 %6941  ;;  %v9599_v35 = vpop.permute.xlu0 %6936 }
 0x1f6   :  { %11837 = vst [vmem:[#allocation139_spill] sm:$0xff] %v9559_v54  ;;  %11840 = vst [vmem:[#allocation109_spill] sm:$0xff] %v9564_v13  ;;  %v3662_v56 = vadd.f32 %v11844_v38, %v11843_v16  ;;  %v4583_v41 = vmul.f32 %v11782_v49, %v11769_v45  ;;  %v4604_v60 = vmul.f32 %v11784_v48, %v11769_v45  ;;  %v11848_v38 = vld [vmem:[#allocation21_spill] sm:$0xff]  ;;  %v11849_v13 = vld [vmem:[#allocation64_spill] sm:$0xff]  ;;  %v11187_v45 = vunpack.i.h.bf16 %v9551_v47 }
 0x1f7   :  { %v9580_v18 = vmul.f32 %v11777_v22, %v3484_v1  ;;  %v9583_v43 = vrot.slane %v3297_v3, %v7099_v23  ;;  %v9586_v20 = vmul.f32 %v11834_v57, %v3436_v4  ;;  %v9589_v61 = vmul.f32 %v11836_v12, %v3436_v4  ;;  %11850 = vst [vmem:[#allocation45_spill] sm:$0xff] %v9597_v28  ;;  %v11893_v54 = vld [vmem:[#allocation92_spill] sm:$0xff]  ;;  %v11903_v12 = vld [vmem:[#allocation34_spill] sm:$0xff]  ;;  %vm11930_vm12 = vmmov %vm11925_vm9 }
 0x1f8   :  { %v4655_v5 = vadd.f32 %v4571_v0, %v4142_v46  ;;  %v4676_v16 = vadd.f32 %v4592_v36, %v4163_v51  ;;  %v4154_v31 = vadd.f32 %v11848_v38, %v3641_v34  ;;  %v4175_v53 = vadd.f32 %v11849_v13, %v3662_v56  ;;  %11851 = vst [vmem:[#allocation78_spill] sm:$0xff] %v9599_v35  ;;  %v11852_v13 = vld [vmem:[#allocation99_spill] sm:$0xff]  ;;  %vm11933_vm13 = vmmov %vm11925_vm9 }
 0x1f9   :  { %11845 = vst [vmem:[#allocation118_spill] sm:$0xff] %v9580_v18  ;;  %11846 = vst [vmem:[#allocation120_spill] sm:$0xff] %v9586_v20  ;;  %v6933_v1 = vunpack.i.l.bf16 %v9551_v47  ;;  %v11186_v18 = vunpack.i.h.bf16 %v9553_v29  ;;  %v6928_v3 = vunpack.i.l.bf16 %v9553_v29  ;;  %v11853_v0 = vunpack.i.h.bf16 %v11852_v13  ;;  %v9642_v47 = vpop.permute.xlu0 %6946 }
 0x1fa   :  { %11847 = vst [vmem:[#allocation39_spill] sm:$0xff] %v9589_v61  ;;  %v4931_v25 = vadd.f32 %v11789_v44, %v4655_v5  ;;  %v4952_v46 = vadd.f32 %v11791_v40, %v4676_v16  ;;  %v4667_v51 = vadd.f32 %v4583_v41, %v4154_v31  ;;  %v4688_v34 = vadd.f32 %v4604_v60, %v4175_v53  ;;  %v11854_v5 = vld [vmem:[#allocation129_spill] sm:$0xff] }
 0x1fb   :  { %v3798_v56 = vsel %vm3795_vm6, %v6933_v1, %v11187_v45  ;;  %v3799_v36 = vsel %vm3795_vm6, %v11853_v0, %v6933_v1  ;;  %v3810_v38 = vsel %vm3795_vm6, %v6928_v3, %v11186_v18  ;;  %v11855_v37 = vunpack.i.h.bf16 %v11854_v5  ;;  %11864 = vst [vmem:[#allocation108_spill] sm:$0xff] %v9642_v47 }
 0x1fc   :  { %v5015_v41 = vmax.f32 %v4931_v25, 0.0  ;;  %v5036_v60 = vmax.f32 %v4952_v46, 0.0  ;;  %v4943_v16 = vadd.f32 %v11789_v44, %v4667_v51  ;;  %v4964_v31 = vadd.f32 %v11791_v40, %v4688_v34  ;;  %v11859_v25 = vld [vmem:[#allocation57_spill] sm:$0xff]  ;;  %v11861_v46 = vld [vmem:[#allocation56_spill] sm:$0xff] }
 0x1fd   :  { %v3811_v53 = vsel %vm3795_vm6, %v11855_v37, %v6928_v3  ;;  %v9622_v13 = vmul.f32 %v11776_v32, %v3436_v4  ;;  %v9625_v1 = vmul.f32 %v11777_v22, %v3436_v4  ;;  %v3997_v0 = vrot.slane %v3799_v36, %v7099_v23  ;;  %v6952_v36 = vpop.permute.xlu1 %6951  ;;  %v11892_v22 = vld [vmem:[#allocation37_spill] sm:$0xff] }
 0x1fe   :  { %v3949_v18 = vrot.slane %v3811_v53, %v7099_v23  ;;  %v6429_v5 = vpack.c.bf16 %v5036_v60, %v5015_v41  ;;  %v5027_v45 = vmax.f32 %v4943_v16, 0.0  ;;  %v5048_v29 = vmax.f32 %v4964_v31, 0.0 }
 0x1ff   :  { %11856 = vst [vmem:[#allocation50_spill] sm:$0xff] %v9622_v13  ;;  %11857 = vst [vmem:[#allocation85_spill] sm:$0xff] %v9625_v1  ;;  %v9630_v37 = vrot.slane %v3798_v56, %v7099_v23  ;;  %v9633_v3 = vmul.f32 %v11859_v25, %v3997_v0  ;;  %v9636_v51 = vmul.f32 %v11861_v46, %v3997_v0  ;;  %v6938_v4 = vunpack.i.l.bf16 %v9599_v35  ;;  %v11872_v13 = vld [vmem:[#allocation132_spill] sm:$0xff] }
 0x200   :  { %v9639_v34 = vrot.slane %v3810_v38, %v7099_v23  ;;  %6430 = vmatpush1.bf16.xpose.msra.mxu1 %v6429_v5  ;;  %v6477_v53 = vpack.c.bf16 %v5048_v29, %v5027_v45  ;;  %v9645_v41 = vmul.f32 %v11780_v14, %v3997_v0  ;;  %v9648_v56 = vmul.f32 %v11781_v9, %v3997_v0 }
 0x201   :  { %11858 = vst [vmem:[#allocation4_spill] sm:$0xff] %v9630_v37  ;;  %11860 = vst [vmem:[#allocation40_spill] sm:$0xff] %v9633_v3  ;;  %v9651_v60 = vmul.f32 %v11859_v25, %v3949_v18  ;;  %v9654_v16 = vmul.f32 %v11861_v46, %v3949_v18  ;;  %v6943_v38 = vunpack.i.l.bf16 %v9597_v28  ;;  %v6954_v29 = vunpack.i.h.bf16 %v6952_v36  ;;  %v6962_v48 = vpop.permute.xlu1 %6961 }
 0x202   :  { %11862 = vst [vmem:[#allocation79_spill] sm:$0xff] %v9636_v51  ;;  %11863 = vst [vmem:[#allocation148_spill] sm:$0xff] %v9639_v34  ;;  %6478 = vmatpush1.bf16.xpose.msra.mxu0 %v6477_v53  ;;  %v6953_v45 = vunpack.i.l.bf16 %v6952_v36  ;;  %v6948_v0 = vunpack.i.l.bf16 %v9642_v47  ;;  %v11871_v1 = vunpack.i.h.bf16 %v9597_v28  ;;  %v11873_v40 = vunpack.i.h.bf16 %v11872_v13  ;;  %v11877_v28 = vld [vmem:[#allocation140_spill] sm:$0xff] }
 0x203   :  { %11865 = vst [vmem:[#allocation41_spill] sm:$0xff] %v9645_v41  ;;  %11866 = vst [vmem:[#allocation100_spill] sm:$0xff] %v9648_v56  ;;  %v9662_v56 = vmul.f32 %v11780_v14, %v3949_v18  ;;  %v9665_v41 = vmul.f32 %v11781_v9, %v3949_v18  ;;  %v11879_v13 = vld [vmem:[#allocation88_spill] sm:$0xff]  ;;  %v6963_v9 = vunpack.i.l.bf16 %v6962_v48  ;;  %v11894_v11 = vunpack.i.h.bf16 %v11893_v54 }
 0x204   :  { %11867 = vst [vmem:[#allocation145_spill] sm:$0xff] %v9651_v60  ;;  %11868 = vst [vmem:[#allocation146_spill] sm:$0xff] %v9654_v16  ;;  %v4311_v31 = vsel %vm4308_vm7, %v6943_v38, %v11871_v1  ;;  %v4312_v36 = vsel %vm4308_vm7, %v11873_v40, %v6943_v38  ;;  %v11880_v44 = vunpack.i.h.bf16 %v11879_v13  ;;  %v271_v38 = vsel %vm269_vm1, %v6953_v45, %v6954_v29  ;;  %v11884_v13 = vld [vmem:[#allocation119_spill] sm:$0xff] }
 0x205   :  { %11869 = vst [vmem:[#allocation61_spill] sm:$0xff] %v9662_v56  ;;  %11870 = vst [vmem:[#allocation110_spill] sm:$0xff] %v9665_v41  ;;  %v9676_v53 = vrot.slane %v4312_v36, %v7099_v23  ;;  %v9679_v5 = vrot.slane %v4311_v31, %v7099_v23  ;;  %v11876_v56 = vunpack.i.h.bf16 %v9599_v35  ;;  %v11878_v41 = vunpack.i.h.bf16 %v11877_v28  ;;  %v11881_v31 = vld [vmem:[#allocation133_spill] sm:$0xff] }
 0x206   :  { %v270_v40 = vsel %vm269_vm1, %v6954_v29, %v11880_v44  ;;  %v11882_v36 = vunpack.i.h.bf16 %v11881_v31  ;;  %v11885_v49 = vunpack.i.h.bf16 %v11884_v13  ;;  %v11904_v57 = vunpack.i.h.bf16 %v11903_v12 }
 0x207   :  { %11874 = vst [vmem:[#allocation12_spill] sm:$0xff] %v9676_v53  ;;  %11875 = vst [vmem:[#allocation13_spill] sm:$0xff] %v9679_v5  ;;  %v4323_v18 = vsel %vm4308_vm7, %v6938_v4, %v11876_v56  ;;  %v4324_v1 = vsel %vm4308_vm7, %v11878_v41, %v6938_v4  ;;  %v11883_v56 = vunpack.i.h.bf16 %v9642_v47  ;;  %v482_v41 = vrot.slane %v271_v38, %v7099_v23 }
 0x208   :  { %v272_v35 = vsel %vm269_vm1, %v11882_v36, %v6953_v45  ;;  %v486_v44 = vrot.slane %v270_v40, %v7099_v23  ;;  %v284_v29 = vsel %vm269_vm1, %v11885_v49, %v6948_v0  ;;  %v9711_v31 = vrot.slane %v4324_v1, %v7099_v23 }
 0x209   :  { %v283_v28 = vsel %vm269_vm1, %v6948_v0, %v11883_v56  ;;  %v478_v4 = vrot.slane %v272_v35, %v7099_v23  ;;  %v9714_v45 = vrot.slane %v4323_v18, %v7099_v23  ;;  %v430_v36 = vrot.slane %v284_v29, %v7099_v23  ;;  %v11888_v35 = vld [vmem:[#allocation30_spill] sm:$0xff]  ;;  %v9724_v18 = vpop.permute.xlu0 %6956 }
 0x20a   :  { %11886 = vst [vmem:[#allocation107_spill] sm:$0xff] %v9711_v31  ;;  %v434_v56 = vrot.slane %v283_v28, %v7099_v23  ;;  %v506_v38 = vmul.f32 %v11888_v35, %v482_v41  ;;  %v6964_v40 = vunpack.i.h.bf16 %v6962_v48  ;;  %v507_v13 = vmul.f32 %v11888_v35, %v486_v44  ;;  %11890 = vst [vmem:[#allocation71_spill] sm:$0xff] %v9724_v18 }
 0x20b   :  { %11887 = vst [vmem:[#allocation131_spill] sm:$0xff] %v9714_v45  ;;  %v505_v47 = vmul.f32 %v11888_v35, %v478_v4  ;;  %v526_v49 = vmul.f32 %v11889_v58, %v478_v4  ;;  %v527_v0 = vmul.f32 %v11889_v58, %v482_v41  ;;  %v528_v1 = vmul.f32 %v11889_v58, %v486_v44 }
 0x20c   :  { %v547_v29 = vmul.f32 %v11891_v39, %v478_v4  ;;  %v548_v28 = vmul.f32 %v11891_v39, %v482_v41  ;;  %v549_v14 = vmul.f32 %v11891_v39, %v486_v44  ;;  %v568_v26 = vmul.f32 %v11892_v22, %v478_v4 }
 0x20d   :  { %v569_v48 = vmul.f32 %v11892_v22, %v482_v41  ;;  %v570_v32 = vmul.f32 %v11892_v22, %v486_v44  ;;  %v9733_v24 = vmul.f32 %v11888_v35, %v430_v36  ;;  %v9736_v8 = vmul.f32 %v11888_v35, %v434_v56  ;;  %v6972_v41 = vpop.permute.xlu1 %6971  ;;  %v9771_v61 = vpop.permute.xlu0 %6966 }
 0x20e   :  { %v9739_v51 = vmul.f32 %v11889_v58, %v430_v36  ;;  %v9742_v53 = vmul.f32 %v11889_v58, %v434_v56  ;;  %v9745_v3 = vmul.f32 %v11891_v39, %v430_v36  ;;  %v9748_v4 = vmul.f32 %v11891_v39, %v434_v56  ;;  %v11895_v58 = vld [vmem:[#allocation113_spill] sm:$0xff]  ;;  %11897 = vst [vmem:[#allocation20_spill] sm:$0xff] %v9771_v61 }
 0x20f   :  { %v9751_v44 = vmul.f32 %v11892_v22, %v430_v36  ;;  %v782_v35 = vsel %vm781_vm0, %v6964_v40, %v11894_v11  ;;  %v783_v10 = vsel %vm781_vm0, %v6963_v9, %v6964_v40  ;;  %v11896_v19 = vunpack.i.h.bf16 %v11895_v58  ;;  %v11898_v58 = vld [vmem:[#allocation26_spill] sm:$0xff] }
 0x210   :  { %v9764_v39 = vmul.f32 %v11892_v22, %v434_v56  ;;  %v995_v36 = vrot.slane %v783_v10, %v7099_v23  ;;  %v999_v54 = vrot.slane %v782_v35, %v7099_v23  ;;  %v6958_v11 = vunpack.i.l.bf16 %v9724_v18  ;;  %v11899_v56 = vld [vmem:[#allocation25_spill] sm:$0xff]  ;;  %v11900_v22 = vld [vmem:[#allocation43_spill] sm:$0xff] }
 0x211   :  { %v784_v31 = vsel %vm781_vm0, %v11896_v19, %v6963_v9  ;;  %v6974_v60 = vunpack.i.h.bf16 %v6972_v41  ;;  %v6973_v40 = vunpack.i.l.bf16 %v6972_v41  ;;  %v6968_v30 = vunpack.i.l.bf16 %v9771_v61 }
 0x212   :  { %v991_v16 = vrot.slane %v784_v31, %v7099_v23  ;;  %v1019_v9 = vmul.f32 %v11898_v58, %v995_v36  ;;  %v1020_v19 = vmul.f32 %v11898_v58, %v999_v54  ;;  %v1040_v10 = vmul.f32 %v11899_v56, %v995_v36 }
 0x213   :  { %v1041_v35 = vmul.f32 %v11899_v56, %v999_v54  ;;  %v1061_v2 = vmul.f32 %v11900_v22, %v995_v36  ;;  %v1062_v41 = vmul.f32 %v11900_v22, %v999_v54  ;;  %v1082_v21 = vmul.f32 %v11901_v59, %v995_v36 }
 0x214   :  { %v1018_v55 = vmul.f32 %v11898_v58, %v991_v16  ;;  %v1039_v31 = vmul.f32 %v11899_v56, %v991_v16  ;;  %v1060_v17 = vmul.f32 %v11900_v22, %v991_v16  ;;  %v1081_v20 = vmul.f32 %v11901_v59, %v991_v16 }
 0x215   :  { %v1083_v5 = vmul.f32 %v11901_v59, %v999_v54  ;;  %v1103_v7 = vadd.f32 %v1019_v9, %v506_v38  ;;  %v1104_v62 = vadd.f32 %v1020_v19, %v507_v13  ;;  %v1124_v50 = vadd.f32 %v1040_v10, %v527_v0  ;;  %v11914_v54 = vld [vmem:[#allocation104_spill] sm:$0xff] }
 0x216   :  { %v1102_v37 = vadd.f32 %v1018_v55, %v505_v47  ;;  %v1123_v42 = vadd.f32 %v1039_v31, %v526_v49  ;;  %v1125_v52 = vadd.f32 %v1041_v35, %v528_v1  ;;  %v1144_v45 = vadd.f32 %v1060_v17, %v547_v29  ;;  %v11905_v55 = vld [vmem:[#allocation95_spill] sm:$0xff] }
 0x217   :  { %v1145_v46 = vadd.f32 %v1061_v2, %v548_v28  ;;  %v1146_v25 = vadd.f32 %v1062_v41, %v549_v14  ;;  %v1165_v34 = vadd.f32 %v1081_v20, %v568_v26  ;;  %v11902_v16 = vunpack.i.h.bf16 %v9724_v18  ;;  %v11909_v20 = vld [vmem:[#allocation22_spill] sm:$0xff] }
 0x218   :  { %v796_v36 = vsel %vm781_vm0, %v11904_v57, %v6958_v11  ;;  %v11906_v47 = vunpack.i.h.bf16 %v11905_v55  ;;  %v1296_v17 = vsel %vm11908_vm15, %v6973_v40, %v6974_v60  ;;  %v1166_v2 = vadd.f32 %v1082_v21, %v569_v48  ;;  %v11917_v55 = vld [vmem:[#allocation24_spill] sm:$0xff] }
 0x219   :  { %v795_v27 = vsel %vm781_vm0, %v6958_v11, %v11902_v16  ;;  %v943_v14 = vrot.slane %v796_v36, %v7099_v23  ;;  %v11910_v13 = vunpack.i.h.bf16 %v11909_v20  ;;  %v1167_v49 = vadd.f32 %v1083_v5, %v570_v32  ;;  %v11920_v20 = vld [vmem:[#allocation48_spill] sm:$0xff] }
 0x21a   :  { %v1295_v38 = vsel %vm11907_vm14, %v6974_v60, %v11906_v47  ;;  %v947_v26 = vrot.slane %v795_v27, %v7099_v23  ;;  %v1508_v0 = vrot.slane %v1296_v17, %v7099_v23  ;;  %v11912_v32 = vunpack.i.h.bf16 %v9771_v61  ;;  %v11918_v17 = vld [vmem:[#allocation23_spill] sm:$0xff]  ;;  %v9846_v61 = vpop.permute.xlu0 %6976 }
 0x21b   :  { %v1297_v12 = vsel %vm11911_vm8, %v11910_v13, %v6973_v40  ;;  %v1512_v1 = vrot.slane %v1295_v38, %v7099_v23  ;;  %v1006_v29 = vmul.f32 %v11898_v58, %v943_v14  ;;  %v1027_v60 = vmul.f32 %v11899_v56, %v943_v14  ;;  %11921 = vst [vmem:[#allocation90_spill] sm:$0xff] %v9846_v61 }
 0x21c   :  { %v1504_v57 = vrot.slane %v1297_v12, %v7099_v23  ;;  %v1007_v21 = vmul.f32 %v11898_v58, %v947_v26  ;;  %v1028_v27 = vmul.f32 %v11899_v56, %v947_v26  ;;  %v1048_v28 = vmul.f32 %v11900_v22, %v943_v14 }
 0x21d   :  { %v1049_v48 = vmul.f32 %v11900_v22, %v947_v26  ;;  %v1308_v5 = vsel %vm11913_vm2, %v6968_v30, %v11912_v32  ;;  %v11915_v11 = vunpack.i.h.bf16 %v11914_v54  ;;  %v1069_v9 = vmul.f32 %v11901_v59, %v943_v14 }
 0x21e   :  { %v1070_v19 = vmul.f32 %v11901_v59, %v947_v26  ;;  %v1090_v31 = vadd.f32 %v1006_v29, %v9733_v24  ;;  %v1091_v10 = vadd.f32 %v1007_v21, %v9736_v8  ;;  %v1111_v35 = vadd.f32 %v1027_v60, %v9739_v51  ;;  %v11919_v26 = vld [vmem:[#allocation49_spill] sm:$0xff] }
 0x21f   :  { %v1309_v40 = vsel %vm11916_vm3, %v11915_v11, %v6968_v30  ;;  %v1112_v41 = vadd.f32 %v1028_v27, %v9742_v53  ;;  %v1132_v16 = vadd.f32 %v1048_v28, %v9745_v3  ;;  %v1133_v36 = vadd.f32 %v1049_v48, %v9748_v4  ;;  %v6982_v11 = vpop.permute.xlu1 %6981 }
 0x220   :  { %v1531_v47 = vmul.f32 %v11917_v55, %v1504_v57  ;;  %v1532_v30 = vmul.f32 %v11917_v55, %v1508_v0  ;;  %v1533_v38 = vmul.f32 %v11917_v55, %v1512_v1  ;;  %v1552_v14 = vmul.f32 %v11918_v17, %v1504_v57 }
 0x221   :  { %v1553_v24 = vmul.f32 %v11918_v17, %v1508_v0  ;;  %v1554_v8 = vmul.f32 %v11918_v17, %v1512_v1  ;;  %v1573_v51 = vmul.f32 %v11919_v26, %v1504_v57  ;;  %v1574_v53 = vmul.f32 %v11919_v26, %v1508_v0 }
 0x222   :  { %v1575_v3 = vmul.f32 %v11919_v26, %v1512_v1  ;;  %v1594_v4 = vmul.f32 %v11920_v20, %v1504_v57  ;;  %v1595_v13 = vmul.f32 %v11920_v20, %v1508_v0  ;;  %v1596_v12 = vmul.f32 %v11920_v20, %v1512_v1 }
 0x223   :  { %v1153_v29 = vadd.f32 %v1069_v9, %v9751_v44  ;;  %v1154_v21 = vadd.f32 %v1070_v19, %v9764_v39  ;;  %v1615_v60 = vadd.f32 %v1531_v47, %v1102_v37  ;;  %v1616_v27 = vadd.f32 %v1532_v30, %v1103_v7 }
 0x224   :  { %v1617_v28 = vadd.f32 %v1533_v38, %v1104_v62  ;;  %v1636_v48 = vadd.f32 %v1552_v14, %v1123_v42  ;;  %v1637_v32 = vadd.f32 %v1553_v24, %v1124_v50  ;;  %v1638_v54 = vadd.f32 %v1554_v8, %v1125_v52  ;;  %v11923_v8 = vld [vmem:[#allocation33_spill] sm:$0xff] }
 0x225   :  { %v1657_v59 = vadd.f32 %v1573_v51, %v1144_v45  ;;  %v1658_v22 = vadd.f32 %v1574_v53, %v1145_v46  ;;  %v1659_v57 = vadd.f32 %v1575_v3, %v1146_v25  ;;  %v1678_v56 = vadd.f32 %v1594_v4, %v1165_v34  ;;  %v11927_v4 = vld [vmem:[#allocation105_spill] sm:$0xff] }
 0x226   :  { %v9848_v0 = vadd.f32 %v1595_v13, %v1166_v2  ;;  %v9850_v1 = vadd.f32 %v1596_v12, %v1167_v49  ;;  %v1456_v44 = vrot.slane %v1309_v40, %v7099_v23  ;;  %v1460_v39 = vrot.slane %v1308_v5, %v7099_v23  ;;  %v11922_v49 = vld [vmem:[#allocation7_spill] sm:$0xff] }
 0x227   :  { %v6984_v7 = vunpack.i.h.bf16 %v6982_v11  ;;  %v6983_v62 = vunpack.i.l.bf16 %v6982_v11  ;;  %v11227_v42 = vunpack.i.h.bf16 %v9846_v61  ;;  %v6978_v52 = vunpack.i.l.bf16 %v9846_v61 }
 0x228   :  { %v1519_v50 = vmul.f32 %v11917_v55, %v1456_v44  ;;  %v1520_v37 = vmul.f32 %v11917_v55, %v1460_v39  ;;  %v1540_v25 = vmul.f32 %v11918_v17, %v1456_v44  ;;  %v1541_v46 = vmul.f32 %v11918_v17, %v1460_v39 }
 0x229   :  { %v1561_v34 = vmul.f32 %v11919_v26, %v1456_v44  ;;  %v1562_v45 = vmul.f32 %v11919_v26, %v1460_v39  ;;  %v9863_v2 = vadd.s32 384, %v7304_v15  ;;  %v9867_v5 = vrot.slane %v11922_v49, %v7099_v23 }
 0x22a   :  { %v1582_v40 = vmul.f32 %v11920_v20, %v1456_v44  ;;  %v1583_v9 = vmul.f32 %v11920_v20, %v1460_v39  ;;  %v1603_v19 = vadd.f32 %v1519_v50, %v1090_v31  ;;  %v1604_v47 = vadd.f32 %v1520_v37, %v1091_v10  ;;  %v11934_v50 = vld [vmem:[#allocation32_spill] sm:$0xff] }
 0x22b   :  { %v1624_v30 = vadd.f32 %v1540_v25, %v1111_v35  ;;  %v1625_v38 = vadd.f32 %v1541_v46, %v1112_v41  ;;  %v1645_v14 = vadd.f32 %v1561_v34, %v1132_v16  ;;  %v1646_v24 = vadd.f32 %v1562_v45, %v1133_v36  ;;  %v11931_v16 = vld [vmem:[#allocation65_spill] sm:$0xff]  ;;  %v11935_v34 = vld [vmem:[#allocation31_spill] sm:$0xff] }
 0x22c   :  { %v11924_v51 = vunpack.i.h.bf16 %v11923_v8  ;;  %v1809_v3 = vsel %vm11926_vm10, %v6983_v62, %v6984_v7  ;;  %v11928_v13 = vunpack.i.h.bf16 %v11927_v4  ;;  %v1821_v31 = vsel %vm11930_vm12, %v6978_v52, %v11227_v42  ;;  %v11937_v8 = vld [vmem:[#allocation53_spill] sm:$0xff] }
 0x22d   :  { %v2021_v35 = vrot.slane %v1809_v3, %v7099_v23  ;;  %v11932_v36 = vunpack.i.h.bf16 %v11931_v16  ;;  %v9892_v44 = vadd.f32 %v1582_v40, %v1153_v29  ;;  %v9894_v39 = vadd.f32 %v1583_v9, %v1154_v21  ;;  %v11936_v29 = vld [vmem:[#allocation54_spill] sm:$0xff] }
 0x22e   :  { %v1808_v53 = vsel %vm11925_vm9, %v6984_v7, %v11924_v51  ;;  %v1810_v12 = vsel %vm11929_vm11, %v11928_v13, %v6983_v62  ;;  %v1973_v62 = vrot.slane %v1821_v31, %v7099_v23  ;;  %v2480_v3 = vmul.f32 %v11608_v6, %v9867_v5 }
 0x22f   :  { %v2017_v10 = vrot.slane %v1810_v12, %v7099_v23  ;;  %v2025_v41 = vrot.slane %v1808_v53, %v7099_v23  ;;  %v1822_v11 = vsel %vm11933_vm13, %v11932_v36, %v6978_v52  ;;  %v2045_v25 = vmul.f32 %v11934_v50, %v2021_v35 }
 0x230   :  { %v1969_v7 = vrot.slane %v1822_v11, %v7099_v23  ;;  %v2066_v49 = vmul.f32 %v11935_v34, %v2021_v35  ;;  %v2087_v21 = vmul.f32 %v11936_v29, %v2021_v35  ;;  %v5078_v53 = vcvt.s32.f32 %v9863_v2 }
 0x231   :  { %v2044_v37 = vmul.f32 %v11934_v50, %v2017_v10  ;;  %v2046_v46 = vmul.f32 %v11934_v50, %v2025_v41  ;;  %v2065_v45 = vmul.f32 %v11935_v34, %v2017_v10  ;;  %v2067_v52 = vmul.f32 %v11935_v34, %v2025_v41 }
 0x232   :  { %v2086_v40 = vmul.f32 %v11936_v29, %v2017_v10  ;;  %v2088_v9 = vmul.f32 %v11936_v29, %v2025_v41  ;;  %v2107_v51 = vmul.f32 %v11937_v8, %v2017_v10  ;;  %v2108_v4 = vmul.f32 %v11937_v8, %v2021_v35 }
 0x233   :  { %v2109_v13 = vmul.f32 %v11937_v8, %v2025_v41  ;;  %v9913_v12 = vadd.f32 %v2044_v37, %v1615_v60  ;;  %v9915_v31 = vadd.f32 %v2045_v25, %v1616_v27  ;;  %v9917_v16 = vadd.f32 %v2046_v46, %v1617_v28 }
 0x234   :  { %v9919_v36 = vadd.f32 %v2065_v45, %v1636_v48  ;;  %v9921_v11 = vadd.f32 %v2066_v49, %v1637_v32  ;;  %v9923_v10 = vadd.f32 %v2067_v52, %v1638_v54  ;;  %v9925_v2 = vadd.f32 %v2086_v40, %v1657_v59  ;;  %v11945_v49 = vld [vmem:[#allocation68_spill] sm:$0xff] }
 0x235   :  { %11938 = vst [vmem:[#allocation111_spill] sm:$0xff] %v9915_v31  ;;  %v9927_v42 = vadd.f32 %v2087_v21, %v1658_v22  ;;  %v9929_v20 = vadd.f32 %v2088_v9, %v1659_v57  ;;  %v9931_v35 = vadd.f32 %v2107_v51, %v1678_v56  ;;  %v2032_v60 = vmul.f32 %v11934_v50, %v1969_v7  ;;  %v11948_v40 = vld [vmem:[#allocation148_spill] sm:$0xff]  ;;  %v11951_v9 = vld [vmem:[#allocation131_spill] sm:$0xff]  ;;  %v11958_v31 = vld [vmem:[#allocation5_spill] sm:$0xff] }
 0x236   :  { %11939 = vst [vmem:[#allocation62_spill] sm:$0xff] %v9921_v11  ;;  %v2033_v27 = vmul.f32 %v11934_v50, %v1973_v62  ;;  %v2053_v28 = vmul.f32 %v11935_v34, %v1969_v7  ;;  %v2054_v48 = vmul.f32 %v11935_v34, %v1973_v62  ;;  %v9938_v32 = vadd.f32 %v2108_v4, %v9848_v0  ;;  %v11952_v51 = vld [vmem:[#allocation67_spill] sm:$0xff] }
 0x237   :  { %11940 = vst [vmem:[#allocation117_spill] sm:$0xff] %v9927_v42  ;;  %v9941_v59 = vadd.f32 %v2109_v13, %v9850_v1  ;;  %v2074_v22 = vmul.f32 %v11936_v29, %v1969_v7  ;;  %v2075_v54 = vmul.f32 %v11936_v29, %v1973_v62  ;;  %v9946_v56 = vmul.f32 %v11937_v8, %v1969_v7  ;;  %v11953_v13 = vld [vmem:[#allocation134_spill] sm:$0xff] }
 0x238   :  { %11941 = vst [vmem:[#allocation11_spill] sm:$0xff] %v9938_v32  ;;  %v9949_v57 = vmul.f32 %v11937_v8, %v1973_v62  ;;  %v9951_v41 = vadd.f32 %v2032_v60, %v1603_v19  ;;  %v9953_v37 = vadd.f32 %v2033_v27, %v1604_v47  ;;  %v9955_v25 = vadd.f32 %v2053_v28, %v1624_v30  ;;  %v11946_v19 = vld [vmem:[#allocation52_spill] sm:$0xff]  ;;  %v11947_v47 = vld [vmem:[#allocation51_spill] sm:$0xff]  ;;  %v11954_v27 = vld [vmem:[#allocation130_spill] sm:$0xff] }
 0x239   :  { %v9957_v0 = vadd.f32 %v2054_v48, %v1625_v38  ;;  %v9959_v1 = vadd.f32 %v2074_v22, %v1645_v14  ;;  %v9961_v46 = vadd.f32 %v2075_v54, %v1646_v24  ;;  %v5103_v45 = vsub.f32 %v5078_v53, %v11573_v63  ;;  %v11949_v38 = vld [vmem:[#allocation57_spill] sm:$0xff]  ;;  %v11950_v14 = vld [vmem:[#allocation56_spill] sm:$0xff]  ;;  %v11955_v28 = vld [vmem:[#allocation66_spill] sm:$0xff] }
 0x23a   :  { %11942 = vst [vmem:[#allocation35_spill] sm:$0xff] %v9953_v37  ;;  %v2501_v7 = vmul.f32 %v11610_v33, %v9867_v5  ;;  %v2564_v62 = vadd.f32 %v2480_v3, %v11945_v49  ;;  %v3506_v52 = vmul.f32 %v11946_v19, %v9583_v43  ;;  %v3527_v30 = vmul.f32 %v11947_v47, %v9583_v43  ;;  %v11956_v54 = vld [vmem:[#allocation14_spill] sm:$0xff]  ;;  %v11957_v32 = vld [vmem:[#allocation103_spill] sm:$0xff] }
 0x23b   :  { %11943 = vst [vmem:[#allocation123_spill] sm:$0xff] %v9957_v0  ;;  %11944 = vst [vmem:[#allocation121_spill] sm:$0xff] %v9961_v46  ;;  %v4019_v21 = vmul.f32 %v11949_v38, %v11948_v40  ;;  %v4040_v24 = vmul.f32 %v11950_v14, %v11948_v40  ;;  %v4532_v53 = vmul.f32 %v11952_v51, %v11951_v9  ;;  %v5124_v4 = vadd.f32 0.5, %v5103_v45 }
 0x23c   :  { %v2585_v60 = vadd.f32 %v2501_v7, %v11953_v13  ;;  %v3077_v3 = vadd.f32 %v11954_v27, %v2564_v62  ;;  %v4553_v48 = vmul.f32 %v11955_v28, %v11951_v9  ;;  %v5069_v22 = vadd.s32 1920, %v7304_v15  ;;  %v11959_v62 = vld [vmem:[#allocation4_spill] sm:$0xff] }
 0x23d   :  { %v9984_v49 = vrot.slane %v11956_v54, %v7099_v23  ;;  %v3518_v42 = vmul.f32 %v11946_v19, %v11957_v32  ;;  %v3539_v46 = vmul.f32 %v11947_v47, %v11957_v32  ;;  %v5145_v11 = vmul.f32 0.055555556, %v5124_v4  ;;  %v11960_v4 = vld [vmem:[#allocation13_spill] sm:$0xff] }
 0x23e   :  { %v3098_v7 = vadd.f32 %v11958_v31, %v2585_v60  ;;  %v3590_v13 = vadd.f32 %v3506_v52, %v3077_v3  ;;  %v4031_v27 = vmul.f32 %v11949_v38, %v11959_v62  ;;  %v5090_v0 = vcvt.s32.f32 %v5069_v22  ;;  %v11961_v60 = vld [vmem:[#allocation115_spill] sm:$0xff] }
 0x23f   :  { %v2492_v37 = vmul.f32 %v11608_v6, %v9984_v49  ;;  %v2513_v54 = vmul.f32 %v11610_v33, %v9984_v49  ;;  %v4052_v26 = vmul.f32 %v11950_v14, %v11959_v62  ;;  %v5166_v17 = vfloor.f32 %v5145_v11  ;;  %v11962_v22 = vld [vmem:[#allocation83_spill] sm:$0xff]  ;;  %v11967_v14 = vld [vmem:[#allocation77_spill] sm:$0xff] }
 0x240   :  { %v3611_v55 = vadd.f32 %v3527_v30, %v3098_v7  ;;  %v4103_v8 = vadd.f32 %v4019_v21, %v3590_v13  ;;  %v4544_v31 = vmul.f32 %v11952_v51, %v11960_v4  ;;  %v5115_v52 = vsub.f32 %v5090_v0, %v11573_v63  ;;  %v11963_v30 = vld [vmem:[#allocation128_spill] sm:$0xff]  ;;  %v11964_v7 = vld [vmem:[#allocation135_spill] sm:$0xff] }
 0x241   :  { %v2576_v3 = vadd.f32 %v2492_v37, %v11961_v60  ;;  %v2597_v29 = vadd.f32 %v2513_v54, %v11962_v22  ;;  %v4565_v34 = vmul.f32 %v11955_v28, %v11960_v4  ;;  %v5187_v50 = vmul.f32 18.0, %v5166_v17  ;;  %v11965_v60 = vld [vmem:[#allocation91_spill] sm:$0xff]  ;;  %v11966_v54 = vld [vmem:[#allocation120_spill] sm:$0xff] }
 0x242   :  { %vm5229_vm14 = vcmp.ge.f32.partialorder %v5166_v17, 1.0  ;;  %vm5250_vm15 = vcmp.le.f32.partialorder %v5166_v17, 16.0  ;;  %v4124_v61 = vadd.f32 %v4040_v24, %v3611_v55  ;;  %v4616_v58 = vadd.f32 %v4532_v53, %v4103_v8  ;;  %v11968_v55 = vld [vmem:[#allocation81_spill] sm:$0xff] }
 0x243   :  { %v5136_v11 = vadd.f32 0.5, %v5115_v52  ;;  %v3089_v21 = vadd.f32 %v11963_v30, %v2576_v3  ;;  %v3110_v13 = vadd.f32 %v11964_v7, %v2597_v29  ;;  %v5208_v18 = vsub.f32 %v5103_v45, %v5187_v50  ;;  %vm5271_vm8 = vmand %vm5229_vm14, %vm5250_vm15  ;;  %v11969_v3 = vld [vmem:[#allocation106_spill] sm:$0xff]  ;;  %v11970_v30 = vld [vmem:[#allocation39_spill] sm:$0xff] }
 0x244   :  { %v4637_v0 = vadd.f32 %v4553_v48, %v4124_v61  ;;  %v5056_v37 = vadd.s32 256, %v7304_v15  ;;  %v3589_v22 = vadd.f32 %v11966_v54, %v11965_v60  ;;  %v4892_v38 = vadd.f32 %v11967_v14, %v4616_v58 }
 0x245   :  { %v5157_v47 = vmul.f32 0.055555556, %v5136_v11  ;;  %v3602_v19 = vadd.f32 %v3518_v42, %v3089_v21  ;;  %v3623_v17 = vadd.f32 %v3539_v46, %v3110_v13  ;;  %vm5292_vm2 = vcmp.ge.f32.partialorder %v5208_v18, 1.0  ;;  %v11971_v11 = vld [vmem:[#allocation145_spill] sm:$0xff] }
 0x246   :  { %vm5334_vm3 = vcmp.le.f32.partialorder %v5208_v18, 16.0  ;;  %v4913_v8 = vadd.f32 %v11968_v55, %v4637_v0  ;;  %v5077_v24 = vcvt.s32.f32 %v5056_v37  ;;  %vm5313_vm9 = vmand %vm5271_vm8, %vm5292_vm2  ;;  %v4976_v29 = vmax.f32 %v4892_v38, 0.0  ;;  %v11974_v0 = vld [vmem:[#allocation107_spill] sm:$0xff] }
 0x247   :  { %v5178_v50 = vfloor.f32 %v5157_v47  ;;  %v4115_v45 = vadd.f32 %v4031_v27, %v3602_v19  ;;  %v4136_v61 = vadd.f32 %v4052_v26, %v3623_v17  ;;  %vm5355_vm10 = vmand %vm5313_vm9, %vm5334_vm3  ;;  %v3610_v58 = vadd.f32 %v11970_v30, %v11969_v3  ;;  %v11973_v19 = vld [vmem:[#allocation146_spill] sm:$0xff]  ;;  %v11978_v30 = vld [vmem:[#allocation139_spill] sm:$0xff] }
 0x248   :  { %v4997_v53 = vmax.f32 %v4913_v8, 0.0  ;;  %v5102_v48 = vsub.f32 %v5077_v24, %v11573_v63  ;;  %v4102_v42 = vadd.f32 %v11971_v11, %v3589_v22  ;;  %v11972_v46 = vmov 1.0   ;;  %v11976_v17 = vld [vmem:[#allocation86_spill] sm:$0xff]  ;;  %v11979_v11 = vld [vmem:[#allocation40_spill] sm:$0xff] }
 0x249   :  { %6276 = vmatprep.mubr.msk.f32.mxu1 %vm5355_vm10, %v11972_v46  ;;  %v5199_v18 = vmul.f32 18.0, %v5178_v50  ;;  %vm5241_vm11 = vcmp.ge.f32.partialorder %v5178_v50, 1.0  ;;  %vm5262_vm12 = vcmp.le.f32.partialorder %v5178_v50, 16.0  ;;  %v4628_v21 = vadd.f32 %v4544_v31, %v4115_v45  ;;  %v11977_v3 = vld [vmem:[#allocation6_spill] sm:$0xff] }
 0x24a   :  { %v6431_v7 = vpack.c.bf16 %v4997_v53, %v4976_v29  ;;  %v4649_v38 = vadd.f32 %v4565_v34, %v4136_v61  ;;  %v5123_v47 = vadd.f32 0.5, %v5102_v48  ;;  %v4123_v26 = vadd.f32 %v11973_v19, %v3610_v58  ;;  %vm5283_vm13 = vmand %vm5241_vm11, %vm5262_vm12  ;;  %v11975_v34 = vld [vmem:[#allocation93_spill] sm:$0xff] }
 0x24b   :  { %v5220_v27 = vsub.f32 %v5115_v52, %v5199_v18  ;;  %v4904_v13 = vadd.f32 %v11967_v14, %v4628_v21  ;;  %v4531_v37 = vmul.f32 %v11952_v51, %v11974_v0  ;;  %v4552_v60 = vmul.f32 %v11955_v28, %v11974_v0  ;;  %v11980_v21 = vld [vmem:[#allocation12_spill] sm:$0xff] }
 0x24c   :  { %6432 = vmatprep.subr.bf16.mxu1 %v6431_v7  ;;  %v4925_v54 = vadd.f32 %v11968_v55, %v4649_v38  ;;  %v5144_v22 = vmul.f32 0.055555556, %v5123_v47  ;;  %v5068_v31 = vadd.s32 1792, %v7304_v15  ;;  %v3601_v8 = vadd.f32 %v11976_v17, %v11975_v34 }
 0x24d   :  { %vm5304_vm14 = vcmp.ge.f32.partialorder %v5220_v27, 1.0  ;;  %vm5346_vm15 = vcmp.le.f32.partialorder %v5220_v27, 16.0  ;;  %v4988_v52 = vmax.f32 %v4904_v13, 0.0  ;;  %v4615_v24 = vadd.f32 %v4531_v37, %v4102_v42  ;;  %v11981_v27 = vld [vmem:[#allocation79_spill] sm:$0xff] }
 0x24e   :  { %vm5325_vm8 = vmand %vm5283_vm13, %vm5304_vm14  ;;  %v5009_v29 = vmax.f32 %v4925_v54, 0.0  ;;  %v5165_v50 = vfloor.f32 %v5144_v22  ;;  %v4636_v45 = vadd.f32 %v4552_v60, %v4123_v26  ;;  %v5089_v61 = vcvt.s32.f32 %v5068_v31  ;;  %v11982_v22 = vld [vmem:[#allocation60_spill] sm:$0xff] }
 0x24f   :  { %vm5367_vm2 = vmand %vm5325_vm8, %vm5346_vm15  ;;  %v4891_v53 = vadd.f32 %v11967_v14, %v4615_v24  ;;  %v3622_v58 = vadd.f32 %v11978_v30, %v11977_v3  ;;  %v4114_v18 = vadd.f32 %v11979_v11, %v3601_v8  ;;  %v4543_v7 = vmul.f32 %v11952_v51, %v11980_v21  ;;  %v11983_v8 = vld [vmem:[#allocation59_spill] sm:$0xff]  ;;  %v11986_v30 = vld [vmem:[#allocation126_spill] sm:$0xff] }
 0x250   :  { %6288 = vmatprep.mubr.msk.f32.mxu0 %vm5367_vm2, %v11972_v46  ;;  %v6479_v38 = vpack.c.bf16 %v5009_v29, %v4988_v52  ;;  %v5186_v42 = vmul.f32 18.0, %v5165_v50  ;;  %vm5228_vm3 = vcmp.ge.f32.partialorder %v5165_v50, 1.0  ;;  %vm5249_vm9 = vcmp.le.f32.partialorder %v5165_v50, 16.0  ;;  %v11984_v24 = vld [vmem:[#allocation75_spill] sm:$0xff] }
 0x251   :  { %v4912_v47 = vadd.f32 %v11968_v55, %v4636_v45  ;;  %v4975_v19 = vmax.f32 %v4891_v53, 0.0  ;;  %v5114_v26 = vsub.f32 %v5089_v61, %v11573_v63  ;;  %v4135_v13 = vadd.f32 %v11981_v27, %v3622_v58  ;;  %vm5270_vm10 = vmand %vm5228_vm3, %vm5249_vm9  ;;  %v11985_v53 = vld [vmem:[#allocation136_spill] sm:$0xff]  ;;  %v11989_v27 = vld [vmem:[#allocation87_spill] sm:$0xff] }
 0x252   :  { %6480 = vmatprep.subr.bf16.mxu0 %v6479_v38  ;;  %v5207_v37 = vsub.f32 %v5102_v48, %v5186_v42  ;;  %v4564_v60 = vmul.f32 %v11955_v28, %v11980_v21  ;;  %v4627_v54 = vadd.f32 %v4543_v7, %v4114_v18  ;;  %v2522_v31 = vmul.f32 %v11982_v22, %v9867_v5  ;;  %v11988_v38 = vld [vmem:[#allocation94_spill] sm:$0xff] }
 0x253   :  { %v4996_v34 = vmax.f32 %v4912_v47, 0.0  ;;  %v5135_v17 = vadd.f32 0.5, %v5114_v26  ;;  %v2543_v52 = vmul.f32 %v11983_v8, %v9867_v5  ;;  %v3548_v29 = vmul.f32 %v11984_v24, %v9583_v43  ;;  %v11987_v5 = vld [vmem:[#allocation74_spill] sm:$0xff] }
 0x254   :  { %vm5291_vm11 = vcmp.ge.f32.partialorder %v5207_v37, 1.0  ;;  %vm5333_vm12 = vcmp.le.f32.partialorder %v5207_v37, 16.0  ;;  %v4648_v50 = vadd.f32 %v4564_v60, %v4135_v13  ;;  %v4903_v48 = vadd.f32 %v11967_v14, %v4627_v54  ;;  %v11990_v13 = vld [vmem:[#allocation137_spill] sm:$0xff]  ;;  %v11991_v60 = vld [vmem:[#allocation19_spill] sm:$0xff] }
 0x255   :  { %vm5312_vm13 = vmand %vm5270_vm10, %vm5291_vm11  ;;  %v6433_v45 = vpack.c.bf16 %v4996_v34, %v4975_v19  ;;  %v5156_v61 = vmul.f32 0.055555556, %v5135_v17  ;;  %v2606_v3 = vadd.f32 %v2522_v31, %v11985_v53  ;;  %v2627_v58 = vadd.f32 %v2543_v52, %v11986_v30  ;;  %v11992_v34 = vld [vmem:[#allocation97_spill] sm:$0xff] }
 0x256   :  { %vm5354_vm14 = vmand %vm5312_vm13, %vm5333_vm12  ;;  %v4924_v11 = vadd.f32 %v11968_v55, %v4648_v50  ;;  %v4987_v18 = vmax.f32 %v4903_v48, 0.0  ;;  %v3569_v7 = vmul.f32 %v11987_v5, %v9583_v43  ;;  %v4061_v42 = vmul.f32 %v11988_v38, %v11948_v40  ;;  %v11993_v43 = vld [vmem:[#allocation96_spill] sm:$0xff]  ;;  %v11995_v55 = vld [vmem:[#allocation58_spill] sm:$0xff] }
 0x257   :  { %6277 = vmatmul.mubr.msk.f32.vlgmr.msra.gmra.mrb[0].mxu1 %vm5354_vm14, %v11972_v46  ;;  %v5177_v47 = vfloor.f32 %v5156_v61  ;;  %v3119_v19 = vadd.f32 %v11989_v27, %v2606_v3  ;;  %v3140_v37 = vadd.f32 %v11990_v13, %v2627_v58  ;;  %v4082_v54 = vmul.f32 %v11991_v60, %v11948_v40 }
 0x258   :  { %6434 = vmatpush1.bf16.xpose.msra.mxu1 %v6433_v45  ;;  %v5008_v31 = vmax.f32 %v4924_v11, 0.0  ;;  %v4574_v17 = vmul.f32 %v11992_v34, %v11951_v9  ;;  %v4595_v52 = vmul.f32 %v11993_v43, %v11951_v9  ;;  %v2534_v50 = vmul.f32 %v11982_v22, %v9984_v49  ;;  %v11994_v45 = vld [vmem:[#allocation127_spill] sm:$0xff] }
 0x259   :  { %v5198_v48 = vmul.f32 18.0, %v5177_v47  ;;  %vm5240_vm15 = vcmp.ge.f32.partialorder %v5177_v47, 1.0  ;;  %vm5261_vm8 = vcmp.le.f32.partialorder %v5177_v47, 16.0  ;;  %v3632_v61 = vadd.f32 %v3548_v29, %v3119_v19  ;;  %v11996_v29 = vld [vmem:[#allocation138_spill] sm:$0xff]  ;;  %v11997_v19 = vld [vmem:[#allocation89_spill] sm:$0xff] }
 0x25a   :  { %v6481_v53 = vpack.c.bf16 %v5008_v31, %v4987_v18  ;;  %v3653_v3 = vadd.f32 %v3569_v7, %v3140_v37  ;;  %v2555_v40 = vmul.f32 %v11983_v8, %v9984_v49  ;;  %v2618_v30 = vadd.f32 %v2534_v50, %v11994_v45  ;;  %vm5282_vm2 = vmand %vm5240_vm15, %vm5261_vm8  ;;  %v11998_v50 = vld [vmem:[#allocation101_spill] sm:$0xff] }
 0x25b   :  { %v5219_v58 = vsub.f32 %v5114_v26, %v5198_v48  ;;  %v4145_v11 = vadd.f32 %v4061_v42, %v3632_v61  ;;  %v3560_v9 = vmul.f32 %v11984_v24, %v11957_v32  ;;  %v3581_v27 = vmul.f32 %v11987_v5, %v11957_v32 }
 0x25c   :  { %v4166_v13 = vadd.f32 %v4082_v54, %v3653_v3  ;;  %v2639_v47 = vadd.f32 %v2555_v40, %v11995_v55  ;;  %v3131_v18 = vadd.f32 %v11996_v29, %v2618_v30  ;;  %v4073_v7 = vmul.f32 %v11988_v38, %v11959_v62  ;;  %v6992_v55 = vpop.permute.xlu1 %6991  ;;  %v12001_v3 = vld [vmem:[#allocation98_spill] sm:$0xff] }
 0x25d   :  { %vm5303_vm3 = vcmp.ge.f32.partialorder %v5219_v58, 1.0  ;;  %vm5345_vm9 = vcmp.le.f32.partialorder %v5219_v58, 16.0  ;;  %v4658_v49 = vadd.f32 %v4574_v17, %v4145_v11  ;;  %v4094_v26 = vmul.f32 %v11991_v60, %v11959_v62  ;;  %v11999_v17 = vld [vmem:[#allocation16_spill] sm:$0xff]  ;;  %v12000_v62 = vld [vmem:[#allocation10_spill] sm:$0xff] }
 0x25e   :  { %vm5324_vm10 = vmand %vm5282_vm2, %vm5303_vm3  ;;  %v4679_v42 = vadd.f32 %v4595_v52, %v4166_v13  ;;  %v3152_v37 = vadd.f32 %v11997_v19, %v2639_v47  ;;  %v3644_v31 = vadd.f32 %v3560_v9, %v3131_v18  ;;  %v4586_v32 = vmul.f32 %v11992_v34, %v11960_v4 }
 0x25f   :  { %v10083_v54 = vadd.f32 %v9946_v56, %v9892_v44  ;;  %vm5366_vm11 = vmand %vm5324_vm10, %vm5345_vm9  ;;  %v4934_v48 = vadd.f32 %v11998_v50, %v4658_v49  ;;  %v2466_v61 = vrot.slane %v11999_v17, %v7099_v23  ;;  %v2474_v52 = vrot.slane %v12000_v62, %v7099_v23 }
 0x260   :  { %6289 = vmatmul.mubr.msk.f32.vlgmr.msra.gmra.mrb[0].mxu0 %vm5366_vm11, %v11972_v46  ;;  %v4955_v40 = vadd.f32 %v12001_v3, %v4679_v42  ;;  %v3665_v45 = vadd.f32 %v3581_v27, %v3152_v37  ;;  %v4157_v30 = vadd.f32 %v4073_v7, %v3644_v31  ;;  %v4607_v58 = vmul.f32 %v11993_v43, %v11960_v4 }
 0x261   :  { %v10096_v44 = vadd.f32 %v9949_v57, %v9894_v39  ;;  %6482 = vmatpush1.bf16.xpose.msra.mxu0 %v6481_v53  ;;  %v5018_v56 = vmax.f32 %v4934_v48, 0.0  ;;  %v6994_v11 = vunpack.i.h.bf16 %v6992_v55  ;;  %v6993_v9 = vunpack.i.l.bf16 %v6992_v55 }
 0x262   :  { %v5039_v13 = vmax.f32 %v4955_v40, 0.0  ;;  %v4178_v47 = vadd.f32 %v4094_v26, %v3665_v45  ;;  %v4670_v29 = vadd.f32 %v4586_v32, %v4157_v30  ;;  %v2493_v18 = vmul.f32 %v11608_v6, %v2466_v61 }
 0x263   :  { %12002 = vst [vmem:[#allocation116_spill] sm:$0xff] %v10096_v44  ;;  %v2495_v49 = vmul.f32 %v11608_v6, %v2474_v52  ;;  %v2514_v27 = vmul.f32 %v11610_v33, %v2466_v61  ;;  %v2516_v7 = vmul.f32 %v11610_v33, %v2474_v52  ;;  %v2535_v4 = vmul.f32 %v11982_v22, %v2466_v61 }
 0x264   :  { %v6435_v42 = vpack.c.bf16 %v5039_v13, %v5018_v56  ;;  %v4691_v39 = vadd.f32 %v4607_v58, %v4178_v47  ;;  %v4946_v57 = vadd.f32 %v11998_v50, %v4670_v29  ;;  %v2537_v53 = vmul.f32 %v11982_v22, %v2474_v52  ;;  %v12005_v58 = vld [vmem:[#allocation102_spill] sm:$0xff] }
 0x265   :  { %v2556_v19 = vmul.f32 %v11983_v8, %v2466_v61  ;;  %v2558_v26 = vmul.f32 %v11983_v8, %v2474_v52  ;;  %v2577_v37 = vadd.f32 %v2493_v18, %v9913_v12  ;;  %v2579_v31 = vadd.f32 %v2495_v49, %v9917_v16  ;;  %v12003_v52 = vld [vmem:[#allocation82_spill] sm:$0xff]  ;;  %v10120_v16 = vpop.permute.xlu0 %6986  ;;  %v12008_v49 = vld [vmem:[#allocation47_spill] sm:$0xff] }
 0x266   :  { %6436 = vmatprep.subr.bf16.mxu1 %v6435_v42  ;;  %v4967_v32 = vadd.f32 %v12001_v3, %v4691_v39  ;;  %v5030_v55 = vmax.f32 %v4946_v57, 0.0  ;;  %v2598_v48 = vadd.f32 %v2514_v27, %v9919_v36  ;;  %v2600_v17 = vadd.f32 %v2516_v7, %v9923_v10  ;;  %v12009_v7 = vld [vmem:[#allocation46_spill] sm:$0xff] }
 0x267   :  { %v2619_v62 = vadd.f32 %v2535_v4, %v9925_v2  ;;  %v2621_v40 = vadd.f32 %v2537_v53, %v9929_v20  ;;  %v2770_v61 = vsel %vm2769_vm4, %v6993_v9, %v6994_v11  ;;  %v12004_v45 = vunpack.i.h.bf16 %v12003_v52  ;;  %v12010_v57 = vld [vmem:[#allocation70_spill] sm:$0xff] }
 0x268   :  { %v5051_v30 = vmax.f32 %v4967_v32, 0.0  ;;  %v12006_v56 = vunpack.i.h.bf16 %v12005_v58  ;;  %v2983_v20 = vrot.slane %v2770_v61, %v7099_v23  ;;  %v2640_v2 = vadd.f32 %v2556_v19, %v9931_v35 }
 0x269   :  { %v2771_v12 = vsel %vm2769_vm4, %v12004_v45, %v6993_v9  ;;  %v2642_v13 = vadd.f32 %v2558_v26, %v9941_v59  ;;  %v12007_v9 = vld [vmem:[#allocation8_spill] sm:$0xff]  ;;  %v6988_v59 = vunpack.i.l.bf16 %v10120_v16  ;;  %vm12125_vm12 = vcmp.lt.s32.totalorder %v7304_v15, 17 }
 0x26a   :  { %v2790_v36 = vsel %vm2769_vm4, %v6994_v11, %v12006_v56  ;;  %v2979_v10 = vrot.slane %v2771_v12, %v7099_v23  ;;  %v2418_v29 = vrot.slane %v12007_v9, %v7099_v23  ;;  %v6483_v18 = vpack.c.bf16 %v5051_v30, %v5030_v55  ;;  %v12014_v55 = vld [vmem:[#allocation69_spill] sm:$0xff]  ;;  %v7002_v30 = vpop.permute.xlu1 %7001  ;;  %vm12132_vm13 = vmmov %vm12125_vm12 }
 0x26b   :  { %v2987_v47 = vrot.slane %v2790_v36, %v7099_v23  ;;  %v10141_v53 = vmul.f32 %v12008_v49, %v2983_v20  ;;  %v10144_v19 = vmul.f32 %v12009_v7, %v2983_v20  ;;  %v10147_v26 = vmul.f32 %v12010_v57, %v2983_v20 }
 0x26c   :  { %v3006_v27 = vmul.f32 %v12008_v49, %v2979_v10  ;;  %v3027_v4 = vmul.f32 %v12009_v7, %v2979_v10  ;;  %v3048_v35 = vmul.f32 %v12010_v57, %v2979_v10  ;;  %6484 = vmatprep.subr.bf16.mxu0 %v6483_v18  ;;  %v3069_v61 = vmul.f32 %v12014_v55, %v2979_v10 }
 0x26d   :  { %v3008_v42 = vmul.f32 %v12008_v49, %v2987_v47  ;;  %v3029_v39 = vmul.f32 %v12009_v7, %v2987_v47  ;;  %12011 = vst [vmem:[#allocation124_spill] sm:$0xff] %v10141_v53  ;;  %12012 = vst [vmem:[#allocation21_spill] sm:$0xff] %v10144_v19  ;;  %v3050_v32 = vmul.f32 %v12010_v57, %v2987_v47 }
 0x26e   :  { %12013 = vst [vmem:[#allocation64_spill] sm:$0xff] %v10147_v26  ;;  %v10152_v52 = vmul.f32 %v12014_v55, %v2983_v20  ;;  %v3071_v45 = vmul.f32 %v12014_v55, %v2987_v47  ;;  %v10155_v12 = vadd.f32 %v3006_v27, %v2577_v37  ;;  %v10159_v56 = vadd.f32 %v3027_v4, %v2598_v48  ;;  %v12023_v48 = vld [vmem:[#allocation84_spill] sm:$0xff]  ;;  %v12060_v26 = vld [vmem:[#allocation125_spill] sm:$0xff] }
 0x26f   :  { %v10157_v58 = vadd.f32 %v3008_v42, %v2579_v31  ;;  %v10161_v36 = vadd.f32 %v3029_v39, %v2600_v17  ;;  %v10163_v9 = vadd.f32 %v3048_v35, %v2619_v62  ;;  %v10165_v18 = vadd.f32 %v3050_v32, %v2621_v40 }
 0x270   :  { %12015 = vst [vmem:[#allocation99_spill] sm:$0xff] %v10152_v52  ;;  %12016 = vst [vmem:[#allocation129_spill] sm:$0xff] %v10155_v12  ;;  %v2481_v10 = vmul.f32 %v11608_v6, %v2418_v29  ;;  %v2502_v20 = vmul.f32 %v11610_v33, %v2418_v29  ;;  %v2523_v11 = vmul.f32 %v11982_v22, %v2418_v29  ;;  %v12022_v47 = vunpack.i.h.bf16 %v10120_v16 }
 0x271   :  { %12017 = vst [vmem:[#allocation132_spill] sm:$0xff] %v10157_v58  ;;  %12018 = vst [vmem:[#allocation140_spill] sm:$0xff] %v10159_v56  ;;  %v2544_v37 = vmul.f32 %v11983_v8, %v2418_v29  ;;  %v12024_v17 = vunpack.i.h.bf16 %v12023_v48  ;;  %v7004_v40 = vunpack.i.h.bf16 %v7002_v30  ;;  %v7003_v32 = vunpack.i.l.bf16 %v7002_v30  ;;  %v12055_v58 = vld [vmem:[#allocation85_spill] sm:$0xff] }
 0x272   :  { %12019 = vst [vmem:[#allocation88_spill] sm:$0xff] %v10161_v36  ;;  %12020 = vst [vmem:[#allocation133_spill] sm:$0xff] %v10163_v9  ;;  %v2782_v31 = vsel %vm2769_vm4, %v6988_v59, %v12022_v47  ;;  %v2565_v27 = vadd.f32 %v2481_v10, %v9951_v41  ;;  %v2586_v4 = vadd.f32 %v2502_v20, %v9955_v25  ;;  %v12025_v47 = vld [vmem:[#allocation112_spill] sm:$0xff] }
 0x273   :  { %12021 = vst [vmem:[#allocation119_spill] sm:$0xff] %v10165_v18  ;;  %v2783_v62 = vsel %vm2769_vm4, %v12024_v17, %v6988_v59  ;;  %v2607_v42 = vadd.f32 %v2523_v11, %v9959_v1  ;;  %v2628_v29 = vadd.f32 %v2544_v37, %v10083_v54  ;;  %v2935_v35 = vrot.slane %v2782_v31, %v7099_v23  ;;  %v10193_v11 = vpop.permute.xlu0 %6996 }
 0x274   :  { %v2931_v39 = vrot.slane %v2783_v62, %v7099_v23  ;;  %v12026_v18 = vunpack.i.h.bf16 %v12025_v47  ;;  %v10195_v10 = vadd.f32 %v3069_v61, %v2640_v2  ;;  %v10197_v54 = vadd.f32 %v3071_v45, %v2642_v13  ;;  %v12035_v13 = vld [vmem:[#allocation141_spill] sm:$0xff] }
 0x275   :  { %v10200_v30 = vmul.f32 %v12008_v49, %v2935_v35  ;;  %v10203_v20 = vmul.f32 %v12009_v7, %v2935_v35  ;;  %v10209_v37 = vmul.f32 %v12014_v55, %v2935_v35  ;;  %v3283_v2 = vsel %vm3282_vm5, %v7003_v32, %v7004_v40 }
 0x276   :  { %v3303_v48 = vsel %vm3282_vm5, %v7004_v40, %v12026_v18  ;;  %v2994_v59 = vmul.f32 %v12008_v49, %v2931_v39  ;;  %v3015_v41 = vmul.f32 %v12009_v7, %v2931_v39  ;;  %v3036_v25 = vmul.f32 %v12010_v57, %v2931_v39  ;;  %12027 = vst [vmem:[#allocation92_spill] sm:$0xff] %v10195_v10  ;;  %v12040_v40 = vld [vmem:[#allocation52_spill] sm:$0xff] }
 0x277   :  { %v3057_v1 = vmul.f32 %v12014_v55, %v2931_v39  ;;  %12028 = vst [vmem:[#allocation113_spill] sm:$0xff] %v10197_v54  ;;  %12029 = vst [vmem:[#allocation34_spill] sm:$0xff] %v10200_v30  ;;  %v10206_v18 = vmul.f32 %v12010_v57, %v2935_v35  ;;  %v12036_v61 = vunpack.i.h.bf16 %v12035_v13  ;;  %v3500_v62 = vrot.slane %v3303_v48, %v7099_v23  ;;  %v12042_v13 = vld [vmem:[#allocation51_spill] sm:$0xff] }
 0x278   :  { %12030 = vst [vmem:[#allocation95_spill] sm:$0xff] %v10203_v20  ;;  %12032 = vst [vmem:[#allocation104_spill] sm:$0xff] %v10209_v37  ;;  %v10211_v31 = vadd.f32 %v2994_v59, %v2565_v27  ;;  %v10213_v17 = vadd.f32 %v3015_v41, %v2586_v4  ;;  %v10223_v47 = vadd.f32 %v3036_v25, %v2607_v42  ;;  %v6998_v4 = vunpack.i.l.bf16 %v10193_v11  ;;  %v12044_v48 = vld [vmem:[#allocation143_spill] sm:$0xff] }
 0x279   :  { %12031 = vst [vmem:[#allocation22_spill] sm:$0xff] %v10206_v18  ;;  %v3284_v45 = vsel %vm3282_vm5, %v12036_v61, %v7003_v32  ;;  %v10225_v35 = vadd.f32 %v3057_v1, %v2628_v29  ;;  %v10230_v59 = vrot.slane %v3283_v2, %v7099_v23  ;;  %v10233_v41 = vmul.f32 %v12040_v40, %v3500_v62  ;;  %v12045_v61 = vld [vmem:[#allocation50_spill] sm:$0xff]  ;;  %v7012_v2 = vpop.permute.xlu1 %7011 }
 0x27a   :  { %12033 = vst [vmem:[#allocation7_spill] sm:$0xff] %v10211_v31  ;;  %12034 = vst [vmem:[#allocation33_spill] sm:$0xff] %v10213_v17  ;;  %v3492_v27 = vrot.slane %v3284_v45, %v7099_v23  ;;  %v10236_v32 = vmul.f32 %v12042_v13, %v3500_v62  ;;  %v3631_v39 = vadd.f32 %v12045_v61, %v12044_v48  ;;  %v12051_v54 = vunpack.i.h.bf16 %v10193_v11  ;;  %v12052_v61 = vld [vmem:[#allocation147_spill] sm:$0xff] }
 0x27b   :  { %12037 = vst [vmem:[#allocation105_spill] sm:$0xff] %v10223_v47  ;;  %12038 = vst [vmem:[#allocation65_spill] sm:$0xff] %v10225_v35  ;;  %v10247_v25 = vmul.f32 %v11984_v24, %v3500_v62  ;;  %v10250_v1 = vmul.f32 %v11987_v5, %v3500_v62  ;;  %v4594_v9 = vmul.f32 %v11993_v43, %v11974_v0  ;;  %v12057_v35 = vld [vmem:[#allocation110_spill] sm:$0xff] }
 0x27c   :  { %12039 = vst [vmem:[#allocation68_spill] sm:$0xff] %v10230_v59  ;;  %12041 = vst [vmem:[#allocation148_spill] sm:$0xff] %v10233_v41  ;;  %v10241_v42 = vmul.f32 %v12040_v40, %v3492_v27  ;;  %v10244_v29 = vmul.f32 %v12042_v13, %v3492_v27  ;;  %v10253_v45 = vmul.f32 %v11984_v24, %v3492_v27  ;;  %v12054_v41 = vld [vmem:[#allocation144_spill] sm:$0xff]  ;;  %v12058_v47 = vld [vmem:[#allocation142_spill] sm:$0xff] }
 0x27d   :  { %12043 = vst [vmem:[#allocation131_spill] sm:$0xff] %v10236_v32  ;;  %12048 = vst [vmem:[#allocation130_spill] sm:$0xff] %v10247_v25  ;;  %v3295_v48 = vsel %vm3282_vm5, %v6998_v4, %v12051_v54  ;;  %v12053_v32 = vunpack.i.h.bf16 %v12052_v61  ;;  %v3652_v25 = vadd.f32 %v12055_v58, %v12054_v41  ;;  %v12059_v61 = vld [vmem:[#allocation109_spill] sm:$0xff]  ;;  %v4585_v58 = vmul.f32 %v11992_v34, %v11980_v21  ;;  %v7022_v18 = vpop.permute.xlu1 %7021 }
 0x27e   :  { %12046 = vst [vmem:[#allocation67_spill] sm:$0xff] %v10241_v42  ;;  %12047 = vst [vmem:[#allocation134_spill] sm:$0xff] %v10244_v29  ;;  %v3643_v52 = vadd.f32 %v12059_v61, %v12058_v47  ;;  %v10284_v41 = vrot.slane %v3295_v48, %v7099_v23  ;;  %v12068_v61 = vld [vmem:[#allocation100_spill] sm:$0xff]  ;;  %v4606_v37 = vmul.f32 %v11993_v43, %v11980_v21  ;;  %v12146_v43 = vld [vmem:[#allocation55_spill] sm:$0xff] }
 0x27f   :  { %12049 = vst [vmem:[#allocation66_spill] sm:$0xff] %v10250_v1  ;;  %12050 = vst [vmem:[#allocation14_spill] sm:$0xff] %v10253_v45  ;;  %v3296_v36 = vsel %vm3282_vm5, %v12053_v32, %v6998_v4  ;;  %v12056_v1 = vld [vmem:[#allocation61_spill] sm:$0xff]  ;;  %v4573_v45 = vmul.f32 %v11992_v34, %v11974_v0  ;;  %v4165_v54 = vadd.f32 %v12057_v35, %v3652_v25  ;;  %v12061_v4 = vld [vmem:[#allocation118_spill] sm:$0xff] }
 0x280   :  { %v3444_v62 = vrot.slane %v3296_v36, %v7099_v23  ;;  %v4144_v10 = vadd.f32 %v12056_v1, %v3631_v39  ;;  %v3664_v32 = vadd.f32 %v12061_v4, %v12060_v26  ;;  %v10278_v36 = vpop.permute.xlu0 %7006  ;;  %v10281_v39 = vmul.f32 %v11987_v5, %v3492_v27  ;;  %12064 = vst [vmem:[#allocation4_spill] sm:$0xff] %v10284_v41  ;;  %v12067_v26 = vld [vmem:[#allocation41_spill] sm:$0xff]  ;;  %v12115_v42 = vld [vmem:[#allocation44_spill] sm:$0xff] }
 0x281   :  { %12062 = vst [vmem:[#allocation103_spill] sm:$0xff] %v10278_v36  ;;  %v4678_v25 = vadd.f32 %v4594_v9, %v4165_v54  ;;  %v4156_v1 = vadd.f32 %v12067_v26, %v3643_v52  ;;  %v7014_v27 = vunpack.i.h.bf16 %v7012_v2  ;;  %v11244_v48 = vunpack.i.h.bf16 %v10278_v36 }
 0x282   :  { %12063 = vst [vmem:[#allocation5_spill] sm:$0xff] %v10281_v39  ;;  %v10287_v0 = vmul.f32 %v12040_v40, %v3444_v62  ;;  %v10290_v35 = vmul.f32 %v12042_v13, %v3444_v62  ;;  %v4657_v47 = vadd.f32 %v4573_v45, %v4144_v10  ;;  %v4177_v4 = vadd.f32 %v12068_v61, %v3664_v32  ;;  %v12069_v45 = vld [vmem:[#allocation122_spill] sm:$0xff] }
 0x283   :  { %v7013_v39 = vunpack.i.l.bf16 %v7012_v2  ;;  %v4954_v29 = vadd.f32 %v12001_v3, %v4678_v25  ;;  %v4669_v56 = vadd.f32 %v4585_v58, %v4156_v1  ;;  %v7008_v10 = vunpack.i.l.bf16 %v10278_v36  ;;  %v12071_v2 = vld [vmem:[#allocation72_spill] sm:$0xff] }
 0x284   :  { %12065 = vst [vmem:[#allocation13_spill] sm:$0xff] %v10287_v0  ;;  %12066 = vst [vmem:[#allocation115_spill] sm:$0xff] %v10290_v35  ;;  %v4933_v44 = vadd.f32 %v11998_v50, %v4657_v47  ;;  %v4690_v9 = vadd.f32 %v4606_v37, %v4177_v4  ;;  %v12070_v54 = vunpack.i.h.bf16 %v12069_v45  ;;  %v12072_v32 = vunpack.i.h.bf16 %v12071_v2  ;;  %v10312_v37 = vpop.permute.xlu0 %7016  ;;  %v12120_v35 = vld [vmem:[#allocation90_spill] sm:$0xff]  ;;  %v12123_v0 = vld [vmem:[#allocation36_spill] sm:$0xff] }
 0x285   :  { %v3796_v52 = vsel %vm3795_vm6, %v7013_v39, %v7014_v27  ;;  %v5038_v61 = vmax.f32 %v4954_v29, 0.0  ;;  %v4945_v58 = vadd.f32 %v11998_v50, %v4669_v56  ;;  %v10315_v1 = vmul.f32 %v11984_v24, %v3444_v62 }
 0x286   :  { %v3797_v21 = vsel %vm3795_vm6, %v12070_v54, %v7013_v39  ;;  %v3816_v26 = vsel %vm3795_vm6, %v7014_v27, %v12072_v32  ;;  %v5017_v47 = vmax.f32 %v4933_v44, 0.0  ;;  %v10318_v4 = vmul.f32 %v11987_v5, %v3444_v62 }
 0x287   :  { %v4005_v25 = vrot.slane %v3797_v21, %v7099_v23  ;;  %12073 = vst [vmem:[#allocation83_spill] sm:$0xff] %v10315_v1  ;;  %v4966_v39 = vadd.f32 %v12001_v3, %v4690_v9  ;;  %v4013_v45 = vrot.slane %v3816_v26, %v7099_v23  ;;  %v5029_v27 = vmax.f32 %v4945_v58, 0.0  ;;  %v12076_v21 = vld [vmem:[#allocation57_spill] sm:$0xff]  ;;  %v12079_v9 = vld [vmem:[#allocation56_spill] sm:$0xff]  ;;  %v756_v26 = vpop.permute.xlu1 %755  ;;  %v12084_v58 = vld [vmem:[#allocation114_spill] sm:$0xff] }
 0x288   :  { %12074 = vst [vmem:[#allocation128_spill] sm:$0xff] %v10318_v4  ;;  %v6437_v54 = vpack.c.bf16 %v5038_v61, %v5017_v47  ;;  %v10323_v44 = vrot.slane %v3796_v52, %v7099_v23  ;;  %v3808_v56 = vsel %vm3795_vm6, %v7008_v10, %v11244_v48  ;;  %v7024_v1 = vunpack.i.h.bf16 %v7022_v18  ;;  %v242_v50 = vpop.permute.xlu0 %241 }
 0x289   :  { %v5050_v29 = vmax.f32 %v4966_v39, 0.0  ;;  %v10330_v2 = vmul.f32 %v12076_v21, %v4005_v25  ;;  %v10333_v62 = vmul.f32 %v12076_v21, %v4013_v45  ;;  %v10336_v32 = vmul.f32 %v12079_v9, %v4005_v25 }
 0x28a   :  { %12075 = vst [vmem:[#allocation135_spill] sm:$0xff] %v10323_v44  ;;  %6438 = vmatpush1.bf16.xpose.msra.mxu1 %v6437_v54  ;;  %v10339_v52 = vmul.f32 %v12079_v9, %v4013_v45  ;;  %v10342_v47 = vmul.f32 %v11988_v38, %v4005_v25  ;;  %v10345_v61 = vmul.f32 %v11988_v38, %v4013_v45  ;;  %v12085_v39 = vunpack.i.h.bf16 %v12084_v58 }
 0x28b   :  { %12077 = vst [vmem:[#allocation91_spill] sm:$0xff] %v10330_v2  ;;  %12078 = vst [vmem:[#allocation120_spill] sm:$0xff] %v10333_v62  ;;  %v6485_v62 = vpack.c.bf16 %v5050_v29, %v5029_v27  ;;  %v10352_v4 = vmul.f32 %v11991_v60, %v4005_v25  ;;  %v7023_v3 = vunpack.i.l.bf16 %v7022_v18  ;;  %v10361_v58 = vrot.slane %v3808_v56, %v7099_v23 }
 0x28c   :  { %12080 = vst [vmem:[#allocation106_spill] sm:$0xff] %v10336_v32  ;;  %12081 = vst [vmem:[#allocation39_spill] sm:$0xff] %v10339_v52  ;;  %v3809_v48 = vsel %vm3795_vm6, %v12085_v39, %v7008_v10  ;;  %v10356_v52 = vmul.f32 %v11991_v60, %v4013_v45  ;;  %v12116_v12 = vunpack.i.l.bf16 %v12115_v42  ;;  %v12121_v42 = vunpack.i.h.bf16 %v12120_v35  ;;  %v12127_v35 = vld [vmem:[#allocation29_spill] sm:$0xff] }
 0x28d   :  { %12082 = vst [vmem:[#allocation145_spill] sm:$0xff] %v10342_v47  ;;  %12083 = vst [vmem:[#allocation146_spill] sm:$0xff] %v10345_v61  ;;  %v3957_v54 = vrot.slane %v3809_v48, %v7099_v23  ;;  %v7018_v61 = vunpack.i.l.bf16 %v10312_v37  ;;  %6486 = vmatpush1.bf16.xpose.msra.mxu0 %v6485_v62  ;;  %v12091_v48 = vld [vmem:[#allocation27_spill] sm:$0xff]  ;;  %v4309_v29 = vsel %vm4308_vm7, %v7023_v3, %v7024_v1  ;;  %v12094_v62 = vld [vmem:[#allocation45_spill] sm:$0xff]  ;;  %v12124_v31 = vunpack.i.l.bf16 %v12123_v0 }
 0x28e   :  { %12086 = vst [vmem:[#allocation107_spill] sm:$0xff] %v10352_v4  ;;  %12087 = vst [vmem:[#allocation93_spill] sm:$0xff] %v10356_v52  ;;  %v12092_v27 = vunpack.i.l.bf16 %v12091_v48  ;;  %v12095_v56 = vunpack.i.h.bf16 %v12094_v62  ;;  %v12096_v47 = vld [vmem:[#allocation76_spill] sm:$0xff]  ;;  %v12101_v62 = vld [vmem:[#allocation78_spill] sm:$0xff] }
 0x28f   :  { %12088 = vst [vmem:[#allocation86_spill] sm:$0xff] %v10361_v58  ;;  %v10364_v10 = vmul.f32 %v12076_v21, %v3957_v54  ;;  %v10367_v25 = vmul.f32 %v12079_v9, %v3957_v54  ;;  %v10374_v45 = vmul.f32 %v11988_v38, %v3957_v54  ;;  %v12097_v52 = vunpack.i.h.bf16 %v12096_v47  ;;  %v1782_v47 = vpop.permute.xlu1 %1781  ;;  %v12135_v38 = vld [vmem:[#allocation32_spill] sm:$0xff] }
 0x290   :  { %v793_v18 = vsel %vm781_vm0, %v756_v26, %v12092_v27  ;;  %v4310_v39 = vsel %vm4308_vm7, %v12095_v56, %v7023_v3  ;;  %v10387_v48 = vmul.f32 %v11991_v60, %v3957_v54  ;;  %v12102_v2 = vunpack.i.h.bf16 %v12101_v62 }
 0x291   :  { %12089 = vst [vmem:[#allocation6_spill] sm:$0xff] %v10364_v10  ;;  %12090 = vst [vmem:[#allocation139_spill] sm:$0xff] %v10367_v25  ;;  %v4329_v4 = vsel %vm4308_vm7, %v7024_v1, %v12097_v52  ;;  %v10390_v27 = vrot.slane %v4310_v39, %v7099_v23  ;;  %v10401_v56 = vrot.slane %v4309_v29, %v7099_v23  ;;  %v12105_v52 = vld [vmem:[#allocation71_spill] sm:$0xff] }
 0x292   :  { %12093 = vst [vmem:[#allocation40_spill] sm:$0xff] %v10374_v45  ;;  %12098 = vst [vmem:[#allocation12_spill] sm:$0xff] %v10387_v48  ;;  %v12100_v45 = vunpack.i.h.bf16 %v10312_v37  ;;  %v4322_v3 = vsel %vm4308_vm7, %v12102_v2, %v7018_v61  ;;  %v10404_v1 = vrot.slane %v4329_v4, %v7099_v23  ;;  %v12106_v54 = vunpack.i.h.bf16 %v12105_v52  ;;  %v12108_v2 = vld [vmem:[#allocation28_spill] sm:$0xff]  ;;  %v12118_v25 = vld [vmem:[#allocation43_spill] sm:$0xff] }
 0x293   :  { %12099 = vst [vmem:[#allocation79_spill] sm:$0xff] %v10390_v27  ;;  %12103 = vst [vmem:[#allocation60_spill] sm:$0xff] %v10401_v56  ;;  %v955_v48 = vrot.slane %v793_v18, %v7099_v23  ;;  %v12110_v27 = vld [vmem:[#allocation108_spill] sm:$0xff] }
 0x294   :  { %v4321_v32 = vsel %vm4308_vm7, %v7018_v61, %v12100_v45  ;;  %12104 = vst [vmem:[#allocation59_spill] sm:$0xff] %v10404_v1  ;;  %v794_v39 = vsel %vm781_vm0, %v12106_v54, %v756_v26  ;;  %v10412_v45 = vrot.slane %v4322_v3, %v7099_v23  ;;  %v12109_v61 = vunpack.i.l.bf16 %v12108_v2  ;;  %v12113_v26 = vld [vmem:[#allocation26_spill] sm:$0xff]  ;;  %v12114_v54 = vld [vmem:[#allocation25_spill] sm:$0xff]  ;;  %v1269_v2 = vpop.permute.xlu0 %1268 }
 0x295   :  { %v951_v62 = vrot.slane %v794_v39, %v7099_v23  ;;  %v12111_v4 = vunpack.i.h.bf16 %v12110_v27  ;;  %v10424_v1 = vrot.slane %v4321_v32, %v7099_v23  ;;  %v1009_v18 = vmul.f32 %v12113_v26, %v955_v48 }
 0x296   :  { %12107 = vst [vmem:[#allocation75_spill] sm:$0xff] %v10412_v45  ;;  %v281_v29 = vsel %vm269_vm1, %v242_v50, %v12109_v61  ;;  %v1030_v3 = vmul.f32 %v12114_v54, %v955_v48  ;;  %vm12117_vm0 = vcmp.lt.s32.totalorder %v7304_v15, 1  ;;  %v1051_v45 = vmul.f32 %v12118_v25, %v955_v48 }
 0x297   :  { %v282_v52 = vsel %vm269_vm1, %v12111_v4, %v242_v50  ;;  %12112 = vst [vmem:[#allocation136_spill] sm:$0xff] %v10424_v1  ;;  %v1819_v39 = vsel %vm12117_vm0, %v1782_v47, %v12116_v12  ;;  %v1008_v61 = vmul.f32 %v12113_v26, %v951_v62  ;;  %v1029_v27 = vmul.f32 %v12114_v54, %v951_v62  ;;  %v12119_v50 = vld [vmem:[#allocation42_spill] sm:$0xff]  ;;  %vm12122_vm1 = vmmov %vm12117_vm0 }
 0x298   :  { %v1072_v4 = vmul.f32 %v12119_v50, %v955_v48  ;;  %v1050_v32 = vmul.f32 %v12118_v25, %v951_v62  ;;  %v438_v10 = vrot.slane %v282_v52, %v7099_v23  ;;  %v442_v46 = vrot.slane %v281_v29, %v7099_v23  ;;  %v3259_v48 = vpop.permute.xlu1 %3258  ;;  %v12126_v52 = vld [vmem:[#allocation30_spill] sm:$0xff] }
 0x299   :  { %v1820_v12 = vsel %vm12122_vm1, %v12121_v42, %v1782_v47  ;;  %v1071_v17 = vmul.f32 %v12119_v50, %v951_v62  ;;  %v1981_v54 = vrot.slane %v1819_v39, %v7099_v23  ;;  %v1306_v25 = vsel %vm12125_vm12, %v1269_v2, %v12124_v31  ;;  %v12128_v42 = vld [vmem:[#allocation38_spill] sm:$0xff]  ;;  %v12130_v31 = vld [vmem:[#allocation20_spill] sm:$0xff] }
 0x29a   :  { %v1977_v26 = vrot.slane %v1820_v12, %v7099_v23  ;;  %v495_v14 = vmul.f32 %v12126_v52, %v438_v10  ;;  %v496_v29 = vmul.f32 %v12126_v52, %v442_v46  ;;  %v516_v19 = vmul.f32 %v12127_v35, %v438_v10  ;;  %v12129_v12 = vld [vmem:[#allocation37_spill] sm:$0xff]  ;;  %v12133_v52 = vld [vmem:[#allocation63_spill] sm:$0xff] }
 0x29b   :  { %v517_v47 = vmul.f32 %v12127_v35, %v442_v46  ;;  %v537_v62 = vmul.f32 %v12128_v42, %v438_v10  ;;  %v538_v50 = vmul.f32 %v12128_v42, %v442_v46  ;;  %v558_v39 = vmul.f32 %v12129_v12, %v438_v10 }
 0x29c   :  { %v559_v0 = vmul.f32 %v12129_v12, %v442_v46  ;;  %v1092_v53 = vadd.f32 %v1008_v61, %v495_v14  ;;  %v1093_v56 = vadd.f32 %v1009_v18, %v496_v29  ;;  %v12131_v44 = vunpack.i.h.bf16 %v12130_v31  ;;  %v12136_v18 = vld [vmem:[#allocation31_spill] sm:$0xff]  ;;  %v12138_v31 = vld [vmem:[#allocation53_spill] sm:$0xff] }
 0x29d   :  { %v12134_v30 = vunpack.i.l.bf16 %v12133_v52  ;;  %v1113_v59 = vadd.f32 %v1029_v27, %v516_v19  ;;  %v1114_v1 = vadd.f32 %v1030_v3, %v517_v47  ;;  %v1134_v63 = vadd.f32 %v1050_v32, %v537_v62  ;;  %v12140_v32 = vld [vmem:[#allocation18_spill] sm:$0xff]  ;;  %v12141_v62 = vld [vmem:[#allocation24_spill] sm:$0xff] }
 0x29e   :  { %v1307_v20 = vsel %vm12132_vm13, %v12131_v44, %v1269_v2  ;;  %v1135_v42 = vadd.f32 %v1051_v45, %v538_v50  ;;  %v1155_v60 = vadd.f32 %v1071_v17, %v558_v39  ;;  %v1156_v10 = vadd.f32 %v1072_v4, %v559_v0  ;;  %v12137_v44 = vld [vmem:[#allocation54_spill] sm:$0xff]  ;;  %v12142_v50 = vld [vmem:[#allocation23_spill] sm:$0xff]  ;;  %v12143_v39 = vld [vmem:[#allocation49_spill] sm:$0xff] }
 0x29f   :  { %v3293_v35 = vsel %vm3282_vm5, %v3259_v48, %v12134_v30  ;;  %v2034_v46 = vmul.f32 %v12135_v38, %v1977_v26  ;;  %v2035_v14 = vmul.f32 %v12135_v38, %v1981_v54  ;;  %v2055_v61 = vmul.f32 %v12136_v18, %v1977_v26 }
 0x2a0   :  { %v2056_v29 = vmul.f32 %v12136_v18, %v1981_v54  ;;  %v2076_v2 = vmul.f32 %v12137_v44, %v1977_v26  ;;  %v2077_v12 = vmul.f32 %v12137_v44, %v1981_v54  ;;  %v2097_v30 = vmul.f32 %v12138_v31, %v1977_v26 }
 0x2a1   :  { %v1464_v19 = vrot.slane %v1307_v20, %v7099_v23  ;;  %v1468_v45 = vrot.slane %v1306_v25, %v7099_v23  ;;  %v12139_v17 = vunpack.i.h.bf16 %v10193_v11  ;;  %v2098_v38 = vmul.f32 %v12138_v31, %v1981_v54  ;;  %v12144_v54 = vld [vmem:[#allocation48_spill] sm:$0xff] }
 0x2a2   :  { %v3456_v4 = vrot.slane %v3293_v35, %v7099_v23  ;;  %v2426_v47 = vrot.slane %v12140_v32, %v7099_v23  ;;  %v2746_v35 = vpop.permute.xlu0 %2745 }
 0x2a3   :  { %v3294_v3 = vsel %vm3282_vm5, %v12139_v17, %v3259_v48  ;;  %v1521_v26 = vmul.f32 %v12141_v62, %v1464_v19  ;;  %v1522_v20 = vmul.f32 %v12141_v62, %v1468_v45  ;;  %v1542_v25 = vmul.f32 %v12142_v50, %v1464_v19 }
 0x2a4   :  { %v3452_v27 = vrot.slane %v3294_v3, %v7099_v23  ;;  %v1543_v11 = vmul.f32 %v12142_v50, %v1468_v45  ;;  %v1563_v0 = vmul.f32 %v12143_v39, %v1464_v19  ;;  %v1564_v48 = vmul.f32 %v12143_v39, %v1468_v45  ;;  %v12145_v50 = vld [vmem:[#allocation3_spill] sm:$0xff] }
 0x2a5   :  { %v1584_v52 = vmul.f32 %v12144_v54, %v1464_v19  ;;  %v1585_v18 = vmul.f32 %v12144_v54, %v1468_v45  ;;  %v1605_v44 = vadd.f32 %v1521_v26, %v1092_v53  ;;  %v1606_v31 = vadd.f32 %v1522_v20, %v1093_v56 }
 0x2a6   :  { %v1626_v17 = vadd.f32 %v1542_v25, %v1113_v59  ;;  %v1627_v3 = vadd.f32 %v1543_v11, %v1114_v1  ;;  %v1647_v32 = vadd.f32 %v1563_v0, %v1134_v63  ;;  %v1648_v58 = vadd.f32 %v1564_v48, %v1135_v42 }
 0x2a7   :  { %v1668_v62 = vadd.f32 %v1584_v52, %v1155_v60  ;;  %v1669_v9 = vadd.f32 %v1585_v18, %v1156_v10  ;;  %v2118_v21 = vadd.f32 %v2034_v46, %v1605_v44  ;;  %v2119_v41 = vadd.f32 %v2035_v14, %v1606_v31  ;;  %v3772_v52 = vpop.permute.xlu0 %3771 }
 0x2a8   :  { %v2430_v36 = vrot.slane %v12145_v50, %v7099_v23  ;;  %v12147_v39 = vunpack.i.l.bf16 %v12146_v43  ;;  %v2139_v45 = vadd.f32 %v2055_v61, %v1626_v17  ;;  %v2140_v54 = vadd.f32 %v2056_v29, %v1627_v3  ;;  %v12151_v17 = vld [vmem:[#allocation80_spill] sm:$0xff] }
 0x2a9   :  { %v2160_v53 = vadd.f32 %v2076_v2, %v1647_v32  ;;  %v2161_v56 = vadd.f32 %v2077_v12, %v1648_v58  ;;  %v2181_v59 = vadd.f32 %v2097_v30, %v1668_v62  ;;  %v2182_v1 = vadd.f32 %v2098_v38, %v1669_v9  ;;  %v4285_v38 = vpop.permute.xlu1 %4284 }
 0x2aa   :  { %v2780_v19 = vsel %vm2769_vm4, %v2746_v35, %v12147_v39  ;;  %v3509_v63 = vmul.f32 %v12040_v40, %v3452_v27  ;;  %v10500_v60 = vmul.f32 %v12040_v40, %v3456_v4  ;;  %v3530_v42 = vmul.f32 %v12042_v13, %v3452_v27 }
 0x2ab   :  { %v10504_v10 = vmul.f32 %v12042_v13, %v3456_v4  ;;  %v3551_v43 = vmul.f32 %v11984_v24, %v3452_v27  ;;  %v10508_v46 = vmul.f32 %v11984_v24, %v3456_v4  ;;  %v3572_v14 = vmul.f32 %v11987_v5, %v3452_v27 }
 0x2ac   :  { %v10512_v58 = vmul.f32 %v11987_v5, %v3456_v4  ;;  %v2483_v9 = vmul.f32 %v11608_v6, %v2426_v47  ;;  %v2484_v61 = vmul.f32 %v11608_v6, %v2430_v36  ;;  %v2504_v29 = vmul.f32 %v11610_v33, %v2426_v47 }
 0x2ad   :  { %12148 = vst [vmem:[#allocation126_spill] sm:$0xff] %v10508_v46  ;;  %v2505_v2 = vmul.f32 %v11610_v33, %v2430_v36  ;;  %v2525_v12 = vmul.f32 %v11982_v22, %v2426_v47  ;;  %v2526_v30 = vmul.f32 %v11982_v22, %v2430_v36  ;;  %v2546_v26 = vmul.f32 %v11983_v8, %v2426_v47 }
 0x2ae   :  { %12149 = vst [vmem:[#allocation74_spill] sm:$0xff] %v10512_v58  ;;  %v2547_v27 = vmul.f32 %v11983_v8, %v2430_v36  ;;  %v2567_v20 = vadd.f32 %v2483_v9, %v2118_v21  ;;  %v2568_v4 = vadd.f32 %v2484_v61, %v2119_v41  ;;  %v2588_v25 = vadd.f32 %v2504_v29, %v2139_v45 }
 0x2af   :  { %v2589_v11 = vadd.f32 %v2505_v2, %v2140_v54  ;;  %v2609_v0 = vadd.f32 %v2525_v12, %v2160_v53  ;;  %v2610_v48 = vadd.f32 %v2526_v30, %v2161_v56  ;;  %v12150_v18 = vunpack.i.h.bf16 %v10120_v16 }
 0x2b0   :  { %v2943_v31 = vrot.slane %v2780_v19, %v7099_v23  ;;  %v12152_v3 = vunpack.i.l.bf16 %v12151_v17  ;;  %v12153_v36 = vunpack.i.h.bf16 %v10312_v37  ;;  %v2630_v21 = vadd.f32 %v2546_v26, %v2181_v59  ;;  %v12154_v19 = vld [vmem:[#allocation73_spill] sm:$0xff] }
 0x2b1   :  { %v2781_v44 = vsel %vm2769_vm4, %v12150_v18, %v2746_v35  ;;  %v2631_v32 = vadd.f32 %v2547_v27, %v2182_v1  ;;  %v12155_v45 = vunpack.i.l.bf16 %v12154_v19 }
 0x2b2   :  { %v4319_v47 = vsel %vm4308_vm7, %v4285_v38, %v12152_v3  ;;  %v4320_v41 = vsel %vm4308_vm7, %v12153_v36, %v4285_v38  ;;  %v2939_v62 = vrot.slane %v2781_v44, %v7099_v23  ;;  %v2997_v35 = vmul.f32 %v12008_v49, %v2943_v31 }
 0x2b3   :  { %v4478_v16 = vrot.slane %v4320_v41, %v7099_v23  ;;  %v3018_v50 = vmul.f32 %v12009_v7, %v2943_v31  ;;  %v10540_v39 = vrot.slane %v4319_v47, %v7099_v23  ;;  %v3806_v37 = vsel %vm3795_vm6, %v3772_v52, %v12155_v45  ;;  %v12168_v41 = vld [vmem:[#allocation57_spill] sm:$0xff]  ;;  %v12173_v45 = vld [vmem:[#allocation19_spill] sm:$0xff] }
 0x2b4   :  { %v2996_v54 = vmul.f32 %v12008_v49, %v2939_v62  ;;  %v3017_v53 = vmul.f32 %v12009_v7, %v2939_v62  ;;  %v3038_v56 = vmul.f32 %v12010_v57, %v2939_v62  ;;  %v3059_v59 = vmul.f32 %v12014_v55, %v2939_v62 }
 0x2b5   :  { %v3039_v1 = vmul.f32 %v12010_v57, %v2943_v31  ;;  %v3060_v9 = vmul.f32 %v12014_v55, %v2943_v31  ;;  %v10552_v61 = vadd.f32 %v2997_v35, %v2568_v4  ;;  %v10554_v29 = vadd.f32 %v3018_v50, %v2589_v11  ;;  %v12161_v55 = vld [vmem:[#allocation96_spill] sm:$0xff]  ;;  %v12163_v11 = vld [vmem:[#allocation103_spill] sm:$0xff]  ;;  %v12165_v31 = vld [vmem:[#allocation9_spill] sm:$0xff] }
 0x2b6   :  { %v3080_v2 = vadd.f32 %v2996_v54, %v2567_v20  ;;  %v3101_v12 = vadd.f32 %v3017_v53, %v2588_v25  ;;  %v3122_v30 = vadd.f32 %v3038_v56, %v2609_v0  ;;  %v3143_v38 = vadd.f32 %v3059_v59, %v2630_v21  ;;  %v12171_v50 = vld [vmem:[#allocation94_spill] sm:$0xff] }
 0x2b7   :  { %v10556_v26 = vadd.f32 %v3039_v1, %v2610_v48  ;;  %v10558_v49 = vadd.f32 %v3060_v9, %v2631_v32  ;;  %v10561_v7 = vmul.f32 %v11952_v51, %v4478_v16  ;;  %v10564_v27 = vmul.f32 %v11955_v28, %v4478_v16 }
 0x2b8   :  { %v10567_v57 = vmul.f32 %v11992_v34, %v4478_v16  ;;  %v10570_v4 = vmul.f32 %v12161_v55, %v4478_v16  ;;  %v3593_v20 = vadd.f32 %v3509_v63, %v3080_v2  ;;  %v3614_v25 = vadd.f32 %v3530_v42, %v3101_v12  ;;  %v12167_v42 = vld [vmem:[#allocation4_spill] sm:$0xff]  ;;  %v12170_v16 = vld [vmem:[#allocation86_spill] sm:$0xff] }
 0x2b9   :  { %12156 = vst [vmem:[#allocation87_spill] sm:$0xff] %v10556_v26  ;;  %12157 = vst [vmem:[#allocation137_spill] sm:$0xff] %v10558_v49  ;;  %v12164_v0 = vunpack.i.h.bf16 %v12163_v11  ;;  %v3969_v18 = vrot.slane %v3806_v37, %v7099_v23  ;;  %v5059_v44 = vadd.s32 640, %v7304_v15  ;;  %v10580_v17 = vrot.slane %v12165_v31, %v7099_v23  ;;  %v12179_v11 = vld [vmem:[#allocation35_spill] sm:$0xff]  ;;  %v12189_v49 = vld [vmem:[#allocation60_spill] sm:$0xff] }
 0x2ba   :  { %12158 = vst [vmem:[#allocation97_spill] sm:$0xff] %v10561_v7  ;;  %12159 = vst [vmem:[#allocation127_spill] sm:$0xff] %v10564_v27  ;;  %v10582_v3 = vadd.f32 %v3551_v43, %v3122_v30  ;;  %v10584_v47 = vadd.f32 %v3572_v14, %v3143_v38  ;;  %v3508_v36 = vmul.f32 %v12040_v40, %v12167_v42  ;;  %v12178_v30 = vld [vmem:[#allocation15_spill] sm:$0xff] }
 0x2bb   :  { %12160 = vst [vmem:[#allocation58_spill] sm:$0xff] %v10567_v57  ;;  %12162 = vst [vmem:[#allocation138_spill] sm:$0xff] %v10570_v4  ;;  %v3807_v48 = vsel %vm3795_vm6, %v12164_v0, %v3772_v52  ;;  %v10590_v21 = vmul.f32 %v12168_v41, %v3969_v18  ;;  %v12169_v52 = vld [vmem:[#allocation56_spill] sm:$0xff]  ;;  %v3529_v62 = vmul.f32 %v12042_v13, %v12167_v42  ;;  %v5080_v53 = vcvt.s32.f32 %v5059_v44  ;;  %v12184_v57 = vld [vmem:[#allocation34_spill] sm:$0xff] }
 0x2bc   :  { %12166 = vst [vmem:[#allocation89_spill] sm:$0xff] %v10584_v47  ;;  %v3965_v63 = vrot.slane %v3807_v48, %v7099_v23  ;;  %v10593_v32 = vmul.f32 %v12169_v52, %v3969_v18  ;;  %v4021_v43 = vmul.f32 %v12168_v41, %v12170_v16  ;;  %v10602_v19 = vmul.f32 %v12171_v50, %v3969_v18  ;;  %v12180_v48 = vld [vmem:[#allocation123_spill] sm:$0xff]  ;;  %v12181_v44 = vld [vmem:[#allocation136_spill] sm:$0xff] }
 0x2bd   :  { %v10605_v37 = vmul.f32 %v12173_v45, %v3969_v18  ;;  %v2482_v56 = vmul.f32 %v11608_v6, %v10580_v17  ;;  %v2503_v59 = vmul.f32 %v11610_v33, %v10580_v17  ;;  %v4042_v12 = vmul.f32 %v12169_v52, %v12170_v16  ;;  %v12193_v27 = vld [vmem:[#allocation7_spill] sm:$0xff] }
 0x2be   :  { %v4022_v14 = vmul.f32 %v12168_v41, %v3965_v63  ;;  %v4043_v35 = vmul.f32 %v12169_v52, %v3965_v63  ;;  %12172 = vst [vmem:[#allocation16_spill] sm:$0xff] %v10602_v19  ;;  %v10608_v54 = vmul.f32 %v12171_v50, %v3965_v63  ;;  %v10615_v1 = vmul.f32 %v12173_v45, %v3965_v63 }
 0x2bf   :  { %12174 = vst [vmem:[#allocation10_spill] sm:$0xff] %v10605_v37  ;;  %v5105_v38 = vsub.f32 %v5080_v53, %v12178_v30  ;;  %v2566_v0 = vadd.f32 %v2482_v56, %v12179_v11  ;;  %v2587_v18 = vadd.f32 %v2503_v59, %v12180_v48  ;;  %v4534_v31 = vmul.f32 %v11952_v51, %v12181_v44  ;;  %v12185_v11 = vld [vmem:[#allocation95_spill] sm:$0xff] }
 0x2c0   :  { %12175 = vst [vmem:[#allocation82_spill] sm:$0xff] %v10615_v1  ;;  %v10617_v9 = vadd.f32 %v4022_v14, %v3593_v20  ;;  %v10619_v2 = vadd.f32 %v4043_v35, %v3614_v25  ;;  %v4555_v63 = vmul.f32 %v11955_v28, %v12181_v44  ;;  %v5071_v20 = vadd.s32 2176, %v7304_v15  ;;  %v12182_v25 = vld [vmem:[#allocation17_spill] sm:$0xff]  ;;  %v12183_v35 = vld [vmem:[#allocation68_spill] sm:$0xff] }
 0x2c1   :  { %v10633_v14 = vrot.slane %v12182_v25, %v7099_v23  ;;  %v3520_v4 = vmul.f32 %v12040_v40, %v12183_v35  ;;  %v5126_v53 = vadd.f32 0.5, %v5105_v38  ;;  %v3079_v56 = vadd.f32 %v12184_v57, %v2566_v0  ;;  %v12186_v23 = vld [vmem:[#allocation135_spill] sm:$0xff] }
 0x2c2   :  { %12176 = vst [vmem:[#allocation102_spill] sm:$0xff] %v10617_v9  ;;  %12177 = vst [vmem:[#allocation8_spill] sm:$0xff] %v10619_v2  ;;  %v3100_v59 = vadd.f32 %v12185_v11, %v2587_v18  ;;  %v3541_v48 = vmul.f32 %v12042_v13, %v12183_v35  ;;  %v5092_v37 = vcvt.s32.f32 %v5071_v20  ;;  %v4033_v25 = vmul.f32 %v12168_v41, %v12186_v23  ;;  %v12187_v18 = vld [vmem:[#allocation111_spill] sm:$0xff]  ;;  %v12188_v20 = vld [vmem:[#allocation62_spill] sm:$0xff] }
 0x2c3   :  { %v2494_v19 = vmul.f32 %v11608_v6, %v10633_v14  ;;  %v2515_v1 = vmul.f32 %v11610_v33, %v10633_v14  ;;  %v5147_v47 = vmul.f32 0.055555556, %v5126_v53  ;;  %v3592_v40 = vadd.f32 %v3508_v36, %v3079_v56  ;;  %v12191_v56 = vld [vmem:[#allocation21_spill] sm:$0xff] }
 0x2c4   :  { %v3613_v58 = vadd.f32 %v3529_v62, %v3100_v59  ;;  %v4054_v57 = vmul.f32 %v12169_v52, %v12186_v23  ;;  %v5117_v0 = vsub.f32 %v5092_v37, %v12178_v30  ;;  %v4546_v6 = vmul.f32 %v11952_v51, %v12189_v49  ;;  %v12190_v62 = vld [vmem:[#allocation124_spill] sm:$0xff]  ;;  %v12194_v2 = vld [vmem:[#allocation13_spill] sm:$0xff] }
 0x2c5   :  { %v2578_v13 = vadd.f32 %v2494_v19, %v12187_v18  ;;  %v2599_v11 = vadd.f32 %v2515_v1, %v12188_v20  ;;  %v5168_v46 = vfloor.f32 %v5147_v47  ;;  %v4105_v33 = vadd.f32 %v4021_v43, %v3592_v40 }
 0x2c6   :  { %v4126_v26 = vadd.f32 %v4042_v12, %v3613_v58  ;;  %v4567_v41 = vmul.f32 %v11955_v28, %v12189_v49  ;;  %v5138_v36 = vadd.f32 0.5, %v5117_v0  ;;  %v5058_v37 = vadd.s32 512, %v7304_v15  ;;  %v12192_v58 = vld [vmem:[#allocation77_spill] sm:$0xff] }
 0x2c7   :  { %v3091_v53 = vadd.f32 %v12190_v62, %v2578_v13  ;;  %v3112_v52 = vadd.f32 %v12191_v56, %v2599_v11  ;;  %v5189_v59 = vmul.f32 18.0, %v5168_v46  ;;  %vm5231_vm4 = vcmp.ge.f32.partialorder %v5168_v46, 1.0  ;;  %v12195_v62 = vld [vmem:[#allocation81_spill] sm:$0xff] }
 0x2c8   :  { %vm5252_vm5 = vcmp.le.f32.partialorder %v5168_v46, 16.0  ;;  %v4618_v19 = vadd.f32 %v4534_v31, %v4105_v33  ;;  %v4639_v1 = vadd.f32 %v4555_v63, %v4126_v26  ;;  %v5159_v18 = vmul.f32 0.055555556, %v5138_v36 }
 0x2c9   :  { %v3604_v20 = vadd.f32 %v3520_v4, %v3091_v53  ;;  %v3625_v47 = vadd.f32 %v3541_v48, %v3112_v52  ;;  %v5210_v43 = vsub.f32 %v5105_v38, %v5189_v59  ;;  %vm5273_vm6 = vmand %vm5231_vm4, %vm5252_vm5  ;;  %v5079_v40 = vcvt.s32.f32 %v5058_v37  ;;  %v12199_v53 = vld [vmem:[#allocation6_spill] sm:$0xff]  ;;  %v12200_v37 = vld [vmem:[#allocation75_spill] sm:$0xff] }
 0x2ca   :  { %v4894_v12 = vadd.f32 %v12192_v58, %v4618_v19  ;;  %v3591_v13 = vadd.f32 %v12194_v2, %v12193_v27  ;;  %v4915_v11 = vadd.f32 %v12195_v62, %v4639_v1  ;;  %v5180_v56 = vfloor.f32 %v5159_v18  ;;  %v12196_v27 = vld [vmem:[#allocation33_spill] sm:$0xff]  ;;  %v12197_v2 = vld [vmem:[#allocation115_spill] sm:$0xff] }
 0x2cb   :  { %v4117_v7 = vadd.f32 %v4033_v25, %v3604_v20  ;;  %v4138_v9 = vadd.f32 %v4054_v57, %v3625_v47  ;;  %vm5294_vm7 = vcmp.ge.f32.partialorder %v5210_v43, 1.0  ;;  %vm5336_vm14 = vcmp.le.f32.partialorder %v5210_v43, 16.0 }
 0x2cc   :  { %v4978_v46 = vmax.f32 %v4894_v12, 0.0  ;;  %v5104_v26 = vsub.f32 %v5079_v40, %v12178_v30  ;;  %vm5315_vm15 = vmand %vm5273_vm6, %vm5294_vm7  ;;  %v4999_v4 = vmax.f32 %v4915_v11, 0.0  ;;  %v5201_v38 = vmul.f32 18.0, %v5180_v56  ;;  %v12203_v11 = vld [vmem:[#allocation67_spill] sm:$0xff] }
 0x2cd   :  { %vm5243_vm8 = vcmp.ge.f32.partialorder %v5180_v56, 1.0  ;;  %vm5264_vm2 = vcmp.le.f32.partialorder %v5180_v56, 16.0  ;;  %vm5357_vm3 = vmand %vm5315_vm15, %vm5336_vm14  ;;  %v4630_v31 = vadd.f32 %v4546_v6, %v4117_v7  ;;  %v4651_v63 = vadd.f32 %v4567_v41, %v4138_v9  ;;  %v12201_v9 = vld [vmem:[#allocation139_spill] sm:$0xff] }
 0x2ce   :  { %v5125_v48 = vadd.f32 0.5, %v5104_v26  ;;  %v3612_v33 = vadd.f32 %v12197_v2, %v12196_v27  ;;  %v12198_v36 = vmov 1.0   ;;  %v6439_v25 = vpack.c.bf16 %v4999_v4, %v4978_v46  ;;  %vm5285_vm9 = vmand %vm5243_vm8, %vm5264_vm2  ;;  %v12204_v46 = vld [vmem:[#allocation140_spill] sm:$0xff]  ;;  %v12205_v4 = vld [vmem:[#allocation134_spill] sm:$0xff] }
 0x2cf   :  { %6278 = vmatprep.mubr.msk.f32.mxu1 %vm5357_vm3, %v12198_v36  ;;  %v5222_v57 = vsub.f32 %v5117_v0, %v5201_v38  ;;  %v4104_v52 = vadd.f32 %v12199_v53, %v3591_v13  ;;  %v4533_v59 = vmul.f32 %v11952_v51, %v12200_v37  ;;  %v4906_v19 = vadd.f32 %v12192_v58, %v4630_v31  ;;  %v12202_v13 = vld [vmem:[#allocation129_spill] sm:$0xff]  ;;  %v12207_v53 = vld [vmem:[#allocation106_spill] sm:$0xff] }
 0x2d0   :  { %v4927_v1 = vadd.f32 %v12195_v62, %v4651_v63  ;;  %v5146_v7 = vmul.f32 0.055555556, %v5125_v48  ;;  %v4125_v6 = vadd.f32 %v12201_v9, %v3612_v33  ;;  %6440 = vmatprep.subr.bf16.mxu1 %v6439_v25  ;;  %v4554_v41 = vmul.f32 %v11955_v28, %v12200_v37  ;;  %v12206_v33 = vld [vmem:[#allocation91_spill] sm:$0xff] }
 0x2d1   :  { %vm5306_vm10 = vcmp.ge.f32.partialorder %v5222_v57, 1.0  ;;  %vm5348_vm11 = vcmp.le.f32.partialorder %v5222_v57, 16.0  ;;  %v4617_v0 = vadd.f32 %v4533_v59, %v4104_v52  ;;  %v4990_v18 = vmax.f32 %v4906_v19, 0.0  ;;  %v12208_v59 = vld [vmem:[#allocation79_spill] sm:$0xff] }
 0x2d2   :  { %vm5327_vm0 = vmand %vm5285_vm9, %vm5306_vm10  ;;  %v5011_v20 = vmax.f32 %v4927_v1, 0.0  ;;  %v5167_v47 = vfloor.f32 %v5146_v7  ;;  %v5070_v43 = vadd.s32 2048, %v7304_v15  ;;  %v4638_v12 = vadd.f32 %v4554_v41, %v4125_v6 }
 0x2d3   :  { %vm5369_vm1 = vmand %vm5327_vm0, %vm5348_vm11  ;;  %v4893_v40 = vadd.f32 %v12192_v58, %v4617_v0  ;;  %v3603_v56 = vadd.f32 %v12203_v11, %v12202_v13  ;;  %v3624_v38 = vadd.f32 %v12205_v4, %v12204_v46  ;;  %v4545_v19 = vmul.f32 %v11952_v51, %v12208_v59  ;;  %v12211_v4 = vld [vmem:[#allocation22_spill] sm:$0xff] }
 0x2d4   :  { %6290 = vmatprep.mubr.msk.f32.mxu0 %vm5369_vm1, %v12198_v36  ;;  %v6487_v31 = vpack.c.bf16 %v5011_v20, %v4990_v18  ;;  %v5188_v63 = vmul.f32 18.0, %v5167_v47  ;;  %vm5230_vm12 = vcmp.ge.f32.partialorder %v5167_v47, 1.0  ;;  %vm5251_vm13 = vcmp.le.f32.partialorder %v5167_v47, 16.0  ;;  %v12209_v47 = vld [vmem:[#allocation121_spill] sm:$0xff] }
 0x2d5   :  { %v4914_v48 = vadd.f32 %v12195_v62, %v4638_v12  ;;  %v4977_v27 = vmax.f32 %v4893_v40, 0.0  ;;  %v5091_v2 = vcvt.s32.f32 %v5070_v43  ;;  %v4116_v25 = vadd.f32 %v12206_v33, %v3603_v56  ;;  %vm5272_vm4 = vmand %vm5230_vm12, %vm5251_vm13  ;;  %v12210_v12 = vld [vmem:[#allocation116_spill] sm:$0xff] }
 0x2d6   :  { %6488 = vmatprep.subr.bf16.mxu0 %v6487_v31  ;;  %v5209_v57 = vsub.f32 %v5104_v26, %v5188_v63  ;;  %v4137_v52 = vadd.f32 %v12207_v53, %v3624_v38  ;;  %v4566_v1 = vmul.f32 %v11955_v28, %v12208_v59  ;;  %v2524_v6 = vmul.f32 %v11982_v22, %v10580_v17  ;;  %v12212_v31 = vld [vmem:[#allocation104_spill] sm:$0xff] }
 0x2d7   :  { %v4998_v7 = vmax.f32 %v4914_v48, 0.0  ;;  %v5116_v9 = vsub.f32 %v5091_v2, %v12178_v30  ;;  %v2545_v41 = vmul.f32 %v11983_v8, %v10580_v17  ;;  %v4629_v26 = vadd.f32 %v4545_v19, %v4116_v25 }
 0x2d8   :  { %vm5293_vm5 = vcmp.ge.f32.partialorder %v5209_v57, 1.0  ;;  %vm5335_vm6 = vcmp.le.f32.partialorder %v5209_v57, 16.0  ;;  %v4650_v0 = vadd.f32 %v4566_v1, %v4137_v52  ;;  %v2608_v43 = vadd.f32 %v2524_v6, %v12209_v47 }
 0x2d9   :  { %vm5314_vm7 = vmand %vm5272_vm4, %vm5293_vm5  ;;  %v6441_v18 = vpack.c.bf16 %v4998_v7, %v4977_v27  ;;  %v5137_v20 = vadd.f32 0.5, %v5116_v9  ;;  %v2629_v40 = vadd.f32 %v2545_v41, %v12210_v12  ;;  %v4905_v13 = vadd.f32 %v12192_v58, %v4629_v26  ;;  %v12215_v12 = vld [vmem:[#allocation64_spill] sm:$0xff] }
 0x2da   :  { %vm5356_vm14 = vmand %vm5314_vm7, %vm5335_vm6  ;;  %v4926_v11 = vadd.f32 %v12195_v62, %v4650_v0  ;;  %v3550_v56 = vmul.f32 %v11984_v24, %v12167_v42  ;;  %v3571_v17 = vmul.f32 %v11987_v5, %v12167_v42  ;;  %v3121_v38 = vadd.f32 %v12211_v4, %v2608_v43  ;;  %v12213_v0 = vld [vmem:[#allocation117_spill] sm:$0xff]  ;;  %v12220_v4 = vld [vmem:[#allocation83_spill] sm:$0xff] }
 0x2db   :  { %6279 = vmatmul.mubr.msk.f32.vlgmr.msra.gmra.mrb[0].mxu1 %vm5356_vm14, %v12198_v36  ;;  %v5158_v46 = vmul.f32 0.055555556, %v5137_v20  ;;  %v3142_v63 = vadd.f32 %v12212_v31, %v2629_v40  ;;  %v4063_v48 = vmul.f32 %v12171_v50, %v12170_v16  ;;  %v4989_v27 = vmax.f32 %v4905_v13, 0.0  ;;  %v12214_v20 = vld [vmem:[#allocation11_spill] sm:$0xff] }
 0x2dc   :  { %6442 = vmatpush1.bf16.xpose.msra.mxu1 %v6441_v18  ;;  %v5010_v2 = vmax.f32 %v4926_v11, 0.0  ;;  %v4084_v33 = vmul.f32 %v12173_v45, %v12170_v16  ;;  %v4576_v25 = vmul.f32 %v11992_v34, %v12181_v44  ;;  %v3634_v57 = vadd.f32 %v3550_v56, %v3121_v38  ;;  %v12216_v13 = vld [vmem:[#allocation99_spill] sm:$0xff] }
 0x2dd   :  { %v5179_v42 = vfloor.f32 %v5158_v46  ;;  %v3655_v53 = vadd.f32 %v3571_v17, %v3142_v63  ;;  %v4597_v52 = vmul.f32 %v12161_v55, %v12181_v44  ;;  %v2536_v1 = vmul.f32 %v11982_v22, %v10633_v14  ;;  %v12221_v63 = vld [vmem:[#allocation65_spill] sm:$0xff] }
 0x2de   :  { %v6489_v19 = vpack.c.bf16 %v5010_v2, %v4989_v27  ;;  %v2557_v7 = vmul.f32 %v11983_v8, %v10633_v14  ;;  %v3562_v6 = vmul.f32 %v11984_v24, %v12183_v35  ;;  %v4147_v41 = vadd.f32 %v4063_v48, %v3634_v57  ;;  %v12222_v48 = vld [vmem:[#allocation128_spill] sm:$0xff] }
 0x2df   :  { %v5200_v16 = vmul.f32 18.0, %v5179_v42  ;;  %vm5242_vm15 = vcmp.ge.f32.partialorder %v5179_v42, 1.0  ;;  %vm5263_vm8 = vcmp.le.f32.partialorder %v5179_v42, 16.0  ;;  %v4168_v26 = vadd.f32 %v4084_v33, %v3655_v53  ;;  %v12223_v57 = vld [vmem:[#allocation40_spill] sm:$0xff] }
 0x2e0   :  { %v2620_v18 = vadd.f32 %v2536_v1, %v12213_v0  ;;  %v2641_v47 = vadd.f32 %v2557_v7, %v12214_v20  ;;  %v3583_v44 = vmul.f32 %v11987_v5, %v12183_v35  ;;  %vm5284_vm2 = vmand %vm5242_vm15, %vm5263_vm8  ;;  %v4660_v22 = vadd.f32 %v4576_v25, %v4147_v41  ;;  %v12217_v5 = vld [vmem:[#allocation101_spill] sm:$0xff]  ;;  %v12227_v41 = vld [vmem:[#allocation92_spill] sm:$0xff] }
 0x2e1   :  { %v5221_v43 = vsub.f32 %v5116_v9, %v5200_v16  ;;  %v4075_v8 = vmul.f32 %v12171_v50, %v12186_v23  ;;  %v4096_v24 = vmul.f32 %v12173_v45, %v12186_v23  ;;  %v4681_v14 = vadd.f32 %v4597_v52, %v4168_v26  ;;  %v12218_v50 = vld [vmem:[#allocation98_spill] sm:$0xff]  ;;  %v12219_v23 = vld [vmem:[#allocation105_spill] sm:$0xff]  ;;  %v12224_v52 = vld [vmem:[#allocation12_spill] sm:$0xff] }
 0x2e2   :  { %v3133_v40 = vadd.f32 %v12215_v12, %v2620_v18  ;;  %v3154_v11 = vadd.f32 %v12216_v13, %v2641_v47  ;;  %v4588_v56 = vmul.f32 %v11992_v34, %v12189_v49  ;;  %v4936_v35 = vadd.f32 %v12217_v5, %v4660_v22  ;;  %v12225_v7 = vld [vmem:[#allocation133_spill] sm:$0xff] }
 0x2e3   :  { %vm5305_vm3 = vcmp.ge.f32.partialorder %v5221_v43, 1.0  ;;  %vm5347_vm9 = vcmp.le.f32.partialorder %v5221_v43, 16.0  ;;  %v4609_v9 = vmul.f32 %v12161_v55, %v12189_v49  ;;  %v4957_v17 = vadd.f32 %v12218_v50, %v4681_v14  ;;  %v12228_v26 = vld [vmem:[#allocation5_spill] sm:$0xff] }
 0x2e4   :  { %vm5326_vm10 = vmand %vm5284_vm2, %vm5305_vm3  ;;  %v3646_v46 = vadd.f32 %v3562_v6, %v3133_v40  ;;  %v3667_v45 = vadd.f32 %v3583_v44, %v3154_v11  ;;  %v3633_v38 = vadd.f32 %v12220_v4, %v12219_v23  ;;  %v5020_v31 = vmax.f32 %v4936_v35, 0.0  ;;  %v12226_v6 = vld [vmem:[#allocation14_spill] sm:$0xff]  ;;  %v12229_v22 = vld [vmem:[#allocation145_spill] sm:$0xff] }
 0x2e5   :  { %vm5368_vm11 = vmand %vm5326_vm10, %vm5347_vm9  ;;  %v3654_v27 = vadd.f32 %v12222_v48, %v12221_v63  ;;  %v4575_v2 = vmul.f32 %v11992_v34, %v12200_v37  ;;  %v4596_v33 = vmul.f32 %v12161_v55, %v12200_v37  ;;  %v5041_v49 = vmax.f32 %v4957_v17, 0.0 }
 0x2e6   :  { %6291 = vmatmul.mubr.msk.f32.vlgmr.msra.gmra.mrb[0].mxu0 %vm5368_vm11, %v12198_v36  ;;  %v4159_v25 = vadd.f32 %v4075_v8, %v3646_v46  ;;  %v4180_v42 = vadd.f32 %v4096_v24, %v3667_v45  ;;  %v4146_v53 = vadd.f32 %v12223_v57, %v3633_v38  ;;  %v3645_v16 = vadd.f32 %v12226_v6, %v12225_v7  ;;  %v12230_v24 = vld [vmem:[#allocation107_spill] sm:$0xff]  ;;  %v12235_v6 = vld [vmem:[#allocation120_spill] sm:$0xff] }
 0x2e7   :  { %6490 = vmatpush1.bf16.xpose.msra.mxu0 %v6489_v19  ;;  %v4167_v1 = vadd.f32 %v12224_v52, %v3654_v27  ;;  %v3666_v0 = vadd.f32 %v12228_v26, %v12227_v41  ;;  %v4587_v18 = vmul.f32 %v11992_v34, %v12208_v59  ;;  %v6443_v37 = vpack.c.bf16 %v5041_v49, %v5020_v31  ;;  %v12231_v27 = vld [vmem:[#allocation132_spill] sm:$0xff]  ;;  %v12236_v41 = vld [vmem:[#allocation39_spill] sm:$0xff] }
 0x2e8   :  { %v4672_v20 = vadd.f32 %v4588_v56, %v4159_v25  ;;  %v4693_v47 = vadd.f32 %v4609_v9, %v4180_v42  ;;  %v4659_v44 = vadd.f32 %v4575_v2, %v4146_v53  ;;  %v4158_v8 = vadd.f32 %v12229_v22, %v3645_v16  ;;  %v12232_v2 = vld [vmem:[#allocation148_spill] sm:$0xff]  ;;  %v12234_v25 = vld [vmem:[#allocation131_spill] sm:$0xff] }
 0x2e9   :  { %v4680_v43 = vadd.f32 %v4596_v33, %v4167_v1  ;;  %v4179_v19 = vadd.f32 %v12230_v24, %v3666_v0  ;;  %v4608_v14 = vmul.f32 %v12161_v55, %v12208_v59  ;;  %6444 = vmatprep.subr.bf16.mxu1 %v6443_v37  ;;  %v5073_v11 = vadd.s32 2432, %v7304_v15  ;;  %v12233_v49 = vld [vmem:[#allocation88_spill] sm:$0xff]  ;;  %v12237_v0 = vld [vmem:[#allocation59_spill] sm:$0xff] }
 0x2ea   :  { %v4948_v12 = vadd.f32 %v12217_v5, %v4672_v20  ;;  %v4969_v40 = vadd.f32 %v12218_v50, %v4693_v47  ;;  %v4935_v13 = vadd.f32 %v12217_v5, %v4659_v44  ;;  %v4671_v35 = vadd.f32 %v4587_v18, %v4158_v8 }
 0x2eb   :  { %v4956_v56 = vadd.f32 %v12218_v50, %v4680_v43  ;;  %v4692_v9 = vadd.f32 %v4608_v14, %v4179_v19  ;;  %v5094_v23 = vcvt.s32.f32 %v5073_v11  ;;  %v5072_v31 = vadd.s32 2304, %v7304_v15 }
 0x2ec   :  { %v5032_v17 = vmax.f32 %v4948_v12, 0.0  ;;  %v5053_v46 = vmax.f32 %v4969_v40, 0.0  ;;  %v5019_v45 = vmax.f32 %v4935_v13, 0.0  ;;  %v4947_v59 = vadd.f32 %v12217_v5, %v4671_v35 }
 0x2ed   :  { %v5040_v4 = vmax.f32 %v4956_v56, 0.0  ;;  %v4968_v38 = vadd.f32 %v12218_v50, %v4692_v9  ;;  %v5119_v48 = vsub.f32 %v5094_v23, %v12178_v30  ;;  %v3605_v33 = vadd.f32 %v12232_v2, %v12231_v27 }
 0x2ee   :  { %v6491_v63 = vpack.c.bf16 %v5053_v46, %v5032_v17  ;;  %v3626_v42 = vadd.f32 %v12234_v25, %v12233_v49  ;;  %v5031_v53 = vmax.f32 %v4947_v59, 0.0  ;;  %v5093_v1 = vcvt.s32.f32 %v5072_v31  ;;  %v12238_v59 = vld [vmem:[#allocation102_spill] sm:$0xff]  ;;  %v12242_v25 = vld [vmem:[#allocation8_spill] sm:$0xff] }
 0x2ef   :  { %v6445_v57 = vpack.c.bf16 %v5040_v4, %v5019_v45  ;;  %v5052_v52 = vmax.f32 %v4968_v38, 0.0  ;;  %v5140_v7 = vadd.f32 0.5, %v5119_v48  ;;  %v4118_v16 = vadd.f32 %v12235_v6, %v3605_v33  ;;  %v12239_v38 = vld [vmem:[#allocation97_spill] sm:$0xff]  ;;  %v12245_v6 = vld [vmem:[#allocation126_spill] sm:$0xff] }
 0x2f0   :  { %6492 = vmatprep.subr.bf16.mxu0 %v6491_v63  ;;  %v4139_v26 = vadd.f32 %v12236_v41, %v3626_v42  ;;  %v4547_v18 = vmul.f32 %v11952_v51, %v12237_v0  ;;  %v5118_v20 = vsub.f32 %v5093_v1, %v12178_v30  ;;  %v4568_v47 = vmul.f32 %v11955_v28, %v12237_v0  ;;  %v12243_v42 = vld [vmem:[#allocation127_spill] sm:$0xff] }
 0x2f1   :  { %6446 = vmatpush1.bf16.xpose.msra.mxu1 %v6445_v57  ;;  %v6493_v37 = vpack.c.bf16 %v5052_v52, %v5031_v53  ;;  %v5061_v44 = vadd.s32 896, %v7304_v15  ;;  %v5161_v43 = vmul.f32 0.055555556, %v5140_v7  ;;  %v3594_v8 = vadd.f32 %v10500_v60, %v10552_v61  ;;  %v12244_v7 = vld [vmem:[#allocation87_spill] sm:$0xff] }
 0x2f2   :  { %v4631_v22 = vadd.f32 %v4547_v18, %v4118_v16  ;;  %v3615_v24 = vadd.f32 %v10504_v10, %v10554_v29  ;;  %v10783_v19 = vadd.f32 %v10608_v54, %v10582_v3  ;;  %v5139_v14 = vadd.f32 0.5, %v5118_v20 }
 0x2f3   :  { %6494 = vmatpush1.bf16.xpose.msra.mxu0 %v6493_v37  ;;  %v4652_v12 = vadd.f32 %v4568_v47, %v4139_v26  ;;  %v5082_v40 = vcvt.s32.f32 %v5061_v44  ;;  %v5182_v13 = vfloor.f32 %v5161_v43  ;;  %v7037_v11 = vmov 0.0|0.0   ;;  %v12246_v44 = vld [vmem:[#allocation137_spill] sm:$0xff]  ;;  %v12247_v43 = vld [vmem:[#allocation74_spill] sm:$0xff] }
 0x2f4   :  { %6495 = vmatprep.subr.bf16.mxu0 %v7037_v11  ;;  %v4907_v56 = vadd.f32 %v12192_v58, %v4631_v22  ;;  %v4107_v35 = vadd.f32 %v10590_v21, %v3594_v8  ;;  %v4128_v60 = vadd.f32 %v10593_v32, %v3615_v24  ;;  %v5160_v61 = vmul.f32 0.055555556, %v5139_v14  ;;  %v12248_v8 = vld [vmem:[#allocation89_spill] sm:$0xff]  ;;  %v12249_v24 = vld [vmem:[#allocation82_spill] sm:$0xff] }
 0x2f5   :  { %v4928_v10 = vadd.f32 %v12195_v62, %v4652_v12  ;;  %v5107_v29 = vsub.f32 %v5082_v40, %v12178_v30  ;;  %v4536_v3 = vmul.f32 %v11952_v51, %v10540_v39  ;;  %v5203_v54 = vmul.f32 18.0, %v5182_v13  ;;  %v12250_v40 = vld [vmem:[#allocation16_spill] sm:$0xff] }
 0x2f6   :  { %vm5245_vm0 = vcmp.ge.f32.partialorder %v5182_v13, 1.0  ;;  %vm5266_vm1 = vcmp.le.f32.partialorder %v5182_v13, 16.0  ;;  %v4557_v9 = vmul.f32 %v11955_v28, %v10540_v39  ;;  %v5181_v17 = vfloor.f32 %v5160_v61 }
 0x2f7   :  { %v4991_v46 = vmax.f32 %v4907_v56, 0.0  ;;  %v5128_v45 = vadd.f32 0.5, %v5107_v29  ;;  %v4620_v21 = vadd.f32 %v4536_v3, %v4107_v35  ;;  %v5224_v23 = vsub.f32 %v5119_v48, %v5203_v54  ;;  %vm5287_vm12 = vmand %vm5245_vm0, %vm5266_vm1  ;;  %v12253_v54 = vld [vmem:[#allocation130_spill] sm:$0xff] }
 0x2f8   :  { %v4641_v32 = vadd.f32 %v4557_v9, %v4128_v60  ;;  %v5060_v4 = vadd.s32 768, %v7304_v15  ;;  %v4619_v31 = vadd.f32 %v12239_v38, %v12238_v59  ;;  %v5202_v63 = vmul.f32 18.0, %v5181_v17  ;;  %v12256_v59 = vld [vmem:[#allocation146_spill] sm:$0xff] }
 0x2f9   :  { %vm5244_vm13 = vcmp.ge.f32.partialorder %v5181_v17, 1.0  ;;  %vm5265_vm4 = vcmp.le.f32.partialorder %v5181_v17, 16.0  ;;  %v5012_v51 = vmax.f32 %v4928_v10, 0.0  ;;  %vm5308_vm5 = vcmp.ge.f32.partialorder %v5224_v23, 1.0 }
 0x2fa   :  { %vm5350_vm6 = vcmp.le.f32.partialorder %v5224_v23, 16.0  ;;  %vm10798_vm7 = vmand %vm5244_vm13, %vm5265_vm4  ;;  %v5149_v27 = vmul.f32 0.055555556, %v5128_v45  ;;  %v4896_v48 = vadd.f32 %v12192_v58, %v4620_v21  ;;  %v5223_v2 = vsub.f32 %v5118_v20, %v5202_v63  ;;  %v12254_v21 = vld [vmem:[#allocation113_spill] sm:$0xff]  ;;  %v12255_v23 = vld [vmem:[#allocation66_spill] sm:$0xff] }
 0x2fb   :  { %vm5329_vm14 = vmand %vm5287_vm12, %vm5308_vm5  ;;  %v4917_v33 = vadd.f32 %v12195_v62, %v4641_v32  ;;  %v5081_v49 = vcvt.s32.f32 %v5060_v4  ;;  %v4640_v57 = vadd.f32 %v12243_v42, %v12242_v25  ;;  %v4895_v1 = vadd.f32 %v12192_v58, %v4619_v31 }
 0x2fc   :  { %vm5371_vm15 = vmand %vm5329_vm14, %vm5350_vm6  ;;  %v5170_v53 = vfloor.f32 %v5149_v27  ;;  %v4980_v52 = vmax.f32 %v4896_v48, 0.0  ;;  %v3636_v16 = vadd.f32 %v12245_v6, %v12244_v7  ;;  %vm5307_vm8 = vcmp.ge.f32.partialorder %v5223_v2, 1.0  ;;  %v12258_v48 = vld [vmem:[#allocation58_spill] sm:$0xff] }
 0x2fd   :  { %6292 = vmatprep.mubr.msk.f32.mxu0 %vm5371_vm15, %v12198_v36  ;;  %vm5349_vm2 = vcmp.le.f32.partialorder %v5223_v2, 16.0  ;;  %v5001_v41 = vmax.f32 %v4917_v33, 0.0  ;;  %v5106_v26 = vsub.f32 %v5081_v49, %v12178_v30  ;;  %vm5328_vm3 = vmand %vm10798_vm7, %vm5307_vm8  ;;  %v6496_v18 = vpack.c.bf16 %v5012_v51, %v4991_v46  ;;  %v12257_v51 = vld [vmem:[#allocation93_spill] sm:$0xff] }
 0x2fe   :  { %v5191_v37 = vmul.f32 18.0, %v5170_v53  ;;  %vm5233_vm9 = vcmp.ge.f32.partialorder %v5170_v53, 1.0  ;;  %vm5254_vm10 = vcmp.le.f32.partialorder %v5170_v53, 16.0  ;;  %vm5370_vm11 = vmand %vm5328_vm3, %vm5349_vm2  ;;  %v4916_v47 = vadd.f32 %v12195_v62, %v4640_v57  ;;  %v12251_v62 = vld [vmem:[#allocation10_spill] sm:$0xff] }
 0x2ff   :  { %v6447_v20 = vpack.c.bf16 %v5001_v41, %v4980_v52  ;;  %v5127_v58 = vadd.f32 0.5, %v5106_v26  ;;  %v3657_v22 = vadd.f32 %v12247_v43, %v12246_v44  ;;  %v4169_v14 = vadd.f32 %v12249_v24, %v12248_v8  ;;  %6293 = vmatmul.mubr.msk.f32.vlgmr.msra.gmra.mrb[0].mxu0 %vm5370_vm11, %v12198_v36  ;;  %vm5275_vm0 = vmand %vm5233_vm9, %vm5254_vm10 }
 0x300   :  { %v5212_v12 = vsub.f32 %v5107_v29, %v5191_v37  ;;  %v4149_v13 = vadd.f32 %v12250_v40, %v3636_v16  ;;  %v4578_v56 = vmul.f32 %v11992_v34, %v10540_v39  ;;  %6497 = vmatpush3.bf16.xpose.msra.mxu0 %v6496_v18  ;;  %v4979_v60 = vmax.f32 %v4895_v1, 0.0  ;;  %v12252_v29 = vld [vmem:[#allocation119_spill] sm:$0xff] }
 0x301   :  { %6448 = vmatprep.subr.bf16.mxu1 %v6447_v20  ;;  %v5148_v35 = vmul.f32 0.055555556, %v5127_v58  ;;  %v4170_v61 = vadd.f32 %v12251_v62, %v3657_v22  ;;  %v4599_v10 = vmul.f32 %v12161_v55, %v10540_v39  ;;  %6498 = vmatprep.subr.bf16.mxu0 %v7037_v11  ;;  %v3647_v9 = vadd.f32 %v12253_v54, %v12252_v29  ;;  %v7025_v54 = vld [vmem:[%s10881_s3] sm:$0xff]  }
 0x302   :  { %vm5296_vm1 = vcmp.ge.f32.partialorder %v5212_v12, 1.0  ;;  %vm5338_vm12 = vcmp.le.f32.partialorder %v5212_v12, 16.0  ;;  %v4662_v3 = vadd.f32 %v4578_v56, %v4149_v13  ;;  %v5000_v46 = vmax.f32 %v4916_v47, 0.0 }
 0x303   :  { %vm5317_vm13 = vmand %vm5275_vm0, %vm5296_vm1  ;;  %v5169_v17 = vfloor.f32 %v5148_v35  ;;  %v4683_v45 = vadd.f32 %v4599_v10, %v4170_v61  ;;  %v3668_v32 = vadd.f32 %v12255_v23, %v12254_v21  ;;  %v4160_v39 = vadd.f32 %v12256_v59, %v3647_v9 }
 0x304   :  { %vm5359_vm4 = vmand %vm5317_vm13, %vm5338_vm12  ;;  %v4938_v4 = vadd.f32 %v12217_v5, %v4662_v3  ;;  %v4589_v38 = vmul.f32 %v11992_v34, %v12237_v0  ;;  %v4610_v11 = vmul.f32 %v12161_v55, %v12237_v0  ;;  %v4661_v2 = vadd.f32 %v12258_v48, %v10783_v19  ;;  %v12259_v34 = vld [vmem:[#allocation138_spill] sm:$0xff] }
 0x305   :  { %6280 = vmatprep.mubr.msk.f32.mxu1 %vm5359_vm4, %v12198_v36  ;;  %v5190_v31 = vmul.f32 18.0, %v5169_v17  ;;  %vm5232_vm5 = vcmp.ge.f32.partialorder %v5169_v17, 1.0  ;;  %vm5253_vm6 = vcmp.le.f32.partialorder %v5169_v17, 16.0  ;;  %v4959_v63 = vadd.f32 %v12218_v50, %v4683_v45  ;;  %v7026_v17 = vld [vmem:[%s10881_s3 + $0x8] sm:$0xff]  }
 0x306   :  { %v4181_v28 = vadd.f32 %v12257_v51, %v3668_v32  ;;  %v4673_v27 = vadd.f32 %v4589_v38, %v4160_v39  ;;  %vm5274_vm7 = vmand %vm5232_vm5, %vm5253_vm6  ;;  %v5022_v49 = vmax.f32 %v4938_v4, 0.0  ;;  %v4682_v25 = vadd.f32 %v12259_v34, %v4169_v14  ;;  %v6295_v39 = vld [vmem:[%s10882_s4] ss:$0 sm:$0xff] }
 0x307   :  { %v5211_v33 = vsub.f32 %v5106_v26, %v5190_v31  ;;  %v5043_v42 = vmax.f32 %v4959_v63, 0.0  ;;  %v6449_v57 = vpack.c.bf16 %v5000_v46, %v4979_v60  ;;  %vm11265_vm8 = vmmov 0  }
 0x308   :  { %v4694_v55 = vadd.f32 %v4610_v11, %v4181_v28  ;;  %v4949_v0 = vadd.f32 %v12217_v5, %v4673_v27  ;;  %v7039_v53 = vmov 0.0   ;;  %v5074_v1 = vadd.s32 2560, %v7304_v15 }
 0x309   :  { %vm5295_vm14 = vcmp.ge.f32.partialorder %v5211_v33, 1.0  ;;  %vm5337_vm15 = vcmp.le.f32.partialorder %v5211_v33, 16.0  ;;  %6404 = vmatprep.mubr.msk.f32.mxu0 %vm11265_vm8, %v7039_v53  ;;  %v4937_v7 = vadd.f32 %v12217_v5, %v4661_v2  ;;  %v4958_v6 = vadd.f32 %v12218_v50, %v4682_v25 }
 0x30a   :  { %vm5316_vm2 = vmand %vm5274_vm7, %vm5295_vm14  ;;  %v4970_v19 = vadd.f32 %v12218_v50, %v4694_v55  ;;  %v5033_v52 = vmax.f32 %v4949_v0, 0.0  ;;  %v5063_v16 = vadd.s32 1152, %v7304_v15  ;;  %v5062_v41 = vadd.s32 1024, %v7304_v15 }
 0x30b   :  { %vm5358_vm3 = vmand %vm5316_vm2, %vm5337_vm15  ;;  %v6451_v26 = vpack.c.bf16 %v5043_v42, %v5022_v49  ;;  %v5095_v37 = vcvt.s32.f32 %v5074_v1  ;;  %v5021_v43 = vmax.f32 %v4937_v7, 0.0  ;;  %v5042_v5 = vmax.f32 %v4958_v6, 0.0 }
 0x30c   :  { %6281 = vmatmul.mubr.msk.f32.vlgmr.msra.gmra.mrb[0].mxu1 %vm5358_vm3, %v12198_v36  ;;  %v5054_v18 = vmax.f32 %v4970_v19, 0.0  ;;  %v5084_v20 = vcvt.s32.f32 %v5063_v16  ;;  %v5083_v58 = vcvt.s32.f32 %v5062_v41 }
 0x30d   :  { %6450 = vmatpush1.bf16.xpose.msra.mxu1 %v6449_v57  ;;  %v5120_v44 = vsub.f32 %v5095_v37, %v12178_v30  ;;  %v6453_v12 = vpack.c.bf16 %v5042_v5, %v5021_v43 }
 0x30e   :  { %6452 = vmatprep.subr.bf16.mxu1 %v6451_v26  ;;  %v6499_v47 = vpack.c.bf16 %v5054_v18, %v5033_v52  ;;  %v5109_v50 = vsub.f32 %v5084_v20, %v12178_v30  ;;  %v5108_v22 = vsub.f32 %v5083_v58, %v12178_v30 }
 0x30f   :  { %v5141_v15 = vadd.f32 0.5, %v5120_v44 }
 0x310   :  { %6500 = vmatpush3.bf16.xpose.msra.mxu0 %v6499_v47  ;;  %v5130_v8 = vadd.f32 0.5, %v5109_v50  ;;  %v5129_v24 = vadd.f32 0.5, %v5108_v22 }
 0x311   :  { %v5162_v14 = vmul.f32 0.055555556, %v5141_v15 }
 0x312   :  { %v5151_v40 = vmul.f32 0.055555556, %v5130_v8  ;;  %v5150_v13 = vmul.f32 0.055555556, %v5129_v24 }
 0x313   :  { %v5183_v56 = vfloor.f32 %v5162_v14 }
 0x314   :  { %v5172_v35 = vfloor.f32 %v5151_v40  ;;  %v5171_v60 = vfloor.f32 %v5150_v13 }
 0x315   :  { %6454 = vmatpush1.bf16.xpose.msra.mxu1 %v6453_v12  ;;  %v5204_v62 = vmul.f32 18.0, %v5183_v56  ;;  %vm5246_vm9 = vcmp.ge.f32.partialorder %v5183_v56, 1.0  ;;  %vm5267_vm10 = vcmp.le.f32.partialorder %v5183_v56, 16.0 }
 0x316   :  { %6407 = vmatprep.subr.bf16.mxu1 %v7039_v53  ;;  %v5193_v61 = vmul.f32 18.0, %v5172_v35  ;;  %vm5235_vm11 = vcmp.ge.f32.partialorder %v5172_v35, 1.0  ;;  %vm5256_vm0 = vcmp.le.f32.partialorder %v5172_v35, 16.0  ;;  %v5192_v30 = vmul.f32 18.0, %v5171_v60  ;;  %vm5288_vm1 = vmand %vm5246_vm9, %vm5267_vm10 }
 0x317   :  { %v5225_v10 = vsub.f32 %v5120_v44, %v5204_v62  ;;  %vm5234_vm12 = vcmp.ge.f32.partialorder %v5171_v60, 1.0  ;;  %vm5255_vm13 = vcmp.le.f32.partialorder %v5171_v60, 16.0  ;;  %vm5277_vm4 = vmand %vm5235_vm11, %vm5256_vm0  ;;  %vm6187_vm9 = vcmask 261120  }
 0x318   :  { %v5214_v3 = vsub.f32 %v5109_v50, %v5193_v61  ;;  %v5213_v29 = vsub.f32 %v5108_v22, %v5192_v30  ;;  %vm5276_vm7 = vmand %vm5234_vm12, %vm5255_vm13  ;;  %v6192_v9 = vsel %vm6187_vm9, %v7025_v54, 0  ;;  %vm12260_vm13 = vmmov 0  }
 0x319   :  { %vm5309_vm5 = vcmp.ge.f32.partialorder %v5225_v10, 1.0  ;;  %vm5351_vm6 = vcmp.le.f32.partialorder %v5225_v10, 16.0  ;;  %v6195_v46 = vsel %vm6187_vm9, %v7026_v17, 0 }
 0x31a   :  { %vm5330_vm14 = vmand %vm5288_vm1, %vm5309_vm5  ;;  %vm5298_vm15 = vcmp.ge.f32.partialorder %v5214_v3, 1.0  ;;  %vm5340_vm2 = vcmp.le.f32.partialorder %v5214_v3, 16.0  ;;  %vm5297_vm8 = vcmp.ge.f32.partialorder %v5213_v29, 1.0  ;;  %vm5339_vm0 = vcmp.le.f32.partialorder %v5213_v29, 16.0 }
 0x31b   :  { %vm5372_vm3 = vmand %vm5330_vm14, %vm5351_vm6 }
 0x31c   :  { %6405 = vmatmul.mubr.msk.f32.vlgmr.msra.gmra.mrb[0].mxu0 %vm5372_vm3, %v12198_v36  ;;  %vm5319_vm10 = vmand %vm5277_vm4, %vm5298_vm15 }
 0x31d   :  { %vm5361_vm11 = vmand %vm5319_vm10, %vm5340_vm2 }
 0x31e   :  { %6282 = vmatprep.mubr.msk.f32.mxu1 %vm5361_vm11, %v12198_v36  ;;  %vm5318_vm12 = vmand %vm5276_vm7, %vm5297_vm8 }
 0x31f   :  { %vm5360_vm1 = vmand %vm5318_vm12, %vm5339_vm0 }
 0x320   :  { %6283 = vmatmul.mubr.msk.f32.vlgmr.msra.gmra.mrb[0].mxu1 %vm5360_vm1, %v12198_v36 }
 0x321   :  { %6408 = vmatpush3.bf16.xpose.msra.mxu1 %v6192_v9  ;;  %6411 = vmatprep.mubr.msk.bf16.mxu1 %vm12260_vm13, %v7039_v53 }
 0x322   :  { %6409 = vmatprep.subr.bf16.mxu1 %v7039_v53 }
 0x329   :  { %6410 = vmatpush3.bf16.xpose.msra.mxu1 %v6195_v46 }
 0x3ef   :  { %v6160_v45 = vpop.f32.mrb[0].mxu0 }
 0x3f0   :  { %v6406_v21 = vpop.f32.mrb[1].mxu0 }
 0x3f3   :  { %v5740_v23 = vpop.f32.mrb[0].mxu1 }
 0x3f4   :  { %v6501_v32 = vadd.f32 %v6160_v45, %v5740_v23  ;;  %v5742_v4 = vpop.f32.mrb[1].mxu1 }
 0x3f6   :  { %v6164_v59 = vmul.f32 0.00390625, %v6501_v32 }
 0x3f8   :  { %v6165_v36 = vpack.c.bf16 %v6164_v59, %v6164_v59 }
 0x3fa   :  { %6412 = vmatmul.mubr.msk.bf16.vlgmr.msra.gmra.mrb[4].mxu1 %vm6187_vm9, %v6165_v36 }
 0x4cd   :  { %v6231_v38 = vpop.f32.mrb[4].mxu1 }
 0x4ce   :  { %v6232_v11 = vadd.f32 %v6295_v39, %v6231_v38  ;;  %v6413_v31 = vpop.f32.mrb[5].mxu1 }
 0x4cf   :  { %v6234_v63 = vpop.f32.mrb[6].mxu1 }
 0x4d0   :  { %6237 = vst.msk [vmem:[%s10883_s5] sm:$0xff] %vm6187_vm9, %v6232_v11  ;;  %v6414_v51 = vpop.f32.mrb[7].mxu1 }

</bundles_post_ra>
